<compile_context>
chip_gen: v5e
topology: v5e:2x2
jax: 0.10.0
libtpu: 0.0.40
codegen_flags: <defaults>
</compile_context>

<pallas_src>
import jax
import jax.numpy as jnp
from jax import lax
from jax.experimental import pallas as pl
from jax.experimental.pallas import tpu as pltpu

N_EMBD = 256
BLOCK_SIZE = 4
N_HEAD = 4
HEAD_SIZE = N_EMBD // N_HEAD
LN_EPS = 1e-5
NEG_BIG = -1e30          # finite mask sentinel (avoids inf arithmetic)
ROWS_TARGET = 128        # rows per grid step (sweep result: 128 beats 256 —
                         # score/softmax work is O(rows^2), MXU still full)

_PARAM_ORDER = [
    "ln1_g", "ln1_b",
    "wqkv", "wproj", "bproj",
    "ln2_g", "ln2_b",
    "w1", "b1", "w2", "b2",
]


def _block_kernel(x_ref, mask_ref,
                  ln1_g_ref, ln1_b_ref,
                  wqkv_ref, wproj_ref, bproj_ref,
                  ln2_g_ref, ln2_b_ref,
                  w1_ref, b1_ref, w2_ref, b2_ref,
                  o_ref,
                  attn_ref):
    f32 = jnp.float32
    bf16 = jnp.bfloat16
    rows, C = x_ref.shape            # rows = B_TILE * T (flattened batch slab)

    x = x_ref[...].astype(f32)       # (rows, C)

    def layernorm(v, g, b):
        mu = jnp.mean(v, axis=-1, keepdims=True)
        var = jnp.mean((v - mu) ** 2, axis=-1, keepdims=True)
        return (v - mu) * lax.rsqrt(var + LN_EPS) * g + b

    # ---- self-attention branch ----
    h1 = layernorm(x, ln1_g_ref[...], ln1_b_ref[...])            # (rows, C) f32
    h1b = h1.astype(bf16)
    # Fused QKV projection; wq columns are pre-scaled by C**-0.5 in the wrapper.
    qkv = jnp.dot(h1b, wqkv_ref[...], preferred_element_type=f32)  # (rows, 3C)
    qkvb = qkv.astype(bf16)          # single bf16 copy; per-head views below

    # Precomputed block-diagonal causal additive mask (0 / NEG_BIG), f32.
    mask_bias = mask_ref[...]        # (rows, rows)

    for h in range(N_HEAD):          # static unroll over 4 heads
        qh = qkvb[:, h * HEAD_SIZE:(h + 1) * HEAD_SIZE]              # (rows, hs)
        kh = qkvb[:, C + h * HEAD_SIZE: C + (h + 1) * HEAD_SIZE]
        vh = qkvb[:, 2 * C + h * HEAD_SIZE: 2 * C + (h + 1) * HEAD_SIZE]
        # q @ k^T without materializing a transpose: contract the last dims.
        wei = lax.dot_general(qh, kh, (((1,), (1,)), ((), ())),
                              preferred_element_type=f32)            # (rows, rows)
        wei = wei + mask_bias
        wei = wei - jnp.max(wei, axis=-1, keepdims=True)
        e = jnp.exp(wei)
        inv = pl.reciprocal(jnp.sum(e, axis=-1, keepdims=True), approx=True)
        p = (e * inv).astype(bf16)                                    # softmax
        # TODO(synk): attention-weight dropout omitted (eval mode => identity)
        head_out = jnp.dot(p, vh, preferred_element_type=f32)        # (rows, hs)
        # Stage into (rows, C) scratch; one K=256 projection after the loop.
        attn_ref[:, h * HEAD_SIZE:(h + 1) * HEAD_SIZE] = head_out.astype(bf16)

    sa = jnp.dot(attn_ref[...], wproj_ref[...],
                 preferred_element_type=f32) + bproj_ref[...]

    x1 = x + sa                                                      # residual 1

    # ---- feed-forward branch ----
    h2 = layernorm(x1, ln2_g_ref[...], ln2_b_ref[...])
    ff = jnp.dot(h2.astype(bf16), w1_ref[...],
                 preferred_element_type=f32) + b1_ref[...]
    ff = jnp.maximum(ff, 0.0)                                        # ReLU
    ff = jnp.dot(ff.astype(bf16), w2_ref[...],
                 preferred_element_type=f32) + b2_ref[...]
    # TODO(synk): FFN output dropout omitted (eval mode => identity)

    o_ref[...] = (x1 + ff).astype(o_ref.dtype)


def transformer_block(x, params, *, rows_target=ROWS_TARGET):
    B, T, C = x.shape
    assert C == N_EMBD and T <= BLOCK_SIZE

    # Batch-tile: each grid step handles b_tile batch elements (~rows_target rows).
    b_tile = max(1, min(B, rows_target // T))
    # If the grid has several steps, keep the row tile a sublane multiple.
    while B > b_tile and (b_tile * T) % 8 != 0:
        b_tile += 1
    n_steps = pl.cdiv(B, b_tile)
    B_pad = n_steps * b_tile

    xp = x
    if B_pad != B:
        xp = jnp.pad(x, ((0, B_pad - B), (0, 0), (0, 0)))
    x2d = xp.reshape(B_pad * T, C)          # lane-dense (rows-total, C) slab

    rows = b_tile * T
    scale = float(C) ** -0.5                # C**-0.5 with C = n_embd (reference!)

    # Fused bf16 QKV weight (query columns pre-scaled) and bf16 matmul weights.
    wqkv = jnp.concatenate(
        [params["wq"] * scale, params["wk"], params["wv"]], axis=1
    ).astype(jnp.bfloat16)                  # (C, 3C)
    pk = {
        "ln1_g": params["ln1_g"], "ln1_b": params["ln1_b"],
        "wqkv": wqkv,
        "wproj": params["wproj"].astype(jnp.bfloat16),
        "bproj": params["bproj"],
        "ln2_g": params["ln2_g"], "ln2_b": params["ln2_b"],
        "w1": params["w1"].astype(jnp.bfloat16), "b1": params["b1"],
        "w2": params["w2"].astype(jnp.bfloat16), "b2": params["b2"],
    }

    # Additive block-diagonal causal mask over the flattened (b_tile*T) rows:
    # 0 where (same batch element AND key<=query), NEG_BIG elsewhere.
    r = jnp.arange(rows)
    allow = (r[:, None] // T == r[None, :] // T) & (r[:, None] >= r[None, :])
    mask_bias = jnp.where(allow, 0.0, NEG_BIG).astype(jnp.float32)   # (rows, rows)

    def const_spec(arr):
        nd = arr.ndim
        # Constant index_map: fetched once, stays VMEM-resident across steps.
        return pl.BlockSpec(arr.shape, lambda b, _nd=nd: (0,) * _nd)

    in_specs = ([pl.BlockSpec((rows, C), lambda b: (b, 0)),
                 const_spec(mask_bias)]
                + [const_spec(pk[name]) for name in _PARAM_ORDER])

    out2d = pl.pallas_call(
        _block_kernel,
        out_shape=jax.ShapeDtypeStruct((B_pad * T, C), x.dtype),
        grid=(n_steps,),
        in_specs=in_specs,
        out_specs=pl.BlockSpec((rows, C), lambda b: (b, 0)),
        scratch_shapes=[pltpu.VMEM((rows, C), jnp.bfloat16)],   # head-output slab
        compiler_params=pltpu.CompilerParams(
            dimension_semantics=("parallel",)),   # grid steps can shard across TCs
    )(x2d, mask_bias, *(pk[name] for name in _PARAM_ORDER))

    return out2d.reshape(B_pad, T, C)[:B]


def init_params(key):
    ks = jax.random.split(key, 8)
    s = 0.02
    return {
        "ln1_g": jnp.ones((1, N_EMBD), jnp.float32),
        "ln1_b": jnp.zeros((1, N_EMBD), jnp.float32),
        # per-head K/Q/V weights concatenated along output dim:
        # columns [h*HEAD_SIZE:(h+1)*HEAD_SIZE] belong to head h.
        "wq": s * jax.random.normal(ks[0], (N_EMBD, N_EMBD), jnp.float32),
        "wk": s * jax.random.normal(ks[1], (N_EMBD, N_EMBD), jnp.float32),
        "wv": s * jax.random.normal(ks[2], (N_EMBD, N_EMBD), jnp.float32),
        "wproj": s * jax.random.normal(ks[3], (N_EMBD, N_EMBD), jnp.float32),
        "bproj": s * jax.random.normal(ks[4], (1, N_EMBD), jnp.float32),
        "ln2_g": jnp.ones((1, N_EMBD), jnp.float32),
        "ln2_b": jnp.zeros((1, N_EMBD), jnp.float32),
        "w1": s * jax.random.normal(ks[5], (N_EMBD, 4 * N_EMBD), jnp.float32),
        "b1": s * jax.random.normal(ks[6], (1, 4 * N_EMBD), jnp.float32),
        "w2": s * jax.random.normal(ks[7], (4 * N_EMBD, N_EMBD), jnp.float32),
        "b2": jnp.zeros((1, N_EMBD), jnp.float32),
    }


def reference_block(x, p):
    """Pure-JAX f32 reference mirroring the PyTorch forward (eval mode)."""
    def ln(v, g, b):
        mu = v.mean(-1, keepdims=True)
        var = ((v - mu) ** 2).mean(-1, keepdims=True)
        return (v - mu) / jnp.sqrt(var + LN_EPS) * g + b

    B, T, C = x.shape
    h1 = ln(x, p["ln1_g"], p["ln1_b"])
    q, k, v = h1 @ p["wq"], h1 @ p["wk"], h1 @ p["wv"]
    mask = jnp.tril(jnp.ones((T, T), bool))
    outs = []
    for h in range(N_HEAD):
        sl = slice(h * HEAD_SIZE, (h + 1) * HEAD_SIZE)
        qh, kh, vh = q[..., sl], k[..., sl], v[..., sl]
        wei = jnp.einsum("btd,bsd->bts", qh, kh) * C ** (-0.5)
        wei = jnp.where(mask, wei, -jnp.inf)
        wei = jax.nn.softmax(wei, axis=-1)
        outs.append(jnp.einsum("bts,bsd->btd", wei, vh))
    sa = jnp.concatenate(outs, -1) @ p["wproj"] + p["bproj"]
    x1 = x + sa
    h2 = ln(x1, p["ln2_g"], p["ln2_b"])
    ff = jax.nn.relu(h2 @ p["w1"] + p["b1"]) @ p["w2"] + p["b2"]
    return x1 + ff


if __name__ == "__main__":
    key = jax.random.PRNGKey(0)
    k_x, k_p, k_x2 = jax.random.split(key, 3)
    params = init_params(k_p)

    # Small-shape check (B=2, T=4): single grid step of 8 rows.
    B, T = 2, BLOCK_SIZE
    x = jax.random.normal(k_x, (B, T, N_EMBD), jnp.float32)
    out = jax.block_until_ready(transformer_block(x, params))
    ref = reference_block(x, params)
    assert out.shape == (B, T, N_EMBD)
    # bf16 matmul inputs + approx reciprocal => relaxed tolerance vs f32 reference.
    assert jnp.allclose(out, ref, rtol=2e-2, atol=2e-2), "mismatch vs reference (B=2)"

    # Larger-batch check exercising the 128-row batched tile + block-diag mask
    # and a 2-step grid.
    B2 = 64
    x2 = jax.random.normal(k_x2, (B2, T, N_EMBD), jnp.float32)
    out2 = jax.block_until_ready(transformer_block(x2, params))
    ref2 = reference_block(x2, params)
    assert jnp.allclose(out2, ref2, rtol=2e-2, atol=2e-2), "mismatch vs reference (B=64)"

    print("KERNEL_OK")
</pallas_src>

<mosaic_0001>
module attributes {stable_mosaic.version = 11 : i64} {
  func.func @_block_kernel(%arg0: i32, %arg1: memref<8x256xf32, #tpu.memory_space<vmem>>, %arg2: memref<8x8xf32, #tpu.memory_space<vmem>>, %arg3: memref<1x256xf32, #tpu.memory_space<vmem>>, %arg4: memref<1x256xf32, #tpu.memory_space<vmem>>, %arg5: memref<256x768xbf16, #tpu.memory_space<vmem>>, %arg6: memref<256x256xbf16, #tpu.memory_space<vmem>>, %arg7: memref<1x256xf32, #tpu.memory_space<vmem>>, %arg8: memref<1x256xf32, #tpu.memory_space<vmem>>, %arg9: memref<1x256xf32, #tpu.memory_space<vmem>>, %arg10: memref<256x1024xbf16, #tpu.memory_space<vmem>>, %arg11: memref<1x1024xf32, #tpu.memory_space<vmem>>, %arg12: memref<1024x256xbf16, #tpu.memory_space<vmem>>, %arg13: memref<1x256xf32, #tpu.memory_space<vmem>>, %arg14: memref<8x256xf32, #tpu.memory_space<vmem>>, %arg15: memref<8x256xbf16, #tpu.memory_space<vmem>>) attributes {dimension_semantics = [#tpu.dimension_semantics<parallel>], iteration_bounds = array<i64: 1>, scalar_prefetch = 0 : i64, scratch_operands = 1 : i64, tpu.core_type = #tpu.core_type<tc>, window_params = [{transform_indices = @transform_0, window_bounds = array<i64: 8, 256>}, {pipeline_mode = #tpu.pipeline_mode<synchronous>, transform_indices = @transform_1, window_bounds = array<i64: 8, 8>}, {pipeline_mode = #tpu.pipeline_mode<synchronous>, transform_indices = @transform_2, window_bounds = array<i64: 1, 256>}, {pipeline_mode = #tpu.pipeline_mode<synchronous>, transform_indices = @transform_3, window_bounds = array<i64: 1, 256>}, {pipeline_mode = #tpu.pipeline_mode<synchronous>, transform_indices = @transform_4, window_bounds = array<i64: 256, 768>}, {pipeline_mode = #tpu.pipeline_mode<synchronous>, transform_indices = @transform_5, window_bounds = array<i64: 256, 256>}, {pipeline_mode = #tpu.pipeline_mode<synchronous>, transform_indices = @transform_6, window_bounds = array<i64: 1, 256>}, {pipeline_mode = #tpu.pipeline_mode<synchronous>, transform_indices = @transform_7, window_bounds = array<i64: 1, 256>}, {pipeline_mode = #tpu.pipeline_mode<synchronous>, transform_indices = @transform_8, window_bounds = array<i64: 1, 256>}, {pipeline_mode = #tpu.pipeline_mode<synchronous>, transform_indices = @transform_9, window_bounds = array<i64: 256, 1024>}, {pipeline_mode = #tpu.pipeline_mode<synchronous>, transform_indices = @transform_10, window_bounds = array<i64: 1, 1024>}, {pipeline_mode = #tpu.pipeline_mode<synchronous>, transform_indices = @transform_11, window_bounds = array<i64: 1024, 256>}, {pipeline_mode = #tpu.pipeline_mode<synchronous>, transform_indices = @transform_12, window_bounds = array<i64: 1, 256>}, {transform_indices = @transform_13, window_bounds = array<i64: 8, 256>}]} {
    %c0 = arith.constant 0 : index
    %c0_0 = arith.constant 0 : index
    %0 = vector.load %arg1[%c0, %c0_0] : memref<8x256xf32, #tpu.memory_space<vmem>>, vector<8x256xf32>
    %c0_1 = arith.constant 0 : index
    %c0_2 = arith.constant 0 : index
    %1 = vector.load %arg3[%c0_1, %c0_2] : memref<1x256xf32, #tpu.memory_space<vmem>>, vector<1x256xf32>
    %c0_3 = arith.constant 0 : index
    %c0_4 = arith.constant 0 : index
    %2 = vector.load %arg4[%c0_3, %c0_4] : memref<1x256xf32, #tpu.memory_space<vmem>>, vector<1x256xf32>
    %cst = arith.constant dense<0.000000e+00> : vector<8xf32>
    %3 = vector.multi_reduction <add>, %0, %cst [1] : vector<8x256xf32> to vector<8xf32>
    %4 = vector.shape_cast %3 : vector<8xf32> to vector<8x1xf32>
    %cst_5 = arith.constant 2.560000e+02 : f32
    %5 = vector.broadcast %cst_5 : f32 to vector<8x1xf32>
    %6 = arith.divf %4, %5 : vector<8x1xf32>
    %7 = vector.broadcast %6 : vector<8x1xf32> to vector<8x256xf32>
    %8 = arith.subf %0, %7 : vector<8x256xf32>
    %9 = arith.mulf %8, %8 : vector<8x256xf32>
    %cst_6 = arith.constant dense<0.000000e+00> : vector<8xf32>
    %10 = vector.multi_reduction <add>, %9, %cst_6 [1] : vector<8x256xf32> to vector<8xf32>
    %11 = vector.shape_cast %10 : vector<8xf32> to vector<8x1xf32>
    %cst_7 = arith.constant 2.560000e+02 : f32
    %12 = vector.broadcast %cst_7 : f32 to vector<8x1xf32>
    %13 = arith.divf %11, %12 : vector<8x1xf32>
    %14 = vector.broadcast %6 : vector<8x1xf32> to vector<8x256xf32>
    %15 = arith.subf %0, %14 : vector<8x256xf32>
    %cst_8 = arith.constant 9.99999974E-6 : f32
    %16 = vector.broadcast %cst_8 : f32 to vector<8x1xf32>
    %17 = arith.addf %13, %16 : vector<8x1xf32>
    %18 = math.rsqrt %17 : vector<8x1xf32>
    %19 = vector.broadcast %18 : vector<8x1xf32> to vector<8x256xf32>
    %20 = arith.mulf %15, %19 : vector<8x256xf32>
    %21 = vector.broadcast %1 : vector<1x256xf32> to vector<8x256xf32>
    %22 = arith.mulf %20, %21 : vector<8x256xf32>
    %23 = vector.broadcast %2 : vector<1x256xf32> to vector<8x256xf32>
    %24 = arith.addf %22, %23 : vector<8x256xf32>
    %25 = arith.truncf %24 : vector<8x256xf32> to vector<8x256xbf16>
    %c0_9 = arith.constant 0 : index
    %c0_10 = arith.constant 0 : index
    %26 = vector.load %arg5[%c0_9, %c0_10] : memref<256x768xbf16, #tpu.memory_space<vmem>>, vector<256x768xbf16>
    %cst_11 = arith.constant dense<0.000000e+00> : vector<8x768xf32>
    %27 = tpu.matmul %25, %26, %cst_11 {dimension_numbers = #tpu.dot_dimension_numbers<[1], [0], [0], [1], [0, 0, 1, 1], [], []>} : vector<8x256xbf16>, vector<256x768xbf16>, vector<8x768xf32> -> vector<8x768xf32>
    %28 = arith.truncf %27 : vector<8x768xf32> to vector<8x768xbf16>
    %c0_12 = arith.constant 0 : index
    %c0_13 = arith.constant 0 : index
    %29 = vector.load %arg2[%c0_12, %c0_13] : memref<8x8xf32, #tpu.memory_space<vmem>>, vector<8x8xf32>
    %30 = vector.extract_strided_slice %28 {offsets = [0, 0], sizes = [8, 64], strides = [1, 1]} : vector<8x768xbf16> to vector<8x64xbf16>
    %31 = vector.extract_strided_slice %28 {offsets = [0, 256], sizes = [8, 64], strides = [1, 1]} : vector<8x768xbf16> to vector<8x64xbf16>
    %32 = vector.extract_strided_slice %28 {offsets = [0, 512], sizes = [8, 64], strides = [1, 1]} : vector<8x768xbf16> to vector<8x64xbf16>
    %cst_14 = arith.constant dense<0.000000e+00> : vector<8x8xf32>
    %33 = tpu.matmul %30, %31, %cst_14 {dimension_numbers = #tpu.dot_dimension_numbers<[1], [1], [0], [0], [0, 0, 1, 0], [], []>} : vector<8x64xbf16>, vector<8x64xbf16>, vector<8x8xf32> -> vector<8x8xf32>
    %34 = arith.addf %33, %29 : vector<8x8xf32>
    %cst_15 = arith.constant dense<0xFF800000> : vector<8xf32>
    %35 = vector.multi_reduction <maximumf>, %34, %cst_15 [1] : vector<8x8xf32> to vector<8xf32>
    %36 = vector.shape_cast %35 : vector<8xf32> to vector<8x1xf32>
    %37 = vector.broadcast %36 : vector<8x1xf32> to vector<8x8xf32>
    %38 = arith.subf %34, %37 : vector<8x8xf32>
    %39 = math.exp %38 : vector<8x8xf32>
    %cst_16 = arith.constant dense<0.000000e+00> : vector<8xf32>
    %40 = vector.multi_reduction <add>, %39, %cst_16 [1] : vector<8x8xf32> to vector<8xf32>
    %41 = vector.shape_cast %40 : vector<8xf32> to vector<8x1xf32>
    %42 = tpu.reciprocal %41 {approx = true} : vector<8x1xf32> -> vector<8x1xf32>
    %43 = vector.broadcast %42 : vector<8x1xf32> to vector<8x8xf32>
    %44 = arith.mulf %39, %43 : vector<8x8xf32>
    %45 = arith.truncf %44 : vector<8x8xf32> to vector<8x8xbf16>
    %cst_17 = arith.constant dense<0.000000e+00> : vector<8x64xf32>
    %46 = tpu.matmul %45, %32, %cst_17 {dimension_numbers = #tpu.dot_dimension_numbers<[1], [0], [0], [1], [0, 0, 1, 1], [], []>} : vector<8x8xbf16>, vector<8x64xbf16>, vector<8x64xf32> -> vector<8x64xf32>
    %47 = arith.truncf %46 : vector<8x64xf32> to vector<8x64xbf16>
    %c0_18 = arith.constant 0 : index
    %c0_19 = arith.constant 0 : index
    %48 = vector.load %arg15[%c0_18, %c0_19] : memref<8x256xbf16, #tpu.memory_space<vmem>>, vector<8x64xbf16>
    tpu.vector_store %arg15[%c0_18, %c0_19], %47 {strides = array<i32>} : memref<8x256xbf16, #tpu.memory_space<vmem>>, vector<8x64xbf16>,
    %49 = vector.extract_strided_slice %28 {offsets = [0, 64], sizes = [8, 64], strides = [1, 1]} : vector<8x768xbf16> to vector<8x64xbf16>
    %50 = vector.extract_strided_slice %28 {offsets = [0, 320], sizes = [8, 64], strides = [1, 1]} : vector<8x768xbf16> to vector<8x64xbf16>
    %51 = vector.extract_strided_slice %28 {offsets = [0, 576], sizes = [8, 64], strides = [1, 1]} : vector<8x768xbf16> to vector<8x64xbf16>
    %cst_20 = arith.constant dense<0.000000e+00> : vector<8x8xf32>
    %52 = tpu.matmul %49, %50, %cst_20 {dimension_numbers = #tpu.dot_dimension_numbers<[1], [1], [0], [0], [0, 0, 1, 0], [], []>} : vector<8x64xbf16>, vector<8x64xbf16>, vector<8x8xf32> -> vector<8x8xf32>
    %53 = arith.addf %52, %29 : vector<8x8xf32>
    %cst_21 = arith.constant dense<0xFF800000> : vector<8xf32>
    %54 = vector.multi_reduction <maximumf>, %53, %cst_21 [1] : vector<8x8xf32> to vector<8xf32>
    %55 = vector.shape_cast %54 : vector<8xf32> to vector<8x1xf32>
    %56 = vector.broadcast %55 : vector<8x1xf32> to vector<8x8xf32>
    %57 = arith.subf %53, %56 : vector<8x8xf32>
    %58 = math.exp %57 : vector<8x8xf32>
    %cst_22 = arith.constant dense<0.000000e+00> : vector<8xf32>
    %59 = vector.multi_reduction <add>, %58, %cst_22 [1] : vector<8x8xf32> to vector<8xf32>
    %60 = vector.shape_cast %59 : vector<8xf32> to vector<8x1xf32>
    %61 = tpu.reciprocal %60 {approx = true} : vector<8x1xf32> -> vector<8x1xf32>
    %62 = vector.broadcast %61 : vector<8x1xf32> to vector<8x8xf32>
    %63 = arith.mulf %58, %62 : vector<8x8xf32>
    %64 = arith.truncf %63 : vector<8x8xf32> to vector<8x8xbf16>
    %cst_23 = arith.constant dense<0.000000e+00> : vector<8x64xf32>
    %65 = tpu.matmul %64, %51, %cst_23 {dimension_numbers = #tpu.dot_dimension_numbers<[1], [0], [0], [1], [0, 0, 1, 1], [], []>} : vector<8x8xbf16>, vector<8x64xbf16>, vector<8x64xf32> -> vector<8x64xf32>
    %66 = arith.truncf %65 : vector<8x64xf32> to vector<8x64xbf16>
    %c0_24 = arith.constant 0 : index
    %c64 = arith.constant 64 : index
    %67 = vector.load %arg15[%c0_24, %c64] : memref<8x256xbf16, #tpu.memory_space<vmem>>, vector<8x64xbf16>
    tpu.vector_store %arg15[%c0_24, %c64], %66 {strides = array<i32>} : memref<8x256xbf16, #tpu.memory_space<vmem>>, vector<8x64xbf16>,
    %68 = vector.extract_strided_slice %28 {offsets = [0, 128], sizes = [8, 64], strides = [1, 1]} : vector<8x768xbf16> to vector<8x64xbf16>
    %69 = vector.extract_strided_slice %28 {offsets = [0, 384], sizes = [8, 64], strides = [1, 1]} : vector<8x768xbf16> to vector<8x64xbf16>
    %70 = vector.extract_strided_slice %28 {offsets = [0, 640], sizes = [8, 64], strides = [1, 1]} : vector<8x768xbf16> to vector<8x64xbf16>
    %cst_25 = arith.constant dense<0.000000e+00> : vector<8x8xf32>
    %71 = tpu.matmul %68, %69, %cst_25 {dimension_numbers = #tpu.dot_dimension_numbers<[1], [1], [0], [0], [0, 0, 1, 0], [], []>} : vector<8x64xbf16>, vector<8x64xbf16>, vector<8x8xf32> -> vector<8x8xf32>
    %72 = arith.addf %71, %29 : vector<8x8xf32>
    %cst_26 = arith.constant dense<0xFF800000> : vector<8xf32>
    %73 = vector.multi_reduction <maximumf>, %72, %cst_26 [1] : vector<8x8xf32> to vector<8xf32>
    %74 = vector.shape_cast %73 : vector<8xf32> to vector<8x1xf32>
    %75 = vector.broadcast %74 : vector<8x1xf32> to vector<8x8xf32>
    %76 = arith.subf %72, %75 : vector<8x8xf32>
    %77 = math.exp %76 : vector<8x8xf32>
    %cst_27 = arith.constant dense<0.000000e+00> : vector<8xf32>
    %78 = vector.multi_reduction <add>, %77, %cst_27 [1] : vector<8x8xf32> to vector<8xf32>
    %79 = vector.shape_cast %78 : vector<8xf32> to vector<8x1xf32>
    %80 = tpu.reciprocal %79 {approx = true} : vector<8x1xf32> -> vector<8x1xf32>
    %81 = vector.broadcast %80 : vector<8x1xf32> to vector<8x8xf32>
    %82 = arith.mulf %77, %81 : vector<8x8xf32>
    %83 = arith.truncf %82 : vector<8x8xf32> to vector<8x8xbf16>
    %cst_28 = arith.constant dense<0.000000e+00> : vector<8x64xf32>
    %84 = tpu.matmul %83, %70, %cst_28 {dimension_numbers = #tpu.dot_dimension_numbers<[1], [0], [0], [1], [0, 0, 1, 1], [], []>} : vector<8x8xbf16>, vector<8x64xbf16>, vector<8x64xf32> -> vector<8x64xf32>
    %85 = arith.truncf %84 : vector<8x64xf32> to vector<8x64xbf16>
    %c0_29 = arith.constant 0 : index
    %c128 = arith.constant 128 : index
    %86 = vector.load %arg15[%c0_29, %c128] : memref<8x256xbf16, #tpu.memory_space<vmem>>, vector<8x64xbf16>
    tpu.vector_store %arg15[%c0_29, %c128], %85 {strides = array<i32>} : memref<8x256xbf16, #tpu.memory_space<vmem>>, vector<8x64xbf16>,
    %87 = vector.extract_strided_slice %28 {offsets = [0, 192], sizes = [8, 64], strides = [1, 1]} : vector<8x768xbf16> to vector<8x64xbf16>
    %88 = vector.extract_strided_slice %28 {offsets = [0, 448], sizes = [8, 64], strides = [1, 1]} : vector<8x768xbf16> to vector<8x64xbf16>
    %89 = vector.extract_strided_slice %28 {offsets = [0, 704], sizes = [8, 64], strides = [1, 1]} : vector<8x768xbf16> to vector<8x64xbf16>
    %cst_30 = arith.constant dense<0.000000e+00> : vector<8x8xf32>
    %90 = tpu.matmul %87, %88, %cst_30 {dimension_numbers = #tpu.dot_dimension_numbers<[1], [1], [0], [0], [0, 0, 1, 0], [], []>} : vector<8x64xbf16>, vector<8x64xbf16>, vector<8x8xf32> -> vector<8x8xf32>
    %91 = arith.addf %90, %29 : vector<8x8xf32>
    %cst_31 = arith.constant dense<0xFF800000> : vector<8xf32>
    %92 = vector.multi_reduction <maximumf>, %91, %cst_31 [1] : vector<8x8xf32> to vector<8xf32>
    %93 = vector.shape_cast %92 : vector<8xf32> to vector<8x1xf32>
    %94 = vector.broadcast %93 : vector<8x1xf32> to vector<8x8xf32>
    %95 = arith.subf %91, %94 : vector<8x8xf32>
    %96 = math.exp %95 : vector<8x8xf32>
    %cst_32 = arith.constant dense<0.000000e+00> : vector<8xf32>
    %97 = vector.multi_reduction <add>, %96, %cst_32 [1] : vector<8x8xf32> to vector<8xf32>
    %98 = vector.shape_cast %97 : vector<8xf32> to vector<8x1xf32>
    %99 = tpu.reciprocal %98 {approx = true} : vector<8x1xf32> -> vector<8x1xf32>
    %100 = vector.broadcast %99 : vector<8x1xf32> to vector<8x8xf32>
    %101 = arith.mulf %96, %100 : vector<8x8xf32>
    %102 = arith.truncf %101 : vector<8x8xf32> to vector<8x8xbf16>
    %cst_33 = arith.constant dense<0.000000e+00> : vector<8x64xf32>
    %103 = tpu.matmul %102, %89, %cst_33 {dimension_numbers = #tpu.dot_dimension_numbers<[1], [0], [0], [1], [0, 0, 1, 1], [], []>} : vector<8x8xbf16>, vector<8x64xbf16>, vector<8x64xf32> -> vector<8x64xf32>
    %104 = arith.truncf %103 : vector<8x64xf32> to vector<8x64xbf16>
    %c0_34 = arith.constant 0 : index
    %c192 = arith.constant 192 : index
    %105 = vector.load %arg15[%c0_34, %c192] : memref<8x256xbf16, #tpu.memory_space<vmem>>, vector<8x64xbf16>
    tpu.vector_store %arg15[%c0_34, %c192], %104 {strides = array<i32>} : memref<8x256xbf16, #tpu.memory_space<vmem>>, vector<8x64xbf16>,
    %c0_35 = arith.constant 0 : index
    %c0_36 = arith.constant 0 : index
    %106 = vector.load %arg15[%c0_35, %c0_36] : memref<8x256xbf16, #tpu.memory_space<vmem>>, vector<8x256xbf16>
    %c0_37 = arith.constant 0 : index
    %c0_38 = arith.constant 0 : index
    %107 = vector.load %arg6[%c0_37, %c0_38] : memref<256x256xbf16, #tpu.memory_space<vmem>>, vector<256x256xbf16>
    %cst_39 = arith.constant dense<0.000000e+00> : vector<8x256xf32>
    %108 = tpu.matmul %106, %107, %cst_39 {dimension_numbers = #tpu.dot_dimension_numbers<[1], [0], [0], [1], [0, 0, 1, 1], [], []>} : vector<8x256xbf16>, vector<256x256xbf16>, vector<8x256xf32> -> vector<8x256xf32>
    %c0_40 = arith.constant 0 : index
    %c0_41 = arith.constant 0 : index
    %109 = vector.load %arg7[%c0_40, %c0_41] : memref<1x256xf32, #tpu.memory_space<vmem>>, vector<1x256xf32>
    %110 = vector.broadcast %109 : vector<1x256xf32> to vector<8x256xf32>
    %111 = arith.addf %108, %110 : vector<8x256xf32>
    %112 = arith.addf %0, %111 : vector<8x256xf32>
    %c0_42 = arith.constant 0 : index
    %c0_43 = arith.constant 0 : index
    %113 = vector.load %arg8[%c0_42, %c0_43] : memref<1x256xf32, #tpu.memory_space<vmem>>, vector<1x256xf32>
    %c0_44 = arith.constant 0 : index
    %c0_45 = arith.constant 0 : index
    %114 = vector.load %arg9[%c0_44, %c0_45] : memref<1x256xf32, #tpu.memory_space<vmem>>, vector<1x256xf32>
    %cst_46 = arith.constant dense<0.000000e+00> : vector<8xf32>
    %115 = vector.multi_reduction <add>, %112, %cst_46 [1] : vector<8x256xf32> to vector<8xf32>
    %116 = vector.shape_cast %115 : vector<8xf32> to vector<8x1xf32>
    %cst_47 = arith.constant 2.560000e+02 : f32
    %117 = vector.broadcast %cst_47 : f32 to vector<8x1xf32>
    %118 = arith.divf %116, %117 : vector<8x1xf32>
    %119 = vector.broadcast %118 : vector<8x1xf32> to vector<8x256xf32>
    %120 = arith.subf %112, %119 : vector<8x256xf32>
    %121 = arith.mulf %120, %120 : vector<8x256xf32>
    %cst_48 = arith.constant dense<0.000000e+00> : vector<8xf32>
    %122 = vector.multi_reduction <add>, %121, %cst_48 [1] : vector<8x256xf32> to vector<8xf32>
    %123 = vector.shape_cast %122 : vector<8xf32> to vector<8x1xf32>
    %cst_49 = arith.constant 2.560000e+02 : f32
    %124 = vector.broadcast %cst_49 : f32 to vector<8x1xf32>
    %125 = arith.divf %123, %124 : vector<8x1xf32>
    %126 = vector.broadcast %118 : vector<8x1xf32> to vector<8x256xf32>
    %127 = arith.subf %112, %126 : vector<8x256xf32>
    %cst_50 = arith.constant 9.99999974E-6 : f32
    %128 = vector.broadcast %cst_50 : f32 to vector<8x1xf32>
    %129 = arith.addf %125, %128 : vector<8x1xf32>
    %130 = math.rsqrt %129 : vector<8x1xf32>
    %131 = vector.broadcast %130 : vector<8x1xf32> to vector<8x256xf32>
    %132 = arith.mulf %127, %131 : vector<8x256xf32>
    %133 = vector.broadcast %113 : vector<1x256xf32> to vector<8x256xf32>
    %134 = arith.mulf %132, %133 : vector<8x256xf32>
    %135 = vector.broadcast %114 : vector<1x256xf32> to vector<8x256xf32>
    %136 = arith.addf %134, %135 : vector<8x256xf32>
    %137 = arith.truncf %136 : vector<8x256xf32> to vector<8x256xbf16>
    %c0_51 = arith.constant 0 : index
    %c0_52 = arith.constant 0 : index
    %138 = vector.load %arg10[%c0_51, %c0_52] : memref<256x1024xbf16, #tpu.memory_space<vmem>>, vector<256x1024xbf16>
    %cst_53 = arith.constant dense<0.000000e+00> : vector<8x1024xf32>
    %139 = tpu.matmul %137, %138, %cst_53 {dimension_numbers = #tpu.dot_dimension_numbers<[1], [0], [0], [1], [0, 0, 1, 1], [], []>} : vector<8x256xbf16>, vector<256x1024xbf16>, vector<8x1024xf32> -> vector<8x1024xf32>
    %c0_54 = arith.constant 0 : index
    %c0_55 = arith.constant 0 : index
    %140 = vector.load %arg11[%c0_54, %c0_55] : memref<1x1024xf32, #tpu.memory_space<vmem>>, vector<1x1024xf32>
    %141 = vector.broadcast %140 : vector<1x1024xf32> to vector<8x1024xf32>
    %142 = arith.addf %139, %141 : vector<8x1024xf32>
    %cst_56 = arith.constant 0.000000e+00 : f32
    %143 = vector.broadcast %cst_56 : f32 to vector<8x1024xf32>
    %144 = arith.maximumf %142, %143 : vector<8x1024xf32>
    %145 = arith.truncf %144 : vector<8x1024xf32> to vector<8x1024xbf16>
    %c0_57 = arith.constant 0 : index
    %c0_58 = arith.constant 0 : index
    %146 = vector.load %arg12[%c0_57, %c0_58] : memref<1024x256xbf16, #tpu.memory_space<vmem>>, vector<1024x256xbf16>
    %cst_59 = arith.constant dense<0.000000e+00> : vector<8x256xf32>
    %147 = tpu.matmul %145, %146, %cst_59 {dimension_numbers = #tpu.dot_dimension_numbers<[1], [0], [0], [1], [0, 0, 1, 1], [], []>} : vector<8x1024xbf16>, vector<1024x256xbf16>, vector<8x256xf32> -> vector<8x256xf32>
    %c0_60 = arith.constant 0 : index
    %c0_61 = arith.constant 0 : index
    %148 = vector.load %arg13[%c0_60, %c0_61] : memref<1x256xf32, #tpu.memory_space<vmem>>, vector<1x256xf32>
    %149 = vector.broadcast %148 : vector<1x256xf32> to vector<8x256xf32>
    %150 = arith.addf %147, %149 : vector<8x256xf32>
    %151 = arith.addf %112, %150 : vector<8x256xf32>
    %c0_62 = arith.constant 0 : index
    %c0_63 = arith.constant 0 : index
    %152 = vector.load %arg14[%c0_62, %c0_63] : memref<8x256xf32, #tpu.memory_space<vmem>>, vector<8x256xf32>
    tpu.vector_store %arg14[%c0_62, %c0_63], %151 {strides = array<i32>} : memref<8x256xf32, #tpu.memory_space<vmem>>, vector<8x256xf32>,
    return
  }
  func.func @transform_0(%arg0: i32) -> (i32, i32) {
    %c0_i32 = arith.constant 0 : i32
    %c0_i32_0 = arith.constant 0 : i32
    return %arg0, %c0_i32 : i32, i32
  }
  func.func @transform_1(%arg0: i32) -> (i32, i32) {
    %c0_i32 = arith.constant 0 : i32
    %c0_i32_0 = arith.constant 0 : i32
    %c0_i32_1 = arith.constant 0 : i32
    return %c0_i32, %c0_i32_0 : i32, i32
  }
  func.func @transform_2(%arg0: i32) -> (i32, i32) {
    %c0_i32 = arith.constant 0 : i32
    %c0_i32_0 = arith.constant 0 : i32
    %c0_i32_1 = arith.constant 0 : i32
    return %c0_i32, %c0_i32_0 : i32, i32
  }
  func.func @transform_3(%arg0: i32) -> (i32, i32) {
    %c0_i32 = arith.constant 0 : i32
    %c0_i32_0 = arith.constant 0 : i32
    %c0_i32_1 = arith.constant 0 : i32
    return %c0_i32, %c0_i32_0 : i32, i32
  }
  func.func @transform_4(%arg0: i32) -> (i32, i32) {
    %c0_i32 = arith.constant 0 : i32
    %c0_i32_0 = arith.constant 0 : i32
    %c0_i32_1 = arith.constant 0 : i32
    return %c0_i32, %c0_i32_0 : i32, i32
  }
  func.func @transform_5(%arg0: i32) -> (i32, i32) {
    %c0_i32 = arith.constant 0 : i32
    %c0_i32_0 = arith.constant 0 : i32
    %c0_i32_1 = arith.constant 0 : i32
    return %c0_i32, %c0_i32_0 : i32, i32
  }
  func.func @transform_6(%arg0: i32) -> (i32, i32) {
    %c0_i32 = arith.constant 0 : i32
    %c0_i32_0 = arith.constant 0 : i32
    %c0_i32_1 = arith.constant 0 : i32
    return %c0_i32, %c0_i32_0 : i32, i32
  }
  func.func @transform_7(%arg0: i32) -> (i32, i32) {
    %c0_i32 = arith.constant 0 : i32
    %c0_i32_0 = arith.constant 0 : i32
    %c0_i32_1 = arith.constant 0 : i32
    return %c0_i32, %c0_i32_0 : i32, i32
  }
  func.func @transform_8(%arg0: i32) -> (i32, i32) {
    %c0_i32 = arith.constant 0 : i32
    %c0_i32_0 = arith.constant 0 : i32
    %c0_i32_1 = arith.constant 0 : i32
    return %c0_i32, %c0_i32_0 : i32, i32
  }
  func.func @transform_9(%arg0: i32) -> (i32, i32) {
    %c0_i32 = arith.constant 0 : i32
    %c0_i32_0 = arith.constant 0 : i32
    %c0_i32_1 = arith.constant 0 : i32
    return %c0_i32, %c0_i32_0 : i32, i32
  }
  func.func @transform_10(%arg0: i32) -> (i32, i32) {
    %c0_i32 = arith.constant 0 : i32
    %c0_i32_0 = arith.constant 0 : i32
    %c0_i32_1 = arith.constant 0 : i32
    return %c0_i32, %c0_i32_0 : i32, i32
  }
  func.func @transform_11(%arg0: i32) -> (i32, i32) {
    %c0_i32 = arith.constant 0 : i32
    %c0_i32_0 = arith.constant 0 : i32
    %c0_i32_1 = arith.constant 0 : i32
    return %c0_i32, %c0_i32_0 : i32, i32
  }
  func.func @transform_12(%arg0: i32) -> (i32, i32) {
    %c0_i32 = arith.constant 0 : i32
    %c0_i32_0 = arith.constant 0 : i32
    %c0_i32_1 = arith.constant 0 : i32
    return %c0_i32, %c0_i32_0 : i32, i32
  }
  func.func @transform_13(%arg0: i32) -> (i32, i32) {
    %c0_i32 = arith.constant 0 : i32
    %c0_i32_0 = arith.constant 0 : i32
    return %arg0, %c0_i32 : i32, i32
  }
}

</mosaic_0001>

<bundles_post_ra>
// kernel: tpu_custom_call.1
= control target key start
LH: loop header
LB: loop body
LE: loop exit
PB: predicated region body
PF: predicated region fallthrough
CT: control target
= control target key end

     0   :  { %18 = vsyncpa [#allocation4], 0  ;;  %s6136_s0 = inlined_call_operand.hbm [shape: f32[8,256], index: 0, kind: input, shape index: {}]   ;;  %s6137_s1 = inlined_call_operand.hbm [shape: f32[8,8], index: 1, kind: input, shape index: {}]   ;;  %s6138_s2 = inlined_call_operand.hbm [shape: f32[1,256], index: 2, kind: input, shape index: {}]   ;;  %s6139_s3 = inlined_call_operand.hbm [shape: f32[1,256], index: 3, kind: input, shape index: {}]   ;;  %s6140_s4 = inlined_call_operand.hbm [shape: bf16[256,768], index: 4, kind: input, shape index: {}]   ;;  %s6141_s5 = inlined_call_operand.hbm [shape: bf16[256,256], index: 5, kind: input, shape index: {}]   ;;  %s6142_s6 = inlined_call_operand.hbm [shape: f32[1,256], index: 6, kind: input, shape index: {}]   ;;  %s6143_s7 = inlined_call_operand.hbm [shape: f32[1,256], index: 7, kind: input, shape index: {}]   ;;  %s6144_s8 = inlined_call_operand.hbm [shape: f32[1,256], index: 8, kind: input, shape index: {}]   ;;  %s6145_s9 = inlined_call_operand.hbm [shape: bf16[256,1024], index: 9, kind: input, shape index: {}]   ;;  %s6146_s10 = inlined_call_operand.vmem [shape: f32[1,1024], index: 10, kind: input, shape index: {}]   ;;  %s6147_s11 = inlined_call_operand.hbm [shape: bf16[1024,256], index: 11, kind: input, shape index: {}]   ;;  %s6148_s12 = inlined_call_operand.vmem [shape: f32[1,256], index: 12, kind: input, shape index: {}]   ;;  %s6149_s13 = inlined_call_operand.hbm [shape: f32[8,256], index: 13, kind: output, shape index: {}]  }
   0x1   :  { %19 = vsyncpa [#allocation7], 0 }
   0x2   :  { %20 = vsyncpa [#allocation10], 0 }
   0x3   :  { %21 = vsyncpa [#allocation13], 0 }
   0x4   :  { %22 = vsyncpa [#allocation16], 0 }
   0x5   :  { %23 = vsyncpa [#allocation19], 0  ;;  %s41_s27 = sshll.u32 %s6137_s1, 4  ;;  %s42_s27 = int_to_ptr.hbm [resolvable:$true] %s41_s27 }
   0x6   :  { %24 = vsyncpa [#allocation5], 0  ;;  %s5834_s28 = smov [#allocation6]   ;;  %s63_s15 = sshll.u32 %s6139_s3, 4  ;;  %s64_s15 = int_to_ptr.hbm [resolvable:$true] %s63_s15 }
   0x7   :  { %s43_s29 = sshll.u32 %s5834_s28, 4  ;;  %s5835_s16 = smov [#allocation9]   ;;  %s44_s29 = int_to_ptr.vmem [resolvable:$true] %s43_s29 }
   0x8   :  { %46 = dma.hbm_to_vmem [thread:$0]  %s42_s27, 128, %s44_s29, [#allocation7]  }
   0x9   :  { %s65_s17 = sshll.u32 %s5835_s16, 4  ;;  %s86_s20 = sshll.u32 %s6141_s5, 4  ;;  %s66_s17 = int_to_ptr.vmem [resolvable:$true] %s65_s17  ;;  %s87_s20 = int_to_ptr.hbm [resolvable:$true] %s86_s20 }
   0xa   :  { %68 = dma.hbm_to_vmem [thread:$0]  %s64_s15, 32, %s66_s17, [#allocation10]  }
   0xb   :  { %s5836_s1 = smov [#allocation12]   ;;  %s111_s24 = sshll.u32 %s6143_s7, 4  ;;  %s112_s24 = int_to_ptr.hbm [resolvable:$true] %s111_s24 }
   0xc   :  { %s88_s21 = sshll.u32 %s5836_s1, 4  ;;  %s5837_s25 = smov 128   ;;  %s89_s21 = int_to_ptr.vmem [resolvable:$true] %s88_s21 }
   0xd   :  { %s5838_s3 = smov 8   ;;  %s5839_s26 = smov [#allocation15]  }
   0xe   :  { %94 = dma.hbm_to_vmem [thread:$0]  %s87_s20, 4096, %s89_s21, [#allocation13], %s5837_s25, %s5837_s25, %s5838_s3  }
   0xf   :  { %s113_s27 = sshll.u32 %s5839_s26, 4  ;;  %s132_s29 = sshll.u32 %s6145_s9, 4  ;;  %s114_s27 = int_to_ptr.vmem [resolvable:$true] %s113_s27  ;;  %s133_s29 = int_to_ptr.hbm [resolvable:$true] %s132_s29 }
  0x10   :  { %116 = dma.hbm_to_vmem [thread:$0]  %s112_s24, 32, %s114_s27, [#allocation16]  }
  0x11   :  { %s5840_s30 = smov [#allocation18]   ;;  %s30_s16 = sshll.u32 %s6136_s0, 4  ;;  %s31_s16 = int_to_ptr.hbm [resolvable:$true] %s30_s16 }
  0x12   :  { %s134_s14 = sshll.u32 %s5840_s30, 4  ;;  %s5841_s17 = smov 512   ;;  %s135_s14 = int_to_ptr.vmem [resolvable:$true] %s134_s14 }
  0x13   :  { %s5842_s18 = smov 32   ;;  %s5843_s19 = smov [#allocation3]  }
  0x14   :  { %140 = dma.hbm_to_vmem [thread:$0]  %s133_s29, 16384, %s135_s14, [#allocation19], %s5841_s17, %s5841_s17, %s5842_s18  }
  0x15   :  { %s32_s20 = sshll.u32 %s5843_s19, 4  ;;  %s52_s9 = sshll.u32 %s6138_s2, 4  ;;  %s33_s20 = int_to_ptr.vmem [resolvable:$true] %s32_s20  ;;  %s53_s9 = int_to_ptr.hbm [resolvable:$true] %s52_s9 }
  0x16   :  { %35 = dma.hbm_to_vmem [thread:$0]  %s31_s16, 256, %s33_s20, [#allocation4]  }
  0x17   :  { %s73_s24 = sshll.u32 %s6140_s4, 4  ;;  %s5844_s26 = smov [#allocation8]   ;;  %s74_s24 = int_to_ptr.hbm [resolvable:$true] %s73_s24 }
  0x18   :  { %s54_s27 = sshll.u32 %s5844_s26, 4  ;;  %s5845_s0 = smov [#allocation11]   ;;  %s55_s27 = int_to_ptr.vmem [resolvable:$true] %s54_s27 }
  0x19   :  { %57 = dma.hbm_to_vmem [thread:$0]  %s53_s9, 32, %s55_s27, [#allocation7]  }
  0x1a   :  { %s75_s5 = sshll.u32 %s5845_s0, 4  ;;  %s5846_s28 = smov 384   ;;  %s76_s5 = int_to_ptr.vmem [resolvable:$true] %s75_s5 }
  0x1b   :  { %s5847_s29 = smov 24   ;;  %s100_s14 = sshll.u32 %s6142_s6, 4  ;;  %s101_s14 = int_to_ptr.hbm [resolvable:$true] %s100_s14 }
  0x1c   :  { %81 = dma.hbm_to_vmem [thread:$0]  %s74_s24, 12288, %s76_s5, [#allocation10], %s5846_s28, %s5846_s28, %s5847_s29  }
  0x1d   :  { %s5848_s7 = smov [#allocation14]   ;;  %s122_s17 = sshll.u32 %s6144_s8, 4  ;;  %s123_s17 = int_to_ptr.hbm [resolvable:$true] %s122_s17 }
  0x1e   :  { %s102_s15 = sshll.u32 %s5848_s7, 4  ;;  %s5849_s18 = smov [#allocation17]   ;;  %s103_s15 = int_to_ptr.vmem [resolvable:$true] %s102_s15 }
  0x1f   :  { %105 = dma.hbm_to_vmem [thread:$0]  %s101_s14, 32, %s103_s15, [#allocation13]  }
  0x20   :  { %s124_s19 = sshll.u32 %s5849_s18, 4  ;;  %s147_s21 = sshll.u32 %s6147_s11, 4  ;;  %s125_s19 = int_to_ptr.vmem [resolvable:$true] %s124_s19  ;;  %s148_s21 = int_to_ptr.hbm [resolvable:$true] %s147_s21 }
  0x21   :  { %127 = dma.hbm_to_vmem [thread:$0]  %s123_s17, 32, %s125_s19, [#allocation16]  }
  0x22   :  { %s5850_s6 = smov [#allocation20]  }
  0x23   :  { %s149_s9 = sshll.u32 %s5850_s6, 4  ;;  %s150_s9 = int_to_ptr.vmem [resolvable:$true] %s149_s9 }
  0x24   :  { %155 = dma.hbm_to_vmem [thread:$0]  %s148_s21, 16384, %s150_s9, [#allocation19], %s5837_s25, %s5837_s25, %s5838_s3  }
  0x25   :  { %5820 = dma.done.wait [#allocation4], 256  }
  0x26   :  { %5821 = vsyncadd [#allocation4], 4294967040 }
  0x27   :  { %5822 = dma.done.wait [#allocation7], 160  }
  0x28   :  { %5823 = vsyncadd [#allocation7], 4294967136 }
  0x29   :  { %5824 = dma.done.wait [#allocation10], 12320  }
  0x2a   :  { %5825 = vsyncadd [#allocation10], 4294954976 }
  0x2b   :  { %5826 = dma.done.wait [#allocation13], 4128  }
  0x2c   :  { %5827 = vsyncadd [#allocation13], 4294963168 }
  0x2d   :  { %5828 = dma.done.wait [#allocation16], 64  }
  0x2e   :  { %5829 = vsyncadd [#allocation16], 4294967232 }
  0x2f   :  { %5830 = dma.done.wait [#allocation19], 32768  }
  0x30   :  { %5831 = vsyncadd [#allocation19], 4294934528  ;;  %v5963_v0 = vld [vmem:[#allocation3] sm:$0xff]  ;;  %v5965_v1 = vld [vmem:[#allocation3 + $0x8] sm:$0xff]  ;;  %v5851_v3 = vmov 256.0   ;;  %vm991_vm4 = vcmask 523264  }
  0x31   :  { %v207_v2 = vadd.f32 %v5965_v1, %v5963_v0  ;;  %5508 = vrcp.f32 %v5851_v3  ;;  %v3730_v7 = vld [vmem:[#allocation11 + $0x150] sm:$0xf]  ;;  %v5149_v8 = vld [vmem:[#allocation11 + $0x164] sm:$0xf0]  ;;  %v5146_v12 = vld [vmem:[#allocation11 + $0x154] sm:$0xf] }
  0x32   :  { %v3922_v9 = vld [vmem:[#allocation11 + $0x2d0] sm:$0xf]  ;;  %v3731_v10 = vor.u32 %v5149_v8, %v3730_v7  ;;  %v5197_v11 = vld [vmem:[#allocation11 + $0x2e4] sm:$0xf0]  ;;  %v3732_v13 = vld [vmem:[#allocation11 + $0x168] sm:$0xf0] }
  0x33   :  { %208 = vadd.xlane.f32.xlu0 %v207_v2  ;;  %v3923_v14 = vor.u32 %v5197_v11, %v3922_v9  ;;  %v3735_v15 = vor.u32 %v5146_v12, %v3732_v13  ;;  %v5194_v16 = vld [vmem:[#allocation11 + $0x2d4] sm:$0xf]  ;;  %v3924_v17 = vld [vmem:[#allocation11 + $0x2e8] sm:$0xf0]  ;;  %v3706_v18 = vld [vmem:[#allocation11 + $0x120] sm:$0xf] }
  0x34   :  { %831 = vmatpush.bf16.msra.mxu0 %v3731_v10  ;;  %v3927_v19 = vor.u32 %v5194_v16, %v3924_v17  ;;  %v5143_v20 = vld [vmem:[#allocation11 + $0x134] sm:$0xf0]  ;;  %v3898_v21 = vld [vmem:[#allocation11 + $0x2a0] sm:$0xf]  ;;  %v5140_v25 = vld [vmem:[#allocation11 + $0x124] sm:$0xf] }
  0x35   :  { %v5191_v22 = vld [vmem:[#allocation11 + $0x2b4] sm:$0xf0]  ;;  %844 = vmatpush.bf16.msra.mxu1 %v3923_v14  ;;  %857 = vmatpush.bf16.msra.mxu2 %v3735_v15  ;;  %v3707_v23 = vor.u32 %v5143_v20, %v3706_v18  ;;  %v3708_v26 = vld [vmem:[#allocation11 + $0x138] sm:$0xf0]  ;;  %v5188_v27 = vld [vmem:[#allocation11 + $0x2a4] sm:$0xf] }
  0x36   :  { %v3899_v24 = vor.u32 %v5191_v22, %v3898_v21  ;;  %870 = vmatpush.bf16.msra.mxu3 %v3927_v19  ;;  %v3711_v28 = vor.u32 %v5140_v25, %v3708_v26  ;;  %v3900_v29 = vld [vmem:[#allocation11 + $0x2b8] sm:$0xf0]  ;;  %v3682_v30 = vld [vmem:[#allocation11 + $0xf0] sm:$0xf]  ;;  %v5137_v31 = vld [vmem:[#allocation11 + $0x104] sm:$0xf0] }
  0x37   :  { %v5969_v4 = vpop.eup %5508  ;;  %v3903_v32 = vor.u32 %v5188_v27, %v3900_v29  ;;  %v3874_v33 = vld [vmem:[#allocation11 + $0x270] sm:$0xf]  ;;  %v5185_v34 = vld [vmem:[#allocation11 + $0x284] sm:$0xf0]  ;;  %v5134_v35 = vld [vmem:[#allocation11 + $0xf4] sm:$0xf]  ;;  %v3683_v36 = vor.u32 %v5137_v31, %v3682_v30 }
  0x38   :  { %v5972_v5 = vmul.f32 256.0, %v5969_v4  ;;  %832 = vmatpush.bf16.msra.mxu0 %v3707_v23  ;;  %v3684_v37 = vld [vmem:[#allocation11 + $0x108] sm:$0xf0]  ;;  %v5182_v38 = vld [vmem:[#allocation11 + $0x274] sm:$0xf]  ;;  %v3875_v40 = vor.u32 %v5185_v34, %v3874_v33  ;;  %vm215_vm0 = vweird.f32 %v5969_v4  ;;  %s5852_s8 = smov 64  }
  0x39   :  { %v3876_v39 = vld [vmem:[#allocation11 + $0x288] sm:$0xf0]  ;;  %845 = vmatpush.bf16.msra.mxu1 %v3899_v24  ;;  %858 = vmatpush.bf16.msra.mxu2 %v3711_v28  ;;  %v3687_v41 = vor.u32 %v5134_v35, %v3684_v37  ;;  %v3658_v42 = vld [vmem:[#allocation11 + $0xc0] sm:$0xf]  ;;  %v5131_v43 = vld [vmem:[#allocation11 + $0xd4] sm:$0xf0] }
  0x3a   :  { %v212_v6 = vsub.f32 1.0, %v5972_v5  ;;  %v3850_v44 = vld [vmem:[#allocation11 + $0x240] sm:$0xf]  ;;  %871 = vmatpush.bf16.msra.mxu3 %v3903_v32  ;;  %v3879_v45 = vor.u32 %v5182_v38, %v3876_v39  ;;  %v5179_v46 = vld [vmem:[#allocation11 + $0x254] sm:$0xf0]  ;;  %v3659_v51 = vor.u32 %v5131_v43, %v3658_v42  ;;  %vm1027_vm5 = vcmask 1043456  }
  0x3b   :  { %v5128_v47 = vld [vmem:[#allocation11 + $0xc4] sm:$0xf]  ;;  %v3660_v48 = vld [vmem:[#allocation11 + $0xd8] sm:$0xf0]  ;;  %v3851_v52 = vor.u32 %v5179_v46, %v3850_v44  ;;  %v3634_v54 = vld [vmem:[#allocation11 + $0x90] sm:$0xf] }
  0x3c   :  { %v5176_v49 = vld [vmem:[#allocation11 + $0x244] sm:$0xf]  ;;  %v3852_v50 = vld [vmem:[#allocation11 + $0x258] sm:$0xf0]  ;;  %833 = vmatpush.bf16.msra.mxu0 %v3683_v36  ;;  %v3663_v53 = vor.u32 %v5128_v47, %v3660_v48  ;;  %v5125_v55 = vld [vmem:[#allocation11 + $0xa4] sm:$0xf0]  ;;  %v213_v57 = vmul.f32 %v5969_v4, %v212_v6 }
  0x3d   :  { %846 = vmatpush.bf16.msra.mxu1 %v3875_v40  ;;  %859 = vmatpush.bf16.msra.mxu2 %v3687_v41  ;;  %v3826_v56 = vld [vmem:[#allocation11 + $0x210] sm:$0xf]  ;;  %v3855_v58 = vor.u32 %v5176_v49, %v3852_v50  ;;  %v5173_v59 = vld [vmem:[#allocation11 + $0x224] sm:$0xf0]  ;;  %v5122_v60 = vld [vmem:[#allocation11 + $0x94] sm:$0xf]  ;;  %v3635_v2 = vor.u32 %v5125_v55, %v3634_v54 }
  0x3e   :  { %872 = vmatpush.bf16.msra.mxu3 %v3879_v45  ;;  %v3636_v61 = vld [vmem:[#allocation11 + $0xa8] sm:$0xf0]  ;;  %v5170_v62 = vld [vmem:[#allocation11 + $0x214] sm:$0xf]  ;;  %v3827_v3 = vor.u32 %v5173_v59, %v3826_v56  ;;  %v3610_v7 = vld [vmem:[#allocation11 + $0x60] sm:$0xf]  ;;  %v214_v10 = vadd.f32 %v5969_v4, %v213_v57 }
  0x3f   :  { %v3828_v63 = vld [vmem:[#allocation11 + $0x228] sm:$0xf0]  ;;  %v3639_v5 = vor.u32 %v5122_v60, %v3636_v61  ;;  %v5119_v8 = vld [vmem:[#allocation11 + $0x74] sm:$0xf0]  ;;  %v3802_v9 = vld [vmem:[#allocation11 + $0x1e0] sm:$0xf] }
  0x40   :  { %834 = vmatpush.bf16.msra.mxu0 %v3659_v51  ;;  %v3831_v6 = vor.u32 %v5170_v62, %v3828_v63  ;;  %v5167_v11 = vld [vmem:[#allocation11 + $0x1f4] sm:$0xf0]  ;;  %v5116_v12 = vld [vmem:[#allocation11 + $0x64] sm:$0xf]  ;;  %v3612_v13 = vld [vmem:[#allocation11 + $0x78] sm:$0xf0]  ;;  %v3611_v16 = vor.u32 %v5119_v8, %v3610_v7  ;;  %v5979_v22 = vsel %vm215_vm0, %v5969_v4, %v214_v10 }
  0x41   :  { %847 = vmatpush.bf16.msra.mxu1 %v3851_v52  ;;  %860 = vmatpush.bf16.msra.mxu2 %v3663_v53  ;;  %v5164_v14 = vld [vmem:[#allocation11 + $0x1e4] sm:$0xf]  ;;  %v3804_v15 = vld [vmem:[#allocation11 + $0x1f8] sm:$0xf0]  ;;  %v3803_v17 = vor.u32 %v5167_v11, %v3802_v9  ;;  %v3615_v18 = vor.u32 %v5116_v12, %v3612_v13  ;;  %v3586_v19 = vld [vmem:[#allocation11 + $0x30] sm:$0xf] }
  0x42   :  { %873 = vmatpush.bf16.msra.mxu3 %v3855_v58  ;;  %v5113_v20 = vld [vmem:[#allocation11 + $0x44] sm:$0xf0]  ;;  %v3778_v21 = vld [vmem:[#allocation11 + $0x1b0] sm:$0xf]  ;;  %v3807_v23 = vor.u32 %v5164_v14, %v3804_v15  ;;  %v5110_v25 = vld [vmem:[#allocation11 + $0x34] sm:$0xf] }
  0x43   :  { %v5161_v24 = vld [vmem:[#allocation11 + $0x1c4] sm:$0xf0]  ;;  %v3588_v26 = vld [vmem:[#allocation11 + $0x48] sm:$0xf0]  ;;  %v5158_v27 = vld [vmem:[#allocation11 + $0x1b4] sm:$0xf]  ;;  %v3587_v30 = vor.u32 %v5113_v20, %v3586_v19 }
  0x44   :  { %835 = vmatpush.bf16.msra.mxu0 %v3635_v2  ;;  %v3780_v28 = vld [vmem:[#allocation11 + $0x1c8] sm:$0xf0]  ;;  %v3779_v32 = vor.u32 %v5161_v24, %v3778_v21  ;;  %v3591_v33 = vor.u32 %v5110_v25, %v3588_v26  ;;  %v3562_v39 = vld [vmem:[#allocation11] sm:$0xf]  ;;  %v5107_v40 = vld [vmem:[#allocation11 + $0x14] sm:$0xf0] }
  0x45   :  { %848 = vmatpush.bf16.msra.mxu1 %v3827_v3  ;;  %861 = vmatpush.bf16.msra.mxu2 %v3639_v5  ;;  %v3783_v34 = vor.u32 %v5158_v27, %v3780_v28  ;;  %v3754_v41 = vld [vmem:[#allocation11 + $0x180] sm:$0xf]  ;;  %v5155_v42 = vld [vmem:[#allocation11 + $0x194] sm:$0xf0]  ;;  %v5104_v43 = vld [vmem:[#allocation11 + $0x4] sm:$0xf] }
  0x46   :  { %874 = vmatpush.bf16.msra.mxu3 %v3831_v6  ;;  %v3755_v44 = vor.u32 %v5155_v42, %v3754_v41  ;;  %v5152_v46 = vld [vmem:[#allocation11 + $0x184] sm:$0xf]  ;;  %v3756_v47 = vld [vmem:[#allocation11 + $0x198] sm:$0xf0]  ;;  %v3738_v48 = vld [vmem:[#allocation11 + $0x158] sm:$0xf] }
  0x47   :  { %v3759_v49 = vor.u32 %v5152_v46, %v3756_v47  ;;  %v5150_v50 = vld [vmem:[#allocation11 + $0x16c] sm:$0xf0]  ;;  %v3930_v51 = vld [vmem:[#allocation11 + $0x2d8] sm:$0xf]  ;;  %v5147_v55 = vld [vmem:[#allocation11 + $0x15c] sm:$0xf] }
  0x48   :  { %836 = vmatpush.bf16.msra.mxu0 %v3611_v16  ;;  %v5198_v52 = vld [vmem:[#allocation11 + $0x2ec] sm:$0xf0]  ;;  %v3739_v53 = vor.u32 %v5150_v50, %v3738_v48  ;;  %v3740_v56 = vld [vmem:[#allocation11 + $0x170] sm:$0xf0]  ;;  %v5195_v57 = vld [vmem:[#allocation11 + $0x2dc] sm:$0xf] }
  0x49   :  { %849 = vmatpush.bf16.msra.mxu1 %v3803_v17  ;;  %862 = vmatpush.bf16.msra.mxu2 %v3615_v18  ;;  %v3931_v54 = vor.u32 %v5198_v52, %v3930_v51  ;;  %v3743_v58 = vor.u32 %v5147_v55, %v3740_v56  ;;  %v3932_v59 = vld [vmem:[#allocation11 + $0x2f0] sm:$0xf0]  ;;  %v3714_v60 = vld [vmem:[#allocation11 + $0x128] sm:$0xf]  ;;  %v5144_v61 = vld [vmem:[#allocation11 + $0x13c] sm:$0xf0] }
  0x4a   :  { %875 = vmatpush.bf16.msra.mxu3 %v3807_v23  ;;  %v3935_v62 = vor.u32 %v5195_v57, %v3932_v59  ;;  %v3715_v63 = vor.u32 %v5144_v61, %v3714_v60  ;;  %v3906_v2 = vld [vmem:[#allocation11 + $0x2a8] sm:$0xf]  ;;  %v5192_v3 = vld [vmem:[#allocation11 + $0x2bc] sm:$0xf0]  ;;  %v5141_v5 = vld [vmem:[#allocation11 + $0x12c] sm:$0xf] }
  0x4b   :  { %v3907_v7 = vor.u32 %v5192_v3, %v3906_v2  ;;  %v3716_v8 = vld [vmem:[#allocation11 + $0x140] sm:$0xf0]  ;;  %v5189_v9 = vld [vmem:[#allocation11 + $0x2ac] sm:$0xf]  ;;  %v3690_v12 = vld [vmem:[#allocation11 + $0xf8] sm:$0xf] }
  0x4c   :  { %837 = vmatpush.bf16.msra.mxu0 %v3587_v30  ;;  %v3908_v10 = vld [vmem:[#allocation11 + $0x2c0] sm:$0xf0]  ;;  %v3719_v6 = vor.u32 %v5141_v5, %v3716_v8  ;;  %v5138_v13 = vld [vmem:[#allocation11 + $0x10c] sm:$0xf0]  ;;  %v3882_v14 = vld [vmem:[#allocation11 + $0x278] sm:$0xf] }
  0x4d   :  { %850 = vmatpush.bf16.msra.mxu1 %v3779_v32  ;;  %863 = vmatpush.bf16.msra.mxu2 %v3591_v33  ;;  %v3911_v11 = vor.u32 %v5189_v9, %v3908_v10  ;;  %v3691_v15 = vor.u32 %v5138_v13, %v3690_v12  ;;  %v5186_v16 = vld [vmem:[#allocation11 + $0x28c] sm:$0xf0]  ;;  %v5135_v17 = vld [vmem:[#allocation11 + $0xfc] sm:$0xf]  ;;  %v3692_v18 = vld [vmem:[#allocation11 + $0x110] sm:$0xf0] }
  0x4e   :  { %876 = vmatpush.bf16.msra.mxu3 %v3783_v34  ;;  %v3883_v19 = vor.u32 %v5186_v16, %v3882_v14  ;;  %v3695_v20 = vor.u32 %v5135_v17, %v3692_v18  ;;  %v5183_v21 = vld [vmem:[#allocation11 + $0x27c] sm:$0xf]  ;;  %v3884_v23 = vld [vmem:[#allocation11 + $0x290] sm:$0xf0]  ;;  %v3666_v25 = vld [vmem:[#allocation11 + $0xc8] sm:$0xf] }
  0x4f   :  { %v3887_v24 = vor.u32 %v5183_v21, %v3884_v23  ;;  %v5132_v26 = vld [vmem:[#allocation11 + $0xdc] sm:$0xf0]  ;;  %v3858_v27 = vld [vmem:[#allocation11 + $0x248] sm:$0xf]  ;;  %v5129_v30 = vld [vmem:[#allocation11 + $0xcc] sm:$0xf] }
  0x50   :  { %v3667_v28 = vor.u32 %v5132_v26, %v3666_v25  ;;  %v5177_v34 = vld [vmem:[#allocation11 + $0x24c] sm:$0xf]  ;;  %v5123_v42 = vld [vmem:[#allocation11 + $0x9c] sm:$0xf]  ;;  %v3836_v46 = vld [vmem:[#allocation11 + $0x230] sm:$0xf0] }
  0x51   :  { %851 = vmatpush.bf16.msra.mxu1 %v3755_v44  ;;  %v3618_v48 = vld [vmem:[#allocation11 + $0x68] sm:$0xf]  ;;  %v5168_v52 = vld [vmem:[#allocation11 + $0x1fc] sm:$0xf0]  ;;  %v5165_v57 = vld [vmem:[#allocation11 + $0x1ec] sm:$0xf] }
  0x52   :  { %877 = vmatpush.bf16.msra.mxu3 %v3759_v49  ;;  %v5120_v49 = vld [vmem:[#allocation11 + $0x7c] sm:$0xf0]  ;;  %v3810_v50 = vld [vmem:[#allocation11 + $0x1e8] sm:$0xf]  ;;  %v3594_v60 = vld [vmem:[#allocation11 + $0x38] sm:$0xf] }
  0x53   :  { %v3619_v51 = vor.u32 %v5120_v49, %v3618_v48  ;;  %v3811_v55 = vor.u32 %v5168_v52, %v3810_v50  ;;  %v5114_v61 = vld [vmem:[#allocation11 + $0x4c] sm:$0xf0]  ;;  %v5111_v3 = vld [vmem:[#allocation11 + $0x3c] sm:$0xf]  ;;  %v3596_v5 = vld [vmem:[#allocation11 + $0x50] sm:$0xf0] }
  0x54   :  { %v5162_v2 = vld [vmem:[#allocation11 + $0x1cc] sm:$0xf0]  ;;  %v3599_v8 = vor.u32 %v5111_v3, %v3596_v5  ;;  %v5159_v9 = vld [vmem:[#allocation11 + $0x1bc] sm:$0xf]  ;;  %v3788_v10 = vld [vmem:[#allocation11 + $0x1d0] sm:$0xf0] }
  0x55   :  { %896 = vmatpush.bf16.msrb.mxu1 %v3931_v54  ;;  %v3620_v54 = vld [vmem:[#allocation11 + $0x80] sm:$0xf0]  ;;  %v5108_v12 = vld [vmem:[#allocation11 + $0x1c] sm:$0xf0]  ;;  %v3762_v13 = vld [vmem:[#allocation11 + $0x188] sm:$0xf] }
  0x56   :  { %922 = vmatpush.bf16.msrb.mxu3 %v3935_v62  ;;  %v3786_v62 = vld [vmem:[#allocation11 + $0x1b8] sm:$0xf]  ;;  %v5105_v16 = vld [vmem:[#allocation11 + $0xc] sm:$0xf]  ;;  %v3572_v17 = vld [vmem:[#allocation11 + $0x20] sm:$0xf0] }
  0x57   :  { %v3764_v21 = vld [vmem:[#allocation11 + $0x1a0] sm:$0xf0]  ;;  %v3748_v50 = vld [vmem:[#allocation11 + $0x178] sm:$0xf0]  ;;  %vm1011_vm6 = vcmask 64512   ;;  %vm1045_vm7 = vcmask 519168  }
  0x58   :  { %v3940_v52 = vld [vmem:[#allocation11 + $0x2f8] sm:$0xf0]  ;;  %vm1117_vm8 = vcmask 1043968   ;;  %s3545_s26 = sshll.u32 %s6149_s13, 4  ;;  %s3546_s26 = int_to_ptr.hbm [resolvable:$true] %s3545_s26 }
  0x59   :  { %897 = vmatpush.bf16.msrb.mxu1 %v3907_v7  ;;  %v3787_v7 = vor.u32 %v5162_v2, %v3786_v62  ;;  %v3724_v62 = vld [vmem:[#allocation11 + $0x148] sm:$0xf0] }
  0x5a   :  { %923 = vmatpush.bf16.msrb.mxu3 %v3911_v11  ;;  %v3570_v11 = vld [vmem:[#allocation11 + $0x8] sm:$0xf]  ;;  %v3916_v2 = vld [vmem:[#allocation11 + $0x2c8] sm:$0xf0] }
  0x5b   :  { %v3571_v14 = vor.u32 %v5108_v12, %v3570_v11  ;;  %v5187_v11 = vld [vmem:[#allocation11 + $0x294] sm:$0xf0]  ;;  %v5136_v12 = vld [vmem:[#allocation11 + $0x104] sm:$0xf] }
  0x5d   :  { %898 = vmatpush.bf16.msrb.mxu1 %v3883_v19  ;;  %v3575_v19 = vor.u32 %v5105_v16, %v3572_v17 }
  0x5e   :  { %924 = vmatpush.bf16.msrb.mxu3 %v3887_v24 }
  0xa6   :  { %v209_v29 = vpop.xlane.xlu0 %208 }
  0xa7   :  { %v217_v31 = vmul.f32 %v5979_v22, %v209_v29  ;;  %v5180_v29 = vld [vmem:[#allocation11 + $0x25c] sm:$0xf0] }
  0xa8   :  { %v3859_v32 = vor.u32 %v5180_v29, %v3858_v27 }
  0xa9   :  { %v5983_v4 = vsub.f32 %v5963_v0, %v217_v31  ;;  %v5986_v35 = vsub.f32 %v5965_v1, %v217_v31  ;;  %v3563_v0 = vor.u32 %v5107_v40, %v3562_v39  ;;  %v3564_v1 = vld [vmem:[#allocation11 + $0x18] sm:$0xf0]  ;;  %v3668_v31 = vld [vmem:[#allocation11 + $0xe0] sm:$0xf0]  ;;  %v5126_v39 = vld [vmem:[#allocation11 + $0xac] sm:$0xf0] }
  0xaa   :  { %v3567_v45 = vor.u32 %v5104_v43, %v3564_v1  ;;  %v3671_v33 = vor.u32 %v5129_v30, %v3668_v31  ;;  %v3834_v40 = vld [vmem:[#allocation11 + $0x218] sm:$0xf]  ;;  %899 = vmatpush.bf16.msrb.mxu1 %v3859_v32  ;;  %v3644_v43 = vld [vmem:[#allocation11 + $0xb0] sm:$0xf0]  ;;  %v205_v31 = vld [vmem:[#allocation8] sm:$0x3] }
  0xab   :  { %v220_v36 = vmul.f32 %v5983_v4, %v5983_v4  ;;  %v221_v37 = vmul.f32 %v5986_v35, %v5986_v35  ;;  %838 = vmatpush.bf16.msra.mxu0 %v3563_v0  ;;  %v5174_v0 = vld [vmem:[#allocation11 + $0x22c] sm:$0xf0]  ;;  %v3647_v44 = vor.u32 %v5123_v42, %v3644_v43 }
  0xac   :  { %864 = vmatpush.bf16.msra.mxu2 %v3567_v45  ;;  %v3835_v1 = vor.u32 %v5174_v0, %v3834_v40  ;;  %v5171_v45 = vld [vmem:[#allocation11 + $0x21c] sm:$0xf] }
  0xad   :  { %v222_v38 = vadd.f32 %v221_v37, %v220_v36  ;;  %v3860_v36 = vld [vmem:[#allocation11 + $0x260] sm:$0xf0]  ;;  %v3839_v47 = vor.u32 %v5171_v45, %v3836_v46  ;;  %v3938_v45 = vld [vmem:[#allocation11 + $0x2e0] sm:$0xf]  ;;  %v5199_v46 = vld [vmem:[#allocation11 + $0x2f4] sm:$0xf0] }
  0xae   :  { %v3863_v37 = vor.u32 %v5177_v34, %v3860_v36  ;;  %900 = vmatpush.bf16.msrb.mxu1 %v3835_v1  ;;  %v240_v36 = vperm.slane %v205_v31, 0  ;;  %v3746_v1 = vld [vmem:[#allocation11 + $0x160] sm:$0xf] }
  0xaf   :  { %223 = vadd.xlane.f32.xlu0 %v222_v38  ;;  %883 = vmatpush.bf16.msrb.mxu0 %v3739_v53  ;;  %v3642_v38 = vld [vmem:[#allocation11 + $0x98] sm:$0xf]  ;;  %v5117_v53 = vld [vmem:[#allocation11 + $0x6c] sm:$0xf] }
  0xb0   :  { %909 = vmatpush.bf16.msrb.mxu2 %v3743_v58  ;;  %v3643_v41 = vor.u32 %v5126_v39, %v3642_v38  ;;  %925 = vmatpush.bf16.msrb.mxu3 %v3863_v37  ;;  %v3623_v56 = vor.u32 %v5117_v53, %v3620_v54  ;;  %v3812_v58 = vld [vmem:[#allocation11 + $0x200] sm:$0xf0]  ;;  %v241_v37 = vperm.slane %v205_v31, 1  ;;  %v3650_v31 = vld [vmem:[#allocation11 + $0xa0] sm:$0xf] }
  0xb1   :  { %v3815_v59 = vor.u32 %v5165_v57, %v3812_v58 }
  0xb2   :  { %901 = vmatpush.bf16.msrb.mxu1 %v3811_v55 }
  0xb3   :  { %884 = vmatpush.bf16.msrb.mxu0 %v3715_v63  ;;  %v3595_v63 = vor.u32 %v5114_v61, %v3594_v60  ;;  %v5193_v60 = vld [vmem:[#allocation11 + $0x2c4] sm:$0xf0]  ;;  %v5142_v61 = vld [vmem:[#allocation11 + $0x134] sm:$0xf] }
  0xb4   :  { %910 = vmatpush.bf16.msrb.mxu2 %v3719_v6  ;;  %926 = vmatpush.bf16.msrb.mxu3 %v3839_v47  ;;  %v3791_v6 = vor.u32 %v5159_v9, %v3788_v10  ;;  %v5148_v47 = vld [vmem:[#allocation11 + $0x164] sm:$0xf]  ;;  %v3727_v9 = vor.u32 %v5142_v61, %v3724_v62  ;;  %v3604_v61 = vld [vmem:[#allocation11 + $0x58] sm:$0xf0] }
  0xb5   :  { %v3751_v57 = vor.u32 %v5148_v47, %v3748_v50  ;;  %v5169_v47 = vld [vmem:[#allocation11 + $0x204] sm:$0xf0]  ;;  %v5166_v50 = vld [vmem:[#allocation11 + $0x1f4] sm:$0xf]  ;;  %v5160_v62 = vld [vmem:[#allocation11 + $0x1c4] sm:$0xf] }
  0xb6   :  { %902 = vmatpush.bf16.msrb.mxu1 %v3787_v7  ;;  %v3698_v7 = vld [vmem:[#allocation11 + $0x100] sm:$0xf] }
  0xb7   :  { %885 = vmatpush.bf16.msrb.mxu0 %v3691_v15  ;;  %v5156_v15 = vld [vmem:[#allocation11 + $0x19c] sm:$0xf0] }
  0xb8   :  { %911 = vmatpush.bf16.msrb.mxu2 %v3695_v20  ;;  %927 = vmatpush.bf16.msrb.mxu3 %v3815_v59  ;;  %v3763_v18 = vor.u32 %v5156_v15, %v3762_v13  ;;  %v5153_v20 = vld [vmem:[#allocation11 + $0x18c] sm:$0xf]  ;;  %v3914_v59 = vld [vmem:[#allocation11 + $0x2b0] sm:$0xf]  ;;  %v3700_v13 = vld [vmem:[#allocation11 + $0x118] sm:$0xf0] }
  0xb9   :  { %v3767_v24 = vor.u32 %v5153_v20, %v3764_v21  ;;  %v3915_v5 = vor.u32 %v5193_v60, %v3914_v59  ;;  %v3892_v15 = vld [vmem:[#allocation11 + $0x298] sm:$0xf0]  ;;  %v3703_v20 = vor.u32 %v5136_v12, %v3700_v13  ;;  %v5163_v59 = vld [vmem:[#allocation11 + $0x1d4] sm:$0xf0]  ;;  %v5112_v60 = vld [vmem:[#allocation11 + $0x44] sm:$0xf] }
  0xba   :  { %903 = vmatpush.bf16.msrb.mxu1 %v3763_v18  ;;  %v3674_v18 = vld [vmem:[#allocation11 + $0xd0] sm:$0xf]  ;;  %v3580_v12 = vld [vmem:[#allocation11 + $0x28] sm:$0xf0]  ;;  %v5154_v13 = vld [vmem:[#allocation11 + $0x194] sm:$0xf] }
  0xbb   :  { %886 = vmatpush.bf16.msrb.mxu0 %v3667_v28 }
  0xbc   :  { %912 = vmatpush.bf16.msrb.mxu2 %v3671_v33  ;;  %928 = vmatpush.bf16.msrb.mxu3 %v3791_v6  ;;  %v206_v33 = vld [vmem:[#allocation9] sm:$0x3]  ;;  %v3890_v6 = vld [vmem:[#allocation11 + $0x280] sm:$0xf] }
  0xbd   :  { %v247_v39 = vperm.slane %v206_v33, 0  ;;  %v248_v40 = vperm.slane %v206_v33, 1  ;;  %v3891_v17 = vor.u32 %v5187_v11, %v3890_v6  ;;  %v5157_v6 = vld [vmem:[#allocation11 + $0x1a4] sm:$0xf0]  ;;  %v5106_v11 = vld [vmem:[#allocation11 + $0x14] sm:$0xf] }
  0xbf   :  { %887 = vmatpush.bf16.msrb.mxu0 %v3643_v41 }
  0xc0   :  { %913 = vmatpush.bf16.msrb.mxu2 %v3647_v44  ;;  %929 = vmatpush.bf16.msrb.mxu3 %v3767_v24  ;;  %v5151_v44 = vld [vmem:[#allocation11 + $0x174] sm:$0xf0]  ;;  %v5181_v24 = vld [vmem:[#allocation11 + $0x264] sm:$0xf0] }
  0xc1   :  { %v3747_v55 = vor.u32 %v5151_v44, %v3746_v1  ;;  %v5121_v1 = vld [vmem:[#allocation11 + $0x84] sm:$0xf0] }
  0xc3   :  { %888 = vmatpush.bf16.msrb.mxu0 %v3619_v51  ;;  %v5196_v51 = vld [vmem:[#allocation11 + $0x2e4] sm:$0xf] }
  0xc4   :  { %914 = vmatpush.bf16.msrb.mxu2 %v3623_v56  ;;  %v3722_v56 = vld [vmem:[#allocation11 + $0x130] sm:$0xf]  ;;  %v3943_v58 = vor.u32 %v5196_v51, %v3940_v52  ;;  %v3820_v51 = vld [vmem:[#allocation11 + $0x208] sm:$0xf0] }
  0xc7   :  { %889 = vmatpush.bf16.msrb.mxu0 %v3595_v63  ;;  %v5190_v63 = vld [vmem:[#allocation11 + $0x2b4] sm:$0xf] }
  0xc8   :  { %915 = vmatpush.bf16.msrb.mxu2 %v3599_v8  ;;  %v5139_v8 = vld [vmem:[#allocation11 + $0x114] sm:$0xf0]  ;;  %v3919_v10 = vor.u32 %v5190_v63, %v3916_v2  ;;  %v3796_v63 = vld [vmem:[#allocation11 + $0x1d8] sm:$0xf0] }
  0xc9   :  { %v3699_v16 = vor.u32 %v5139_v8, %v3698_v7  ;;  %v5109_v7 = vld [vmem:[#allocation11 + $0x24] sm:$0xf0]  ;;  %v3607_v8 = vor.u32 %v5112_v60, %v3604_v61 }
  0xcb   :  { %890 = vmatpush.bf16.msrb.mxu0 %v3571_v14  ;;  %v5184_v14 = vld [vmem:[#allocation11 + $0x284] sm:$0xf] }
  0xcc   :  { %916 = vmatpush.bf16.msrb.mxu2 %v3575_v19  ;;  %v5133_v19 = vld [vmem:[#allocation11 + $0xe4] sm:$0xf0]  ;;  %v3895_v21 = vor.u32 %v5184_v14, %v3892_v15  ;;  %v3772_v14 = vld [vmem:[#allocation11 + $0x1a8] sm:$0xf0] }
 0x122   :  { %v224_v23 = vpop.xlane.xlu0 %223 }
 0x123   :  { %v225_v25 = vmul.f32 %v224_v23, %v5979_v22  ;;  %v3866_v23 = vld [vmem:[#allocation11 + $0x250] sm:$0xf] }
 0x125   :  { %v226_v26 = vadd.f32 1e-05, %v225_v25  ;;  %v5130_v25 = vld [vmem:[#allocation11 + $0xd4] sm:$0xf] }
 0x127   :  { %5510 = vrsqrt.f32 %v226_v26  ;;  %vm233_vm2 = vweird.f32 %v226_v26 }
 0x12d   :  { %v5511_v27 = vpop.eup %5510 }
 0x12e   :  { %v228_v28 = vmul.f32 %v5511_v27, %v226_v26  ;;  %vm234_vm1 = vweird.f32 %v5511_v27  ;;  %v3676_v26 = vld [vmem:[#allocation11 + $0xe8] sm:$0xf0] }
 0x12f   :  { %vm235_vm3 = vmor %vm233_vm2, %vm234_vm1  ;;  %v3679_v33 = vor.u32 %v5130_v25, %v3676_v26 }
 0x130   :  { %v229_v29 = vmul.f32 %v5511_v27, %v228_v28  ;;  %v3868_v28 = vld [vmem:[#allocation11 + $0x268] sm:$0xf0] }
 0x132   :  { %v230_v30 = vmul.f32 0.5, %v229_v29  ;;  %v3675_v29 = vor.u32 %v5133_v19, %v3674_v18  ;;  %v3775_v18 = vor.u32 %v5154_v13, %v3772_v14 }
 0x134   :  { %v231_v32 = vsub.f32 1.5, %v230_v30  ;;  %v3867_v30 = vor.u32 %v5181_v24, %v3866_v23 }
 0x136   :  { %v232_v34 = vmul.f32 %v5511_v27, %v231_v32  ;;  %v5127_v32 = vld [vmem:[#allocation11 + $0xb4] sm:$0xf0] }
 0x138   :  { %v236_v38 = vsel %vm235_vm3, %v5511_v27, %v232_v34  ;;  %v5178_v27 = vld [vmem:[#allocation11 + $0x254] sm:$0xf] }
 0x139   :  { %v237_v41 = vmul.f32 %v236_v38, %v5983_v4  ;;  %v238_v0 = vmul.f32 %v236_v38, %v5986_v35  ;;  %v3939_v4 = vor.u32 %v5199_v46, %v3938_v45  ;;  %v5145_v35 = vld [vmem:[#allocation11 + $0x144] sm:$0xf0]  ;;  %v3871_v34 = vor.u32 %v5178_v27, %v3868_v28  ;;  %v5124_v38 = vld [vmem:[#allocation11 + $0xa4] sm:$0xf]  ;;  %v3818_v46 = vld [vmem:[#allocation11 + $0x1f0] sm:$0xf] }
 0x13a   :  { %v3723_v3 = vor.u32 %v5145_v35, %v3722_v56  ;;  %v5115_v56 = vld [vmem:[#allocation11 + $0x54] sm:$0xf0] }
 0x13b   :  { %v244_v42 = vmul.f32 %v240_v36, %v237_v41  ;;  %v245_v43 = vmul.f32 %v241_v37, %v238_v0  ;;  %v3842_v36 = vld [vmem:[#allocation11 + $0x220] sm:$0xf]  ;;  %v5175_v37 = vld [vmem:[#allocation11 + $0x234] sm:$0xf0]  ;;  %v3844_v41 = vld [vmem:[#allocation11 + $0x238] sm:$0xf0]  ;;  %v3651_v0 = vor.u32 %v5127_v32, %v3650_v31 }
 0x13d   :  { %v251_v48 = vadd.f32 %v247_v39, %v244_v42  ;;  %v252_v49 = vadd.f32 %v248_v40, %v245_v43  ;;  %v3652_v39 = vld [vmem:[#allocation11 + $0xb8] sm:$0xf0]  ;;  %v5172_v40 = vld [vmem:[#allocation11 + $0x224] sm:$0xf]  ;;  %v3843_v42 = vor.u32 %v5175_v37, %v3842_v36  ;;  %v3626_v43 = vld [vmem:[#allocation11 + $0x70] sm:$0xf] }
 0x13e   :  { %v3655_v44 = vor.u32 %v5124_v38, %v3652_v39  ;;  %v3847_v45 = vor.u32 %v5172_v40, %v3844_v41  ;;  %v3627_v52 = vor.u32 %v5121_v1, %v3626_v43 }
 0x13f   :  { %v5995_v53 = vpack.c.bf16 %v251_v48, %v251_v48  ;;  %v5997_v54 = vpack.c.bf16 %v252_v49, %v252_v49  ;;  %v5118_v48 = vld [vmem:[#allocation11 + $0x74] sm:$0xf]  ;;  %v3628_v49 = vld [vmem:[#allocation11 + $0x88] sm:$0xf0] }
 0x140   :  { %v3631_v35 = vor.u32 %v5118_v48, %v3628_v49 }
 0x141   :  { %839 = vmatmul.bf16.vlgmr.msra.gmra.mxu0 %v5995_v53  ;;  %852 = vmatmul.bf16.vlgmr.msra.gmra.mxu1 %v5997_v54 }
 0x142   :  { %865 = vmatmul.bf16.vlgmr.msra.gmra.mxu2 %v5995_v53  ;;  %878 = vmatmul.bf16.vlgmr.msra.gmra.mxu3 %v5997_v54 }
 0x143   :  { %935 = vmatpush.bf16.msra.mxu0 %v3747_v55  ;;  %948 = vmatpush.bf16.msra.mxu1 %v3939_v4  ;;  %v3819_v55 = vor.u32 %v5169_v47, %v3818_v46  ;;  %v3602_v4 = vld [vmem:[#allocation11 + $0x40] sm:$0xf] }
 0x144   :  { %961 = vmatpush.bf16.msra.mxu2 %v3751_v57  ;;  %974 = vmatpush.bf16.msra.mxu3 %v3943_v58  ;;  %v3823_v57 = vor.u32 %v5166_v50, %v3820_v51  ;;  %v3794_v58 = vld [vmem:[#allocation11 + $0x1c0] sm:$0xf]  ;;  %v3603_v2 = vor.u32 %v5115_v56, %v3602_v4 }
 0x147   :  { %936 = vmatpush.bf16.msra.mxu0 %v3723_v3  ;;  %949 = vmatpush.bf16.msra.mxu1 %v3915_v5  ;;  %v3795_v3 = vor.u32 %v5163_v59, %v3794_v58  ;;  %v3578_v5 = vld [vmem:[#allocation11 + $0x10] sm:$0xf] }
 0x148   :  { %962 = vmatpush.bf16.msra.mxu2 %v3727_v9  ;;  %975 = vmatpush.bf16.msra.mxu3 %v3919_v10  ;;  %v3799_v9 = vor.u32 %v5160_v62, %v3796_v63  ;;  %v3770_v10 = vld [vmem:[#allocation11 + $0x190] sm:$0xf]  ;;  %v3579_v15 = vor.u32 %v5109_v7, %v3578_v5 }
 0x14b   :  { %937 = vmatpush.bf16.msra.mxu0 %v3699_v16  ;;  %950 = vmatpush.bf16.msra.mxu1 %v3891_v17  ;;  %v3771_v16 = vor.u32 %v5157_v6, %v3770_v10  ;;  %v3583_v17 = vor.u32 %v5106_v11, %v3580_v12 }
 0x14c   :  { %963 = vmatpush.bf16.msra.mxu2 %v3703_v20  ;;  %976 = vmatpush.bf16.msra.mxu3 %v3895_v21 }
 0x14f   :  { %938 = vmatpush.bf16.msra.mxu0 %v3675_v29  ;;  %951 = vmatpush.bf16.msra.mxu1 %v3867_v30 }
 0x150   :  { %964 = vmatpush.bf16.msra.mxu2 %v3679_v33  ;;  %977 = vmatpush.bf16.msra.mxu3 %v3871_v34 }
 0x151   :  { %891 = vmatmul.bf16.vlgmr.msrb.gmra.mxu0 %v5995_v53  ;;  %904 = vmatmul.bf16.vlgmr.msrb.gmra.mxu1 %v5997_v54 }
 0x152   :  { %917 = vmatmul.bf16.vlgmr.msrb.gmra.mxu2 %v5995_v53  ;;  %930 = vmatmul.bf16.vlgmr.msrb.gmra.mxu3 %v5997_v54 }
 0x153   :  { %939 = vmatpush.bf16.msra.mxu0 %v3651_v0  ;;  %952 = vmatpush.bf16.msra.mxu1 %v3843_v42 }
 0x154   :  { %965 = vmatpush.bf16.msra.mxu2 %v3655_v44  ;;  %978 = vmatpush.bf16.msra.mxu3 %v3847_v45 }
 0x157   :  { %940 = vmatpush.bf16.msra.mxu0 %v3627_v52  ;;  %953 = vmatpush.bf16.msra.mxu1 %v3819_v55 }
 0x158   :  { %966 = vmatpush.bf16.msra.mxu2 %v3631_v35  ;;  %979 = vmatpush.bf16.msra.mxu3 %v3823_v57 }
 0x15b   :  { %941 = vmatpush.bf16.msra.mxu0 %v3603_v2  ;;  %954 = vmatpush.bf16.msra.mxu1 %v3795_v3 }
 0x15c   :  { %967 = vmatpush.bf16.msra.mxu2 %v3607_v8  ;;  %980 = vmatpush.bf16.msra.mxu3 %v3799_v9  ;;  %v990_v9 = vld [vmem:[#allocation6] sm:$0xff] }
 0x15f   :  { %942 = vmatpush.bf16.msra.mxu0 %v3579_v15  ;;  %955 = vmatpush.bf16.msra.mxu1 %v3771_v16 }
 0x160   :  { %968 = vmatpush.bf16.msra.mxu2 %v3583_v17  ;;  %981 = vmatpush.bf16.msra.mxu3 %v3775_v18 }
 0x162   :  { %943 = vmatmul.bf16.vlgmr.msra.gmra.mxu0 %v5995_v53  ;;  %956 = vmatmul.bf16.vlgmr.msra.gmra.mxu1 %v5997_v54 }
 0x163   :  { %969 = vmatmul.bf16.vlgmr.msra.gmra.mxu2 %v5995_v53  ;;  %982 = vmatmul.bf16.vlgmr.msra.gmra.mxu3 %v5997_v54 }
 0x1be   :  { %v840_v19 = vpop.f32.mrf.mxu0  ;;  %v853_v20 = vpop.f32.mrf.mxu1 }
 0x1bf   :  { %v854_v54 = vadd.f32 %v853_v20, %v840_v19 }
 0x1c5   :  { %v866_v21 = vpop.f32.mrf.mxu2  ;;  %v879_v23 = vpop.f32.mrf.mxu3 }
 0x1c6   :  { %v842_v24 = vpop.f32.mrf.mxu0  ;;  %v855_v25 = vpop.f32.mrf.mxu1  ;;  %v880_v53 = vadd.f32 %v879_v23, %v866_v21 }
 0x1c8   :  { %v987_v41 = vpack.c.bf16 %v880_v53, %v854_v54 }
 0x1ca   :  { %v1119_v47 = vunpack.c.h.b16 %v987_v41  ;;  %v1048_v48 = vunpack.c.l.b16 %v987_v41 }
 0x1cc   :  { %v1120_v49 = vpack.c.b16 %v1119_v47, %v1119_v47  ;;  %v1049_v50 = vpack.c.b16 %v1048_v48, %v1048_v48 }
 0x1cd   :  { %v868_v26 = vpop.f32.mrf.mxu2  ;;  %v881_v27 = vpop.f32.mrf.mxu3 }
 0x1ce   :  { %v892_v28 = vpop.f32.mrf.mxu0  ;;  %v905_v29 = vpop.f32.mrf.mxu1 }
 0x1cf   :  { %v906_v32 = vadd.f32 %v905_v29, %v892_v28 }
 0x1d5   :  { %v918_v30 = vpop.f32.mrf.mxu2  ;;  %v931_v31 = vpop.f32.mrf.mxu3 }
 0x1d6   :  { %v932_v33 = vadd.f32 %v931_v31, %v918_v30  ;;  %v894_v34 = vpop.f32.mrf.mxu0  ;;  %v907_v36 = vpop.f32.mrf.mxu1 }
 0x1d8   :  { %v988_v37 = vpack.c.bf16 %v932_v33, %v906_v32 }
 0x1da   :  { %v996_v38 = vsel %vm991_vm4, %v988_v37, 0  ;;  %v1121_v39 = vunpack.c.h.b16 %v988_v37  ;;  %v1053_v40 = vunpack.c.l.b16 %v988_v37 }
 0x1db   :  { %1005 = vmatpush.bf16.xpose.msrb.mxu0 %v996_v38 }
 0x1dc   :  { %v1122_v0 = vpack.c.b16 %v1121_v39, %v1121_v39  ;;  %v1054_v42 = vpack.c.b16 %v1053_v40, %v1053_v40 }
 0x1dd   :  { %v920_v43 = vpop.f32.mrf.mxu2  ;;  %v933_v1 = vpop.f32.mrf.mxu3 }
 0x1de   :  { %1179 = vrot.lane.b32.xlu2 %v1122_v0, %s5852_s8  ;;  %1055 = vrot.lane.b32.xlu1 %v1054_v42, %s5852_s8  ;;  %v1127_v44 = vsel %vm991_vm4, %v1122_v0, 0 }
 0x1df   :  { %v944_v45 = vpop.f32.mrf.mxu0  ;;  %v957_v46 = vpop.f32.mrf.mxu1 }
 0x1e0   :  { %v958_v55 = vadd.f32 %v957_v46, %v944_v45 }
 0x1e2   :  { %3944 = vmatmul.msk.bf16.vlgmr.msrb.gmra.mxu0 %vm991_vm4, %v987_v41 }
 0x1e3   :  { %1136 = vmatpush.bf16.xpose.msra.mxu0 %v1127_v44 }
 0x1e6   :  { %v970_v51 = vpop.f32.mrf.mxu2  ;;  %v983_v52 = vpop.f32.mrf.mxu3  ;;  %1177 = vrot.lane.b32.xlu2 %v1120_v49, %s5852_s8  ;;  %1050 = vrot.lane.b32.xlu1 %v1049_v50, %s5852_s8 }
 0x1e7   :  { %v984_v4 = vadd.f32 %v983_v52, %v970_v51  ;;  %v946_v56 = vpop.f32.mrf.mxu0  ;;  %v959_v35 = vpop.f32.mrf.mxu1 }
 0x1e9   :  { %v989_v57 = vpack.c.bf16 %v984_v4, %v958_v55 }
 0x1eb   :  { %v1029_v58 = vsel %vm1027_vm5, %v989_v57, 0  ;;  %v1154_v59 = vunpack.c.h.b16 %v989_v57  ;;  %v1089_v23 = vunpack.c.l.b16 %v989_v57 }
 0x1ec   :  { %1038 = vmatpush.bf16.msrb.mxu1 %v1029_v58 }
 0x1ed   :  { %v1155_v60 = vpack.c.b16 %v1154_v59, %v1154_v59  ;;  %v1090_v25 = vpack.c.b16 %v1089_v23, %v1089_v23 }
 0x1ee   :  { %v972_v61 = vpop.f32.mrf.mxu2  ;;  %v985_v62 = vpop.f32.mrf.mxu3 }
 0x1ef   :  { %v1160_v63 = vsel %vm1027_vm5, %v1155_v60, 0 }
 0x1f0   :  { %1169 = vmatpush.bf16.msra.mxu1 %v1160_v63 }
 0x1f2   :  { %3948 = vmatmul.msk.bf16.vlgmr.msra.gmra.mxu0 %vm991_vm4, %v1120_v49 }
 0x238   :  { %v1180_v2 = vpop.permute.xlu2 %1179 }
 0x239   :  { %v1185_v7 = vsel %vm991_vm4, %v1180_v2, 0 }
 0x240   :  { %v1178_v13 = vpop.permute.xlu2 %1177 }
 0x250   :  { %v1056_v3 = vpop.permute.xlu1 %1055 }
 0x251   :  { %v1061_v5 = vsel %vm991_vm4, %v1056_v3, 0 }
 0x252   :  { %1070 = vmatpush.bf16.xpose.msrb.mxu2 %v1061_v5 }
 0x258   :  { %v1051_v8 = vpop.permute.xlu1 %1050 }
 0x259   :  { %3946 = vmatmul.msk.bf16.vlgmr.msrb.gmra.mxu2 %vm991_vm4, %v1051_v8 }
 0x25a   :  { %1194 = vmatpush.bf16.xpose.msra.mxu2 %v1185_v7 }
 0x25f   :  { %v1007_v10 = vpop.f32.mrf.mxu0 }
 0x260   :  { %v1008_v6 = vadd.f32 %v1007_v10, %v990_v9 }
 0x262   :  { %v1012_v11 = vsel %vm1011_vm6, %v1008_v6, -inf }
 0x263   :  { %1013 = vmax.xlane.f32.xlu2 %v1012_v11 }
 0x267   :  { %v1009_v12 = vpop.f32.mrf.mxu0 }
 0x269   :  { %3950 = vmatmul.msk.bf16.vlgmr.msra.gmra.mxu2 %vm991_vm4, %v1178_v13 }
 0x26f   :  { %v1138_v14 = vpop.f32.mrf.mxu0 }
 0x270   :  { %v1139_v32 = vadd.f32 %v1138_v14, %v990_v9  ;;  %v4010_v14 = vld [vmem:[#allocation12 + $0x70] sm:$0xf] }
 0x272   :  { %v1142_v39 = vsel %vm1011_vm6, %v1139_v32, -inf }
 0x277   :  { %v1140_v15 = vpop.f32.mrf.mxu0 }
 0x278   :  { %v5215_v15 = vld [vmem:[#allocation12 + $0x74] sm:$0xf0] }
 0x2d6   :  { %v1014_v33 = vpop.xlane.xlu2 %1013 }
 0x2d7   :  { %v1015_v53 = vsub.f32 %v1008_v6, %v1014_v33  ;;  %v5212_v33 = vld [vmem:[#allocation12 + $0x64] sm:$0xf] }
 0x2d9   :  { %v1016_v40 = vmul.f32 1.442695, %v1015_v53 }
 0x2dc   :  { %v1072_v16 = vpop.f32.mrf.mxu2 }
 0x2dd   :  { %v1073_v17 = vadd.f32 %v1072_v16, %v990_v9  ;;  %v4074_v16 = vld [vmem:[#allocation12 + $0xf0] sm:$0xf] }
 0x2df   :  { %v1076_v18 = vsel %vm1011_vm6, %v1073_v17, -inf }
 0x2e0   :  { %1077 = vmax.xlane.f32.xlu0 %v1076_v18  ;;  %v5231_v18 = vld [vmem:[#allocation12 + $0xf4] sm:$0xf0] }
 0x2e4   :  { %v1074_v19 = vpop.f32.mrf.mxu2 }
 0x2e5   :  { %v5214_v19 = vld [vmem:[#allocation12 + $0x74] sm:$0xf] }
 0x2ec   :  { %v1196_v20 = vpop.f32.mrf.mxu2 }
 0x2ed   :  { %v1197_v21 = vadd.f32 %v1196_v20, %v990_v9  ;;  %v4012_v20 = vld [vmem:[#allocation12 + $0x78] sm:$0xf0] }
 0x2ee   :  { %v4015_v23 = vor.u32 %v5214_v19, %v4012_v20 }
 0x2ef   :  { %v1200_v24 = vsel %vm1011_vm6, %v1197_v21, -inf }
 0x2f0   :  { %1201 = vmax.xlane.f32.xlu1 %v1200_v24  ;;  %v5230_v24 = vld [vmem:[#allocation12 + $0xf4] sm:$0xf]  ;;  %1471 = vmatpush.bf16.msrb.mxu2 %v4015_v23  ;;  %v4036_v23 = vld [vmem:[#allocation12 + $0xa8] sm:$0xf0] }
 0x2f4   :  { %v1198_v26 = vpop.f32.mrf.mxu2  ;;  %1091 = vrot.lane.b32.xlu0 %v1090_v25, %s5852_s8  ;;  %v4076_v25 = vld [vmem:[#allocation12 + $0xf8] sm:$0xf0] }
 0x2f5   :  { %v4002_v26 = vld [vmem:[#allocation12 + $0x60] sm:$0xf] }
 0x309   :  { %1212 = vrot.lane.b32.xlu1 %v1155_v60, %s5852_s8 }
 0x353   :  { %v1078_v27 = vpop.xlane.xlu0 %1077 }
 0x354   :  { %v1079_v28 = vsub.f32 %v1073_v17, %v1078_v27  ;;  %v4011_v17 = vor.u32 %v5215_v15, %v4010_v14  ;;  %v4079_v27 = vor.u32 %v5230_v24, %v4076_v25  ;;  %v4034_v14 = vld [vmem:[#allocation12 + $0xa0] sm:$0xf]  ;;  %v3962_v25 = vld [vmem:[#allocation12 + $0x10] sm:$0xf] }
 0x356   :  { %v1080_v29 = vmul.f32 1.442695, %v1079_v28  ;;  %1445 = vmatpush.bf16.msrb.mxu0 %v4011_v17  ;;  %v5213_v28 = vld [vmem:[#allocation12 + $0x64] sm:$0xf0]  ;;  %v5204_v17 = vld [vmem:[#allocation12 + $0x24] sm:$0xf] }
 0x358   :  { %5512 = vpow2.f32 %v1080_v29  ;;  %v4066_v29 = vld [vmem:[#allocation12 + $0xe0] sm:$0xf] }
 0x35e   :  { %v5513_v30 = vpop.eup %5512 }
 0x35f   :  { %v1082_v31 = vsel %vm1011_vm6, %v5513_v30, 0.0 }
 0x360   :  { %1083 = vadd.xlane.f32.xlu0 %v1082_v31  ;;  %v4003_v31 = vor.u32 %v5213_v28, %v4002_v26  ;;  %v5203_v26 = vld [vmem:[#allocation12 + $0x14] sm:$0xf0] }
 0x361   :  { %v3963_v28 = vor.u32 %v5203_v26, %v3962_v25  ;;  %v4564_v25 = vld [vmem:[#allocation18 + $0x3e0] sm:$0xf0]  ;;  %v4274_v26 = vld [vmem:[#allocation18 + $0x180] sm:$0xf] }
 0x362   :  { %1446 = vmatpush.bf16.msrb.mxu0 %v4003_v31  ;;  %v3964_v31 = vld [vmem:[#allocation12 + $0x18] sm:$0xf0] }
 0x363   :  { %v1202_v34 = vpop.xlane.xlu1 %1201 }
 0x364   :  { %v1203_v36 = vsub.f32 %v1197_v21, %v1202_v34  ;;  %v4075_v21 = vor.u32 %v5231_v18, %v4074_v16  ;;  %v4004_v34 = vld [vmem:[#allocation12 + $0x68] sm:$0xf0]  ;;  %v5221_v16 = vld [vmem:[#allocation12 + $0xa4] sm:$0xf0] }
 0x365   :  { %v4007_v53 = vor.u32 %v5212_v33, %v4004_v34  ;;  %v3972_v18 = vld [vmem:[#allocation12 + $0x28] sm:$0xf0]  ;;  %v4035_v19 = vor.u32 %v5221_v16, %v4034_v14  ;;  %v5218_v34 = vld [vmem:[#allocation12 + $0x94] sm:$0xf]  ;;  %v4306_v14 = vld [vmem:[#allocation18 + $0x1c0] sm:$0xf] }
 0x366   :  { %v1204_v37 = vmul.f32 1.442695, %v1203_v36  ;;  %v1092_v54 = vpop.permute.xlu0 %1091  ;;  %v5228_v36 = vld [vmem:[#allocation12 + $0xe4] sm:$0xf]  ;;  %v3975_v20 = vor.u32 %v5204_v17, %v3972_v18 }
 0x367   :  { %v1097_v38 = vsel %vm1027_vm5, %v1092_v54, 0  ;;  %v3994_v54 = vld [vmem:[#allocation12 + $0x50] sm:$0xf]  ;;  %1472 = vmatpush.bf16.msrb.mxu2 %v4007_v53  ;;  %v3954_v53 = vld [vmem:[#allocation12] sm:$0xf] }
 0x368   :  { %5514 = vpow2.f32 %v1204_v37  ;;  %1106 = vmatpush.bf16.msrb.mxu3 %v1097_v38  ;;  %1143 = vmax.xlane.f32.xlu0 %v1142_v39  ;;  %v4068_v37 = vld [vmem:[#allocation12 + $0xe8] sm:$0xf0]  ;;  %v5211_v38 = vld [vmem:[#allocation12 + $0x54] sm:$0xf0]  ;;  %v4562_v16 = vld [vmem:[#allocation18 + $0x3c0] sm:$0xf] }
 0x369   :  { %5516 = vpow2.f32 %v1016_v40  ;;  %v4071_v39 = vor.u32 %v5228_v36, %v4068_v37  ;;  %v4058_v40 = vld [vmem:[#allocation12 + $0xd0] sm:$0xf]  ;;  %v4028_v36 = vld [vmem:[#allocation12 + $0x98] sm:$0xf0]  ;;  %v5356_v18 = vld [vmem:[#allocation18 + $0x3dc] sm:$0xf0] }
 0x36a   :  { %v4031_v37 = vor.u32 %v5218_v34, %v4028_v36  ;;  %v4276_v34 = vld [vmem:[#allocation18 + $0x1a0] sm:$0xf0] }
 0x36b   :  { %v5344_v36 = vld [vmem:[#allocation18 + $0x384] sm:$0xf] }
 0x36e   :  { %v5515_v41 = vpop.eup %5514 }
 0x36f   :  { %v1206_v0 = vsel %vm1011_vm6, %v5515_v41, 0.0  ;;  %v5517_v42 = vpop.eup %5516 }
 0x370   :  { %1207 = vadd.xlane.f32.xlu2 %v1206_v0  ;;  %v1018_v43 = vsel %vm1011_vm6, %v5517_v42, 0.0  ;;  %v5210_v0 = vld [vmem:[#allocation12 + $0x54] sm:$0xf] }
 0x378   :  { %1019 = vadd.xlane.f32.xlu2 %v1018_v43  ;;  %v3996_v43 = vld [vmem:[#allocation12 + $0x58] sm:$0xf0] }
 0x37b   :  { %v1213_v1 = vpop.permute.xlu1 %1212 }
 0x37c   :  { %v1218_v44 = vsel %vm1027_vm5, %v1213_v1, 0  ;;  %v5226_v1 = vld [vmem:[#allocation12 + $0xd4] sm:$0xf] }
 0x37d   :  { %1227 = vmatpush.bf16.msra.mxu3 %v1218_v44  ;;  %v4060_v44 = vld [vmem:[#allocation12 + $0xd8] sm:$0xf0] }
 0x3d3   :  { %v1084_v45 = vpop.xlane.xlu0 %1083 }
 0x3d4   :  { %5518 = vrcp.f32 %v1084_v45 }
 0x3da   :  { %v5519_v46 = vpop.eup %5518 }
 0x3db   :  { %v1086_v47 = vmul.f32 %v5519_v46, %v5513_v30  ;;  %v1144_v48 = vpop.xlane.xlu0 %1143  ;;  %v5229_v30 = vld [vmem:[#allocation12 + $0xe4] sm:$0xf0]  ;;  %v3999_v46 = vor.u32 %v5210_v0, %v3996_v43  ;;  %v5200_v0 = vld [vmem:[#allocation12 + $0x4] sm:$0xf] }
 0x3dc   :  { %v1145_v49 = vsub.f32 %v1139_v32, %v1144_v48  ;;  %v4067_v32 = vor.u32 %v5229_v30, %v4066_v29  ;;  %v5209_v48 = vld [vmem:[#allocation12 + $0x44] sm:$0xf0]  ;;  %v5219_v29 = vld [vmem:[#allocation12 + $0x94] sm:$0xf0]  ;;  %v5202_v30 = vld [vmem:[#allocation12 + $0x14] sm:$0xf] }
 0x3dd   :  { %v1087_v50 = vpack.c.bf16 %v1086_v47, %v1086_v47  ;;  %v3986_v47 = vld [vmem:[#allocation12 + $0x40] sm:$0xf]  ;;  %1473 = vmatpush.bf16.msrb.mxu2 %v3999_v46  ;;  %v3967_v33 = vor.u32 %v5202_v30, %v3964_v31  ;;  %v5216_v43 = vld [vmem:[#allocation12 + $0x84] sm:$0xf] }
 0x3de   :  { %v1146_v51 = vmul.f32 1.442695, %v1145_v49  ;;  %v4050_v49 = vld [vmem:[#allocation12 + $0xc0] sm:$0xf]  ;;  %v5348_v30 = vld [vmem:[#allocation18 + $0x39c] sm:$0xf0] }
 0x3df   :  { %3947 = vmatmul.msk.bf16.vlgmr.msrb.gmra.mxu3 %vm1011_vm6, %v1087_v50  ;;  %v4063_v50 = vor.u32 %v5226_v1, %v4060_v44  ;;  %v4020_v44 = vld [vmem:[#allocation12 + $0x88] sm:$0xf0] }
 0x3e0   :  { %5520 = vpow2.f32 %v1146_v51  ;;  %1484 = vmatpush.bf16.msrb.mxu3 %v4079_v27  ;;  %v5225_v51 = vld [vmem:[#allocation12 + $0xc4] sm:$0xf0]  ;;  %v4026_v27 = vld [vmem:[#allocation12 + $0x90] sm:$0xf] }
 0x3e3   :  { %v1208_v52 = vpop.xlane.xlu2 %1207 }
 0x3e4   :  { %5522 = vrcp.f32 %v1208_v52  ;;  %1485 = vmatpush.bf16.msrb.mxu3 %v4071_v39  ;;  %v5208_v52 = vld [vmem:[#allocation12 + $0x44] sm:$0xf]  ;;  %v5217_v39 = vld [vmem:[#allocation12 + $0x84] sm:$0xf0] }
 0x3e6   :  { %v5521_v55 = vpop.eup %5520 }
 0x3e7   :  { %v1148_v4 = vsel %vm1011_vm6, %v5521_v55, 0.0 }
 0x3e8   :  { %1149 = vadd.xlane.f32.xlu2 %v1148_v4  ;;  %v5224_v4 = vld [vmem:[#allocation12 + $0xc4] sm:$0xf]  ;;  %1486 = vmatpush.bf16.msrb.mxu3 %v4063_v50 }
 0x3ea   :  { %v5523_v56 = vpop.eup %5522 }
 0x3eb   :  { %v1210_v35 = vmul.f32 %v5523_v56, %v5515_v41  ;;  %v1020_v57 = vpop.xlane.xlu2 %1019  ;;  %v5227_v41 = vld [vmem:[#allocation12 + $0xd4] sm:$0xf0]  ;;  %v4052_v56 = vld [vmem:[#allocation12 + $0xc8] sm:$0xf0] }
 0x3ec   :  { %5524 = vrcp.f32 %v1020_v57  ;;  %v4059_v45 = vor.u32 %v5227_v41, %v4058_v40  ;;  %v4051_v57 = vor.u32 %v5225_v51, %v4050_v49 }
 0x3ed   :  { %v1211_v58 = vpack.c.bf16 %v1210_v35, %v1210_v35  ;;  %v3987_v35 = vor.u32 %v5209_v48, %v3986_v47 }
 0x3ef   :  { %3951 = vmatmul.msk.bf16.vlgmr.msra.gmra.mxu3 %vm1011_vm6, %v1211_v58 }
 0x3f2   :  { %v5525_v59 = vpop.eup %5524 }
 0x3f3   :  { %v1022_v60 = vmul.f32 %v5525_v59, %v5517_v42  ;;  %v3995_v42 = vor.u32 %v5211_v38, %v3994_v54  ;;  %v4055_v59 = vor.u32 %v5224_v4, %v4052_v56  ;;  %v5201_v54 = vld [vmem:[#allocation12 + $0x4] sm:$0xf0]  ;;  %v4018_v38 = vld [vmem:[#allocation12 + $0x80] sm:$0xf] }
 0x3f4   :  { %v3955_v40 = vor.u32 %v5201_v54, %v3954_v53  ;;  %v4019_v41 = vor.u32 %v5217_v39, %v4018_v38  ;;  %v1272_v56 = vld [vmem:[#allocation14] sm:$0x3]  ;;  %v4242_v54 = vld [vmem:[#allocation18 + $0x140] sm:$0xf] }
 0x3f5   :  { %v1023_v61 = vpack.c.bf16 %v1022_v60, %v1022_v60  ;;  %1447 = vmatpush.bf16.msrb.mxu0 %v3995_v42  ;;  %1487 = vmatpush.bf16.msrb.mxu3 %v4055_v59  ;;  %v3956_v42 = vld [vmem:[#allocation12 + $0x8] sm:$0xf0]  ;;  %v5276_v38 = vld [vmem:[#allocation18 + $0x15c] sm:$0xf0] }
 0x3f6   :  { %v3959_v1 = vor.u32 %v5200_v0, %v3956_v42  ;;  %v5272_v0 = vld [vmem:[#allocation18 + $0x144] sm:$0xf]  ;;  %v4243_v42 = vor.u32 %v5276_v38, %v4242_v54 }
 0x3f7   :  { %3945 = vmatmul.msk.bf16.vlgmr.msrb.gmra.mxu1 %vm1011_vm6, %v1023_v61  ;;  %v3978_v61 = vld [vmem:[#allocation12 + $0x30] sm:$0xf] }
 0x3f8   :  { %1458 = vmatpush.bf16.msrb.mxu1 %v4075_v21  ;;  %v5220_v21 = vld [vmem:[#allocation12 + $0xa4] sm:$0xf] }
 0x3f9   :  { %1448 = vmatpush.bf16.msrb.mxu0 %v3987_v35  ;;  %v4039_v24 = vor.u32 %v5220_v21, %v4036_v23  ;;  %v1274_v35 = vperm.slane %v1272_v56, 0  ;;  %v4563_v21 = vor.u32 %v5356_v18, %v4562_v16  ;;  %v5316_v16 = vld [vmem:[#allocation18 + $0x29c] sm:$0xf0]  ;;  %v4148_v18 = vld [vmem:[#allocation18 + $0xa0] sm:$0xf0] }
 0x3fc   :  { %1459 = vmatpush.bf16.msrb.mxu1 %v4067_v32  ;;  %v4027_v32 = vor.u32 %v5219_v29, %v4026_v27  ;;  %v4530_v29 = vld [vmem:[#allocation18 + $0x380] sm:$0xf] }
 0x400   :  { %1460 = vmatpush.bf16.msrb.mxu1 %v4059_v45  ;;  %v4023_v45 = vor.u32 %v5216_v43, %v4020_v44  ;;  %v4244_v43 = vld [vmem:[#allocation18 + $0x160] sm:$0xf0] }
 0x401   :  { %v4500_v44 = vld [vmem:[#allocation18 + $0x360] sm:$0xf0] }
 0x404   :  { %1461 = vmatpush.bf16.msrb.mxu1 %v4051_v57 }
 0x45b   :  { %v1150_v62 = vpop.xlane.xlu2 %1149 }
 0x45c   :  { %5526 = vrcp.f32 %v1150_v62  ;;  %v5207_v62 = vld [vmem:[#allocation12 + $0x34] sm:$0xf0] }
 0x462   :  { %v5527_v63 = vpop.eup %5526  ;;  %v1108_v2 = vpop.f32.mrf.mxu3 }
 0x463   :  { %v1152_v3 = vmul.f32 %v5527_v63, %v5521_v55  ;;  %v1112_v5 = vpack.c.bf16 %v1108_v2, %v1108_v2  ;;  %v3988_v55 = vld [vmem:[#allocation12 + $0x48] sm:$0xf0]  ;;  %v4042_v63 = vld [vmem:[#allocation12 + $0xb0] sm:$0xf]  ;;  %v3979_v2 = vor.u32 %v5207_v62, %v3978_v61 }
 0x464   :  { %v3991_v58 = vor.u32 %v5208_v52, %v3988_v55 }
 0x465   :  { %v1153_v7 = vpack.c.bf16 %v1152_v3, %v1152_v3  ;;  %1114 = vrot.lane.b32.xlu2 %v1112_v5, %s5852_s8  ;;  %v5223_v3 = vld [vmem:[#allocation12 + $0xb4] sm:$0xf0]  ;;  %v5206_v5 = vld [vmem:[#allocation12 + $0x34] sm:$0xf]  ;;  %1449 = vmatpush.bf16.msrb.mxu0 %v3979_v2 }
 0x466   :  { %1474 = vmatpush.bf16.msrb.mxu2 %v3991_v58 }
 0x467   :  { %3949 = vmatmul.msk.bf16.vlgmr.msra.gmra.mxu1 %vm1011_vm6, %v1153_v7  ;;  %v3980_v7 = vld [vmem:[#allocation12 + $0x38] sm:$0xf0] }
 0x46a   :  { %v1110_v8 = vpop.f32.mrf.mxu3 }
 0x46b   :  { %v4043_v8 = vor.u32 %v5223_v3, %v4042_v63 }
 0x46d   :  { %1462 = vmatpush.bf16.msrb.mxu1 %v4043_v8  ;;  %v5530_v8 = vld [vmem:[#allocation3] sm:$0xff] }
 0x471   :  { %1463 = vmatpush.bf16.msrb.mxu1 %v4035_v19  ;;  %v5288_v19 = vld [vmem:[#allocation18 + $0x1c4] sm:$0xf] }
 0x472   :  { %v1229_v9 = vpop.f32.mrf.mxu3 }
 0x473   :  { %v1233_v10 = vpack.c.bf16 %v1229_v9, %v1229_v9  ;;  %v3983_v9 = vor.u32 %v5206_v5, %v3980_v7 }
 0x474   :  { %v1040_v6 = vpop.f32.mrf.mxu1 }
 0x475   :  { %v1044_v11 = vpack.c.bf16 %v1040_v6, %v1040_v6  ;;  %1235 = vrot.lane.b32.xlu1 %v1233_v10, %s5852_s8  ;;  %v5222_v10 = vld [vmem:[#allocation12 + $0xb4] sm:$0xf]  ;;  %v4044_v6 = vld [vmem:[#allocation12 + $0xb8] sm:$0xf0]  ;;  %1475 = vmatpush.bf16.msrb.mxu2 %v3983_v9 }
 0x476   :  { %1464 = vmatpush.bf16.msrb.mxu1 %v4027_v32  ;;  %v4531_v32 = vor.u32 %v5348_v30, %v4530_v29  ;;  %v5308_v29 = vld [vmem:[#allocation18 + $0x25c] sm:$0xf0]  ;;  %v5240_v30 = vld [vmem:[#allocation18 + $0x44] sm:$0xf] }
 0x477   :  { %1046 = vst.msk [vmem:[#allocation2] sm:$0xf] %vm1045_vm7, %v1044_v11  ;;  %v4047_v11 = vor.u32 %v5222_v10, %v4044_v6  ;;  %v5531_v10 = vld [vmem:[#allocation3 + $0x8] sm:$0xff] }
 0x479   :  { %1488 = vmatpush.bf16.msrb.mxu3 %v4047_v11  ;;  %1476 = vmatpush.bf16.msrb.mxu2 %v3975_v20  ;;  %v4308_v20 = vld [vmem:[#allocation18 + $0x1e0] sm:$0xf0] }
 0x47a   :  { %v1231_v12 = vpop.f32.mrf.mxu3  ;;  %1465 = vmatpush.bf16.msrb.mxu1 %v4019_v41  ;;  %v4311_v23 = vor.u32 %v5288_v19, %v4308_v20  ;;  %v5340_v41 = vld [vmem:[#allocation18 + $0x35c] sm:$0xf0]  ;;  %v5312_v19 = vld [vmem:[#allocation18 + $0x284] sm:$0xf] }
 0x47b   :  { %v3970_v12 = vld [vmem:[#allocation12 + $0x20] sm:$0xf]  ;;  %v4404_v20 = vld [vmem:[#allocation18 + $0x2a0] sm:$0xf0] }
 0x47c   :  { %v1042_v13 = vpop.f32.mrf.mxu1 }
 0x47d   :  { %v5205_v13 = vld [vmem:[#allocation12 + $0x24] sm:$0xf0]  ;;  %1489 = vmatpush.bf16.msrb.mxu3 %v4039_v24  ;;  %1477 = vmatpush.bf16.msrb.mxu2 %v3967_v33 }
 0x47e   :  { %v3971_v15 = vor.u32 %v5205_v13, %v3970_v12  ;;  %v5352_v24 = vld [vmem:[#allocation18 + $0x3c4] sm:$0xf]  ;;  %2341 = vmatpush.bf16.msra.mxu1 %v4563_v21 }
 0x47f   :  { %v4567_v27 = vor.u32 %v5352_v24, %v4564_v25  ;;  %v5280_v33 = vld [vmem:[#allocation18 + $0x184] sm:$0xf]  ;;  %v4114_v25 = vld [vmem:[#allocation18 + $0x40] sm:$0xf] }
 0x480   :  { %1450 = vmatpush.bf16.msrb.mxu0 %v3971_v15  ;;  %v5292_v15 = vld [vmem:[#allocation18 + $0x1dc] sm:$0xf0]  ;;  %v4279_v53 = vor.u32 %v5280_v33, %v4276_v34  ;;  %v4372_v33 = vld [vmem:[#allocation18 + $0x260] sm:$0xf0] }
 0x481   :  { %1490 = vmatpush.bf16.msrb.mxu3 %v4031_v37  ;;  %1478 = vmatpush.bf16.msrb.mxu2 %v3959_v1  ;;  %v4307_v17 = vor.u32 %v5292_v15, %v4306_v14  ;;  %v4532_v37 = vld [vmem:[#allocation18 + $0x3a0] sm:$0xf0]  ;;  %v4402_v14 = vld [vmem:[#allocation18 + $0x280] sm:$0xf] }
 0x482   :  { %v4535_v39 = vor.u32 %v5344_v36, %v4532_v37  ;;  %v5336_v1 = vld [vmem:[#allocation18 + $0x344] sm:$0xf]  ;;  %2342 = vmatpush.bf16.msra.mxu1 %v4531_v32 }
 0x483   :  { %v5304_v32 = vld [vmem:[#allocation18 + $0x244] sm:$0xf] }
 0x484   :  { %1451 = vmatpush.bf16.msrb.mxu0 %v3963_v28  ;;  %v5284_v28 = vld [vmem:[#allocation18 + $0x19c] sm:$0xf0]  ;;  %v4375_v38 = vor.u32 %v5304_v32, %v4372_v33  ;;  %v4218_v32 = vld [vmem:[#allocation18 + $0x108] sm:$0xf] }
 0x485   :  { %1491 = vmatpush.bf16.msrb.mxu3 %v4023_v45  ;;  %2354 = vmatpush.bf16.msra.mxu2 %v4311_v23  ;;  %v4275_v31 = vor.u32 %v5284_v28, %v4274_v26  ;;  %v4403_v23 = vor.u32 %v5316_v16, %v4402_v14  ;;  %v5244_v26 = vld [vmem:[#allocation18 + $0x5c] sm:$0xf0]  ;;  %v4407_v28 = vor.u32 %v5312_v19, %v4404_v20  ;;  %v4284_v14 = vld [vmem:[#allocation18 + $0x1a8] sm:$0xf0]  ;;  %v4250_v19 = vld [vmem:[#allocation18 + $0x148] sm:$0xf] }
 0x486   :  { %v4115_v36 = vor.u32 %v5244_v26, %v4114_v25  ;;  %v4540_v16 = vld [vmem:[#allocation18 + $0x3a8] sm:$0xf0]  ;;  %v5277_v20 = vld [vmem:[#allocation18 + $0x164] sm:$0xf0] }
 0x487   :  { %v5273_v25 = vld [vmem:[#allocation18 + $0x14c] sm:$0xf]  ;;  %v5269_v33 = vld [vmem:[#allocation18 + $0x124] sm:$0xf0] }
 0x488   :  { %1452 = vmatpush.bf16.msrb.mxu0 %v3955_v40  ;;  %v4498_v40 = vld [vmem:[#allocation18 + $0x340] sm:$0xf]  ;;  %v4252_v26 = vld [vmem:[#allocation18 + $0x168] sm:$0xf0] }
 0x489   :  { %2367 = vmatpush.bf16.msra.mxu3 %v4567_v27  ;;  %2355 = vmatpush.bf16.msra.mxu2 %v4279_v53  ;;  %v4499_v45 = vor.u32 %v5340_v41, %v4498_v40  ;;  %v4370_v27 = vld [vmem:[#allocation18 + $0x240] sm:$0xf] }
 0x48a   :  { %v4371_v37 = vor.u32 %v5308_v29, %v4370_v27  ;;  %v5337_v29 = vld [vmem:[#allocation18 + $0x34c] sm:$0xf] }
 0x48b   :  { %2343 = vmatpush.bf16.msra.mxu1 %v4499_v45 }
 0x48c   :  { %2328 = vmatpush.bf16.msra.mxu0 %v4307_v17  ;;  %v5248_v17 = vld [vmem:[#allocation18 + $0x84] sm:$0xf] }
 0x48d   :  { %2368 = vmatpush.bf16.msra.mxu3 %v4535_v39  ;;  %v4151_v24 = vor.u32 %v5248_v17, %v4148_v18 }
 0x490   :  { %2329 = vmatpush.bf16.msra.mxu0 %v4275_v31  ;;  %v4116_v31 = vld [vmem:[#allocation18 + $0x60] sm:$0xf0] }
 0x491   :  { %v4119_v54 = vor.u32 %v5240_v30, %v4116_v31  ;;  %v4508_v30 = vld [vmem:[#allocation18 + $0x368] sm:$0xf0] }
 0x492   :  { %v4511_v31 = vor.u32 %v5337_v29, %v4508_v30  ;;  %v5297_v30 = vld [vmem:[#allocation18 + $0x20c] sm:$0xf] }
 0x494   :  { %2330 = vmatpush.bf16.msra.mxu0 %v4243_v42 }
 0x4bf   :  { %v1115_v60 = vpop.permute.xlu2 %1114 }
 0x4c0   :  { %1118 = vst.msk [vmem:[#allocation2] sm:$0xf] %vm1117_vm8, %v1115_v60  ;;  %v1275_v60 = vperm.slane %v1272_v56, 1  ;;  %v4468_v56 = vld [vmem:[#allocation18 + $0x320] sm:$0xf0] }
 0x4e4   :  { %v1171_v46 = vpop.f32.mrf.mxu1 }
 0x4e5   :  { %v1175_v47 = vpack.c.bf16 %v1171_v46, %v1171_v46  ;;  %v4247_v46 = vor.u32 %v5272_v0, %v4244_v43  ;;  %v4082_v43 = vld [vmem:[#allocation18] sm:$0xf] }
 0x4e7   :  { %1176 = vst.msk [vmem:[#allocation2 + $0x4] sm:$0xf] %vm1045_vm7, %v1175_v47  ;;  %v1236_v48 = vpop.permute.xlu1 %1235  ;;  %v4210_v47 = vld [vmem:[#allocation18 + $0x100] sm:$0xf]  ;;  %2356 = vmatpush.bf16.msra.mxu2 %v4247_v46 }
 0x4e8   :  { %1238 = vst.msk [vmem:[#allocation2 + $0x4] sm:$0xf] %vm1117_vm8, %v1236_v48  ;;  %v5268_v48 = vld [vmem:[#allocation18 + $0x11c] sm:$0xf0] }
 0x4e9   :  { %v5300_v46 = vld [vmem:[#allocation18 + $0x21c] sm:$0xf0] }
 0x4ec   :  { %v1173_v49 = vpop.f32.mrf.mxu1 }
 0x4ed   :  { %v4466_v49 = vld [vmem:[#allocation18 + $0x300] sm:$0xf] }
 0x4ef   :  { %v1239_v50 = vld [vmem:[#allocation2] sm:$0xff] }
 0x4f0   :  { %v1279_v51 = vunpack.c.l.b16 %v1239_v50  ;;  %v1280_v52 = vunpack.c.h.b16 %v1239_v50  ;;  %v4503_v50 = vor.u32 %v5336_v1, %v4500_v44  ;;  %v5236_v1 = vld [vmem:[#allocation18 + $0x1c] sm:$0xf0] }
 0x4f1   :  { %v4338_v44 = vld [vmem:[#allocation18 + $0x200] sm:$0xf]  ;;  %v4083_v45 = vor.u32 %v5236_v1, %v4082_v43  ;;  %v4186_v1 = vld [vmem:[#allocation18 + $0xc8] sm:$0xf] }
 0x4f2   :  { %v1281_v55 = vpack.c.b16 %v1279_v51, %v1279_v51  ;;  %v1282_v4 = vpack.c.b16 %v1280_v52, %v1280_v52  ;;  %v5332_v51 = vld [vmem:[#allocation18 + $0x31c] sm:$0xf0]  ;;  %v5264_v52 = vld [vmem:[#allocation18 + $0x104] sm:$0xf]  ;;  %2369 = vmatpush.bf16.msra.mxu3 %v4503_v50 }
 0x4f4   :  { %1453 = vmatmul.bf16.vlgmr.msrb.gmra.mxu0 %v1281_v55  ;;  %1466 = vmatmul.bf16.vlgmr.msrb.gmra.mxu1 %v1282_v4 }
 0x4f5   :  { %1479 = vmatmul.bf16.vlgmr.msrb.gmra.mxu2 %v1281_v55  ;;  %1492 = vmatmul.bf16.vlgmr.msrb.gmra.mxu3 %v1282_v4  ;;  %v4212_v55 = vld [vmem:[#allocation18 + $0x120] sm:$0xf0] }
 0x4f6   :  { %v5328_v4 = vld [vmem:[#allocation18 + $0x304] sm:$0xf] }
 0x571   :  { %v1454_v57 = vpop.f32.mrf.mxu0  ;;  %v1467_v58 = vpop.f32.mrf.mxu1 }
 0x572   :  { %v1455_v59 = vadd.f32 %v1454_v57, %v1274_v35  ;;  %v4211_v35 = vor.u32 %v5268_v48, %v4210_v47  ;;  %v4467_v57 = vor.u32 %v5332_v51, %v4466_v49  ;;  %v5232_v47 = vld [vmem:[#allocation18 + $0x4] sm:$0xf]  ;;  %v4339_v49 = vor.u32 %v5300_v46, %v4338_v44  ;;  %v5261_v44 = vld [vmem:[#allocation18 + $0xe4] sm:$0xf0] }
 0x573   :  { %v4084_v48 = vld [vmem:[#allocation18 + $0x20] sm:$0xf0]  ;;  %v4187_v46 = vor.u32 %v5261_v44, %v4186_v1 }
 0x574   :  { %v1468_v63 = vadd.f32 %v1467_v58, %v1455_v59  ;;  %v4215_v58 = vor.u32 %v5264_v52, %v4212_v55  ;;  %v4178_v59 = vld [vmem:[#allocation18 + $0xc0] sm:$0xf]  ;;  %2331 = vmatpush.bf16.msra.mxu0 %v4211_v35  ;;  %2344 = vmatpush.bf16.msra.mxu1 %v4467_v57  ;;  %v4087_v50 = vor.u32 %v5232_v47, %v4084_v48  ;;  %v5296_v51 = vld [vmem:[#allocation18 + $0x204] sm:$0xf]  ;;  %v4314_v55 = vld [vmem:[#allocation18 + $0x1c8] sm:$0xf] }
 0x575   :  { %v4340_v52 = vld [vmem:[#allocation18 + $0x220] sm:$0xf0]  ;;  %v4570_v35 = vld [vmem:[#allocation18 + $0x3c8] sm:$0xf]  ;;  %v5257_v48 = vld [vmem:[#allocation18 + $0xcc] sm:$0xf] }
 0x576   :  { %v6047_v9 = vadd.f32 %v5530_v8, %v1468_v63  ;;  %v5324_v63 = vld [vmem:[#allocation18 + $0x2dc] sm:$0xf0]  ;;  %2357 = vmatpush.bf16.msra.mxu2 %v4215_v58  ;;  %v5357_v57 = vld [vmem:[#allocation18 + $0x3e4] sm:$0xf0] }
 0x577   :  { %v5325_v47 = vld [vmem:[#allocation18 + $0x2e4] sm:$0xf0] }
 0x578   :  { %v1480_v61 = vpop.f32.mrf.mxu2  ;;  %v1493_v62 = vpop.f32.mrf.mxu3 }
 0x579   :  { %v1481_v2 = vadd.f32 %v1480_v61, %v1275_v60  ;;  %v1456_v3 = vpop.f32.mrf.mxu0  ;;  %v1469_v5 = vpop.f32.mrf.mxu1  ;;  %v5260_v60 = vld [vmem:[#allocation18 + $0xdc] sm:$0xf0] }
 0x57a   :  { %v4434_v61 = vld [vmem:[#allocation18 + $0x2c0] sm:$0xf]  ;;  %v4180_v3 = vld [vmem:[#allocation18 + $0xe0] sm:$0xf0]  ;;  %v4179_v8 = vor.u32 %v5260_v60, %v4178_v59  ;;  %v4571_v59 = vor.u32 %v5357_v57, %v4570_v35  ;;  %v5289_v60 = vld [vmem:[#allocation18 + $0x1cc] sm:$0xf] }
 0x57b   :  { %v1494_v7 = vadd.f32 %v1493_v62, %v1481_v2  ;;  %v4471_v62 = vor.u32 %v5328_v4, %v4468_v56  ;;  %v5256_v2 = vld [vmem:[#allocation18 + $0xc4] sm:$0xf]  ;;  %v4343_v4 = vor.u32 %v5296_v51, %v4340_v52  ;;  %v5293_v56 = vld [vmem:[#allocation18 + $0x1e4] sm:$0xf0]  ;;  %v5321_v52 = vld [vmem:[#allocation18 + $0x2cc] sm:$0xf] }
 0x57c   :  { %v5320_v5 = vld [vmem:[#allocation18 + $0x2c4] sm:$0xf]  ;;  %2332 = vmatpush.bf16.msra.mxu0 %v4179_v8  ;;  %v4315_v58 = vor.u32 %v5293_v56, %v4314_v55  ;;  %v4444_v55 = vld [vmem:[#allocation18 + $0x2e8] sm:$0xf0]  ;;  %v4154_v56 = vld [vmem:[#allocation18 + $0x88] sm:$0xf] }
 0x57d   :  { %v6049_v6 = vadd.f32 %v5531_v10, %v1494_v7  ;;  %v4436_v7 = vld [vmem:[#allocation18 + $0x2e0] sm:$0xf0]  ;;  %v4435_v10 = vor.u32 %v5324_v63, %v4434_v61  ;;  %2370 = vmatpush.bf16.msra.mxu3 %v4471_v62  ;;  %v4316_v61 = vld [vmem:[#allocation18 + $0x1e8] sm:$0xf0]  ;;  %v5253_v35 = vld [vmem:[#allocation18 + $0xa4] sm:$0xf0] }
 0x57e   :  { %v4439_v15 = vor.u32 %v5320_v5, %v4436_v7  ;;  %v5353_v62 = vld [vmem:[#allocation18 + $0x3cc] sm:$0xf]  ;;  %v4319_v63 = vor.u32 %v5289_v60, %v4316_v61  ;;  %v5285_v5 = vld [vmem:[#allocation18 + $0x1a4] sm:$0xf0] }
 0x57f   :  { %v1501_v11 = vadd.f32 %v6049_v6, %v6047_v9  ;;  %2345 = vmatpush.bf16.msra.mxu1 %v4435_v10  ;;  %v4538_v10 = vld [vmem:[#allocation18 + $0x388] sm:$0xf]  ;;  %v5249_v60 = vld [vmem:[#allocation18 + $0x8c] sm:$0xf] }
 0x580   :  { %v1482_v12 = vpop.f32.mrf.mxu2  ;;  %v1495_v13 = vpop.f32.mrf.mxu3  ;;  %v4410_v57 = vld [vmem:[#allocation18 + $0x288] sm:$0xf]  ;;  %v4156_v61 = vld [vmem:[#allocation18 + $0xa8] sm:$0xf0] }
 0x581   :  { %1502 = vadd.xlane.f32.xlu1 %v1501_v11  ;;  %v4183_v11 = vor.u32 %v5256_v2, %v4180_v3  ;;  %v4146_v12 = vld [vmem:[#allocation18 + $0x80] sm:$0xf]  ;;  %2371 = vmatpush.bf16.msra.mxu3 %v4439_v15  ;;  %v4572_v2 = vld [vmem:[#allocation18 + $0x3e8] sm:$0xf0]  ;;  %v4282_v3 = vld [vmem:[#allocation18 + $0x188] sm:$0xf] }
 0x582   :  { %v5252_v13 = vld [vmem:[#allocation18 + $0x9c] sm:$0xf0]  ;;  %v4575_v7 = vor.u32 %v5353_v62, %v4572_v2  ;;  %v4283_v8 = vor.u32 %v5285_v5, %v4282_v3  ;;  %v5345_v15 = vld [vmem:[#allocation18 + $0x38c] sm:$0xf] }
 0x583   :  { %v4147_v21 = vor.u32 %v5252_v13, %v4146_v12  ;;  %2358 = vmatpush.bf16.msra.mxu2 %v4183_v11  ;;  %2346 = vmatpush.bf16.msra.mxu1 %v4403_v23  ;;  %v5349_v11 = vld [vmem:[#allocation18 + $0x3a4] sm:$0xf0]  ;;  %v5281_v12 = vld [vmem:[#allocation18 + $0x18c] sm:$0xf]  ;;  %v4543_v18 = vor.u32 %v5345_v15, %v4540_v16  ;;  %v4251_v23 = vor.u32 %v5277_v20, %v4250_v19 }
 0x584   :  { %v4539_v13 = vor.u32 %v5349_v11, %v4538_v10  ;;  %v4287_v17 = vor.u32 %v5281_v12, %v4284_v14  ;;  %v5313_v2 = vld [vmem:[#allocation18 + $0x28c] sm:$0xf]  ;;  %v4378_v10 = vld [vmem:[#allocation18 + $0x248] sm:$0xf] }
 0x585   :  { %2333 = vmatpush.bf16.msra.mxu0 %v4147_v21  ;;  %2372 = vmatpush.bf16.msra.mxu3 %v4407_v28  ;;  %v4506_v21 = vld [vmem:[#allocation18 + $0x348] sm:$0xf]  ;;  %v4255_v28 = vor.u32 %v5273_v25, %v4252_v26  ;;  %v4412_v3 = vld [vmem:[#allocation18 + $0x2a8] sm:$0xf0] }
 0x586   :  { %v4415_v5 = vor.u32 %v5313_v2, %v4412_v3  ;;  %v5309_v12 = vld [vmem:[#allocation18 + $0x264] sm:$0xf0]  ;;  %v4124_v14 = vld [vmem:[#allocation18 + $0x68] sm:$0xf0]  ;;  %v4290_v2 = vld [vmem:[#allocation18 + $0x190] sm:$0xf] }
 0x587   :  { %2359 = vmatpush.bf16.msra.mxu2 %v4151_v24  ;;  %2347 = vmatpush.bf16.msra.mxu1 %v4371_v37  ;;  %v5341_v24 = vld [vmem:[#allocation18 + $0x364] sm:$0xf0]  ;;  %v5265_v37 = vld [vmem:[#allocation18 + $0x10c] sm:$0xf]  ;;  %v4379_v15 = vor.u32 %v5309_v12, %v4378_v10  ;;  %v5282_v10 = vld [vmem:[#allocation18 + $0x194] sm:$0xf] }
 0x588   :  { %v4507_v27 = vor.u32 %v5341_v24, %v4506_v21  ;;  %v4090_v20 = vld [vmem:[#allocation18 + $0x8] sm:$0xf]  ;;  %v5233_v26 = vld [vmem:[#allocation18 + $0xc] sm:$0xf]  ;;  %v5346_v12 = vld [vmem:[#allocation18 + $0x394] sm:$0xf] }
 0x589   :  { %2334 = vmatpush.bf16.msra.mxu0 %v4115_v36  ;;  %2373 = vmatpush.bf16.msra.mxu3 %v4375_v38  ;;  %v4219_v36 = vor.u32 %v5269_v33, %v4218_v32  ;;  %v5237_v21 = vld [vmem:[#allocation18 + $0x24] sm:$0xf0] }
 0x58a   :  { %v4091_v24 = vor.u32 %v5237_v21, %v4090_v20  ;;  %v5301_v25 = vld [vmem:[#allocation18 + $0x224] sm:$0xf0]  ;;  %v4514_v20 = vld [vmem:[#allocation18 + $0x350] sm:$0xf] }
 0x58b   :  { %2360 = vmatpush.bf16.msra.mxu2 %v4119_v54  ;;  %2348 = vmatpush.bf16.msra.mxu1 %v4339_v49  ;;  %v4220_v54 = vld [vmem:[#allocation18 + $0x128] sm:$0xf0]  ;;  %v5342_v21 = vld [vmem:[#allocation18 + $0x36c] sm:$0xf0] }
 0x58c   :  { %v4188_v49 = vld [vmem:[#allocation18 + $0xe8] sm:$0xf0] }
 0x58d   :  { %2335 = vmatpush.bf16.msra.mxu0 %v4083_v45  ;;  %2374 = vmatpush.bf16.msra.mxu3 %v4343_v4  ;;  %v4442_v45 = vld [vmem:[#allocation18 + $0x2c8] sm:$0xf]  ;;  %v4191_v51 = vor.u32 %v5257_v48, %v4188_v49  ;;  %v4447_v4 = vor.u32 %v5321_v52, %v4444_v55  ;;  %v5294_v52 = vld [vmem:[#allocation18 + $0x1ec] sm:$0xf0] }
 0x58e   :  { %v4578_v55 = vld [vmem:[#allocation18 + $0x3d0] sm:$0xf] }
 0x58f   :  { %2361 = vmatpush.bf16.msra.mxu2 %v4087_v50  ;;  %2393 = vmatpush.bf16.msrb.mxu1 %v4571_v59  ;;  %v4443_v50 = vor.u32 %v5325_v47, %v4442_v45  ;;  %v5317_v59 = vld [vmem:[#allocation18 + $0x2a4] sm:$0xf0] }
 0x590   :  { %v4411_v62 = vor.u32 %v5317_v59, %v4410_v57  ;;  %v5354_v59 = vld [vmem:[#allocation18 + $0x3d4] sm:$0xf] }
 0x591   :  { %2380 = vmatpush.bf16.msrb.mxu0 %v4315_v58  ;;  %2419 = vmatpush.bf16.msrb.mxu3 %v4575_v7  ;;  %v4155_v58 = vor.u32 %v5253_v35, %v4154_v56  ;;  %v4122_v7 = vld [vmem:[#allocation18 + $0x48] sm:$0xf]  ;;  %v5290_v56 = vld [vmem:[#allocation18 + $0x1d4] sm:$0xf] }
 0x593   :  { %2406 = vmatpush.bf16.msrb.mxu2 %v4319_v63  ;;  %2394 = vmatpush.bf16.msrb.mxu1 %v4539_v13  ;;  %v4159_v63 = vor.u32 %v5249_v60, %v4156_v61  ;;  %v5241_v13 = vld [vmem:[#allocation18 + $0x4c] sm:$0xf]  ;;  %v4580_v60 = vld [vmem:[#allocation18 + $0x3f0] sm:$0xf0] }
 0x594   :  { %v4127_v16 = vor.u32 %v5241_v13, %v4124_v14  ;;  %v4548_v13 = vld [vmem:[#allocation18 + $0x3b0] sm:$0xf0] }
 0x595   :  { %2381 = vmatpush.bf16.msrb.mxu0 %v4283_v8  ;;  %2420 = vmatpush.bf16.msrb.mxu3 %v4543_v18  ;;  %v5245_v8 = vld [vmem:[#allocation18 + $0x64] sm:$0xf0]  ;;  %v4380_v18 = vld [vmem:[#allocation18 + $0x268] sm:$0xf0] }
 0x596   :  { %v4123_v11 = vor.u32 %v5245_v8, %v4122_v7  ;;  %v4546_v7 = vld [vmem:[#allocation18 + $0x390] sm:$0xf] }
 0x597   :  { %2407 = vmatpush.bf16.msrb.mxu2 %v4287_v17  ;;  %2395 = vmatpush.bf16.msrb.mxu1 %v4507_v27  ;;  %v5305_v17 = vld [vmem:[#allocation18 + $0x24c] sm:$0xf]  ;;  %v5350_v8 = vld [vmem:[#allocation18 + $0x3ac] sm:$0xf0] }
 0x598   :  { %v4383_v19 = vor.u32 %v5305_v17, %v4380_v18  ;;  %v4092_v27 = vld [vmem:[#allocation18 + $0x28] sm:$0xf0]  ;;  %v5278_v17 = vld [vmem:[#allocation18 + $0x16c] sm:$0xf0] }
 0x599   :  { %2382 = vmatpush.bf16.msrb.mxu0 %v4251_v23  ;;  %2421 = vmatpush.bf16.msrb.mxu3 %v4511_v31  ;;  %v4346_v23 = vld [vmem:[#allocation18 + $0x208] sm:$0xf]  ;;  %v4095_v29 = vor.u32 %v5233_v26, %v4092_v27  ;;  %v4348_v31 = vld [vmem:[#allocation18 + $0x228] sm:$0xf0]  ;;  %v4516_v26 = vld [vmem:[#allocation18 + $0x370] sm:$0xf0] }
 0x59a   :  { %v4351_v32 = vor.u32 %v5297_v30, %v4348_v31  ;;  %v5270_v30 = vld [vmem:[#allocation18 + $0x12c] sm:$0xf0] }
 0x59b   :  { %2408 = vmatpush.bf16.msrb.mxu2 %v4255_v28  ;;  %v4347_v28 = vor.u32 %v5301_v25, %v4346_v23  ;;  %v5274_v23 = vld [vmem:[#allocation18 + $0x154] sm:$0xf] }
 0x59c   :  { %v5338_v25 = vld [vmem:[#allocation18 + $0x354] sm:$0xf] }
 0x59d   :  { %2383 = vmatpush.bf16.msrb.mxu0 %v4219_v36 }
 0x5a1   :  { %2384 = vmatpush.bf16.msrb.mxu0 %v4187_v46 }
 0x5a5   :  { %2385 = vmatpush.bf16.msrb.mxu0 %v4155_v58  ;;  %v4324_v58 = vld [vmem:[#allocation18 + $0x1f0] sm:$0xf0] }
 0x5a6   :  { %v4327_v3 = vor.u32 %v5290_v56, %v4324_v58  ;;  %v4418_v56 = vld [vmem:[#allocation18 + $0x290] sm:$0xf]  ;;  %v4164_v58 = vld [vmem:[#allocation18 + $0xb0] sm:$0xf0] }
 0x5a9   :  { %2386 = vmatpush.bf16.msrb.mxu0 %v4123_v11  ;;  %v4292_v11 = vld [vmem:[#allocation18 + $0x1b0] sm:$0xf0] }
 0x5aa   :  { %v4295_v18 = vor.u32 %v5282_v10, %v4292_v11  ;;  %v5242_v10 = vld [vmem:[#allocation18 + $0x54] sm:$0xf] }
 0x5ab   :  { %v4132_v11 = vld [vmem:[#allocation18 + $0x70] sm:$0xf0] }
 0x5ad   :  { %2387 = vmatpush.bf16.msrb.mxu0 %v4091_v24  ;;  %v4260_v24 = vld [vmem:[#allocation18 + $0x170] sm:$0xf0] }
 0x5ae   :  { %v4263_v31 = vor.u32 %v5274_v23, %v4260_v24  ;;  %v5234_v23 = vld [vmem:[#allocation18 + $0x14] sm:$0xf] }
 0x5af   :  { %v4100_v24 = vld [vmem:[#allocation18 + $0x30] sm:$0xf0] }
 0x5f4   :  { %v1503_v34 = vpop.xlane.xlu1 %1502 }
 0x5f5   :  { %v1504_v53 = vmul.f32 %v1503_v34, %v5979_v22  ;;  %v4474_v34 = vld [vmem:[#allocation18 + $0x308] sm:$0xf] }
 0x5f7   :  { %v6055_v39 = vsub.f32 %v6047_v9, %v1504_v53  ;;  %v6058_v40 = vsub.f32 %v6049_v6, %v1504_v53  ;;  %v5333_v53 = vld [vmem:[#allocation18 + $0x324] sm:$0xf0] }
 0x5f8   :  { %v4475_v38 = vor.u32 %v5333_v53, %v4474_v34 }
 0x5f9   :  { %v1507_v41 = vmul.f32 %v6055_v39, %v6055_v39  ;;  %v1508_v0 = vmul.f32 %v6058_v40, %v6058_v40 }
 0x5fa   :  { %2396 = vmatpush.bf16.msrb.mxu1 %v4475_v38 }
 0x5fb   :  { %v1509_v42 = vadd.f32 %v1508_v0, %v1507_v41  ;;  %v4223_v41 = vor.u32 %v5265_v37, %v4220_v54  ;;  %v5329_v0 = vld [vmem:[#allocation18 + $0x30c] sm:$0xf] }
 0x5fd   :  { %1510 = vadd.xlane.f32.xlu0 %v1509_v42  ;;  %v4476_v42 = vld [vmem:[#allocation18 + $0x328] sm:$0xf0]  ;;  %2409 = vmatpush.bf16.msrb.mxu2 %v4223_v41  ;;  %v1499_v41 = vld [vmem:[#allocation15] sm:$0x3] }
 0x5fe   :  { %v4479_v43 = vor.u32 %v5329_v0, %v4476_v42  ;;  %2397 = vmatpush.bf16.msrb.mxu1 %v4443_v50  ;;  %v1500_v42 = vld [vmem:[#allocation17] sm:$0x3]  ;;  %v1527_v1 = vperm.slane %v1499_v41, 0  ;;  %v1528_v44 = vperm.slane %v1499_v41, 1 }
 0x5ff   :  { %v1534_v46 = vperm.slane %v1500_v42, 0 }
 0x600   :  { %2422 = vmatpush.bf16.msrb.mxu3 %v4479_v43 }
 0x601   :  { %2410 = vmatpush.bf16.msrb.mxu2 %v4191_v51  ;;  %v4322_v51 = vld [vmem:[#allocation18 + $0x1d0] sm:$0xf] }
 0x602   :  { %2398 = vmatpush.bf16.msrb.mxu1 %v4411_v62 }
 0x604   :  { %2423 = vmatpush.bf16.msrb.mxu3 %v4447_v4  ;;  %v5358_v4 = vld [vmem:[#allocation18 + $0x3ec] sm:$0xf0] }
 0x605   :  { %2411 = vmatpush.bf16.msrb.mxu2 %v4159_v63  ;;  %v4323_v63 = vor.u32 %v5294_v52, %v4322_v51  ;;  %v4162_v51 = vld [vmem:[#allocation18 + $0x90] sm:$0xf] }
 0x606   :  { %2399 = vmatpush.bf16.msrb.mxu1 %v4379_v15  ;;  %v4547_v15 = vor.u32 %v5350_v8, %v4546_v7  ;;  %v5254_v52 = vld [vmem:[#allocation18 + $0xac] sm:$0xf0] }
 0x607   :  { %v4386_v7 = vld [vmem:[#allocation18 + $0x250] sm:$0xf] }
 0x608   :  { %2424 = vmatpush.bf16.msrb.mxu3 %v4415_v5  ;;  %v4583_v5 = vor.u32 %v5354_v59, %v4580_v60  ;;  %v5314_v59 = vld [vmem:[#allocation18 + $0x294] sm:$0xf]  ;;  %v5310_v8 = vld [vmem:[#allocation18 + $0x26c] sm:$0xf0] }
 0x609   :  { %2412 = vmatpush.bf16.msrb.mxu2 %v4127_v16  ;;  %v4258_v16 = vld [vmem:[#allocation18 + $0x150] sm:$0xf]  ;;  %v4420_v60 = vld [vmem:[#allocation18 + $0x2b0] sm:$0xf0] }
 0x60a   :  { %2400 = vmatpush.bf16.msrb.mxu1 %v4347_v28  ;;  %v4259_v27 = vor.u32 %v5278_v17, %v4258_v16  ;;  %v4515_v28 = vor.u32 %v5342_v21, %v4514_v20  ;;  %v4387_v16 = vor.u32 %v5310_v8, %v4386_v7  ;;  %v5238_v17 = vld [vmem:[#allocation18 + $0x2c] sm:$0xf0]  ;;  %v4135_v20 = vor.u32 %v5242_v10, %v4132_v11  ;;  %v4490_v7 = vld [vmem:[#allocation18 + $0x318] sm:$0xf]  ;;  %v5267_v10 = vld [vmem:[#allocation18 + $0x11c] sm:$0xf] }
 0x60b   :  { %v5335_v8 = vld [vmem:[#allocation18 + $0x334] sm:$0xf0]  ;;  %v4236_v11 = vld [vmem:[#allocation18 + $0x138] sm:$0xf0] }
 0x60c   :  { %2425 = vmatpush.bf16.msrb.mxu3 %v4383_v19  ;;  %v4551_v19 = vor.u32 %v5346_v12, %v4548_v13  ;;  %v5306_v12 = vld [vmem:[#allocation18 + $0x254] sm:$0xf] }
 0x60d   :  { %2413 = vmatpush.bf16.msrb.mxu2 %v4095_v29  ;;  %v4226_v29 = vld [vmem:[#allocation18 + $0x110] sm:$0xf]  ;;  %v4388_v13 = vld [vmem:[#allocation18 + $0x270] sm:$0xf0] }
 0x60e   :  { %v4391_v21 = vor.u32 %v5306_v12, %v4388_v13  ;;  %v5331_v12 = vld [vmem:[#allocation18 + $0x31c] sm:$0xf] }
 0x60f   :  { %v4492_v13 = vld [vmem:[#allocation18 + $0x338] sm:$0xf0] }
 0x610   :  { %2426 = vmatpush.bf16.msrb.mxu3 %v4351_v32  ;;  %v4519_v32 = vor.u32 %v5338_v25, %v4516_v26  ;;  %v5298_v25 = vld [vmem:[#allocation18 + $0x214] sm:$0xf] }
 0x611   :  { %v4356_v26 = vld [vmem:[#allocation18 + $0x230] sm:$0xf0] }
 0x670   :  { %v1511_v33 = vpop.xlane.xlu0 %1510 }
 0x671   :  { %v1512_v34 = vmul.f32 %v1511_v33, %v5979_v22  ;;  %v1535_v22 = vperm.slane %v1500_v42, 1  ;;  %v4482_v33 = vld [vmem:[#allocation18 + $0x310] sm:$0xf] }
 0x672   :  { %v5262_v42 = vld [vmem:[#allocation18 + $0xec] sm:$0xf0] }
 0x673   :  { %v1513_v36 = vadd.f32 1e-05, %v1512_v34  ;;  %v5334_v34 = vld [vmem:[#allocation18 + $0x32c] sm:$0xf0] }
 0x674   :  { %v4483_v41 = vor.u32 %v5334_v34, %v4482_v33  ;;  %v4332_v34 = vld [vmem:[#allocation18 + $0x1f8] sm:$0xf0] }
 0x675   :  { %5528 = vrsqrt.f32 %v1513_v36  ;;  %vm1520_vm10 = vweird.f32 %v1513_v36 }
 0x67b   :  { %v5529_v53 = vpop.eup %5528 }
 0x67c   :  { %v1515_v37 = vmul.f32 %v5529_v53, %v1513_v36  ;;  %vm1521_vm9 = vweird.f32 %v5529_v53  ;;  %v5266_v36 = vld [vmem:[#allocation18 + $0x114] sm:$0xf] }
 0x67d   :  { %vm1522_vm11 = vmor %vm1520_vm10, %vm1521_vm9 }
 0x67e   :  { %v1516_v54 = vmul.f32 %v5529_v53, %v1515_v37  ;;  %v5330_v37 = vld [vmem:[#allocation18 + $0x314] sm:$0xf] }
 0x680   :  { %v1517_v38 = vmul.f32 0.5, %v1516_v54  ;;  %v4484_v54 = vld [vmem:[#allocation18 + $0x330] sm:$0xf0] }
 0x682   :  { %v1518_v0 = vsub.f32 1.5, %v1517_v38  ;;  %v4227_v38 = vor.u32 %v5270_v30, %v4226_v29  ;;  %v4586_v29 = vld [vmem:[#allocation18 + $0x3d8] sm:$0xf] }
 0x683   :  { %v5359_v30 = vld [vmem:[#allocation18 + $0x3f4] sm:$0xf0] }
 0x684   :  { %v1519_v43 = vmul.f32 %v5529_v53, %v1518_v0  ;;  %v4194_v0 = vld [vmem:[#allocation18 + $0xd0] sm:$0xf] }
 0x686   :  { %v1523_v45 = vsel %vm1522_vm11, %v5529_v53, %v1519_v43  ;;  %v4228_v53 = vld [vmem:[#allocation18 + $0x130] sm:$0xf0] }
 0x687   :  { %v1524_v47 = vmul.f32 %v1523_v45, %v6055_v39  ;;  %v1525_v48 = vmul.f32 %v1523_v45, %v6058_v40  ;;  %v4579_v39 = vor.u32 %v5358_v4, %v4578_v55  ;;  %v5286_v40 = vld [vmem:[#allocation18 + $0x1ac] sm:$0xf0]  ;;  %v4231_v43 = vor.u32 %v5266_v36, %v4228_v53  ;;  %v5355_v36 = vld [vmem:[#allocation18 + $0x3dc] sm:$0xf] }
 0x688   :  { %v4291_v14 = vor.u32 %v5286_v40, %v4290_v2  ;;  %v5326_v45 = vld [vmem:[#allocation18 + $0x2ec] sm:$0xf0]  ;;  %v4588_v53 = vld [vmem:[#allocation18 + $0x3f8] sm:$0xf0] }
 0x689   :  { %v1531_v49 = vmul.f32 %v1527_v1, %v1524_v47  ;;  %v1532_v50 = vmul.f32 %v1528_v44, %v1525_v48  ;;  %v4487_v1 = vor.u32 %v5330_v37, %v4484_v54  ;;  %v4450_v44 = vld [vmem:[#allocation18 + $0x2d0] sm:$0xf]  ;;  %v5322_v47 = vld [vmem:[#allocation18 + $0x2d4] sm:$0xf]  ;;  %v4103_v37 = vor.u32 %v5234_v23, %v4100_v24  ;;  %v5259_v23 = vld [vmem:[#allocation18 + $0xdc] sm:$0xf] }
 0x68a   :  { %v4452_v48 = vld [vmem:[#allocation18 + $0x2f0] sm:$0xf0]  ;;  %v4130_v2 = vld [vmem:[#allocation18 + $0x50] sm:$0xf]  ;;  %v4359_v54 = vor.u32 %v5298_v25, %v4356_v26  ;;  %v4204_v24 = vld [vmem:[#allocation18 + $0xf8] sm:$0xf0] }
 0x68b   :  { %v1538_v35 = vadd.f32 %v1534_v46, %v1531_v49  ;;  %v1539_v57 = vadd.f32 %v1535_v22, %v1532_v50  ;;  %v5258_v46 = vld [vmem:[#allocation18 + $0xd4] sm:$0xf]  ;;  %v4195_v49 = vor.u32 %v5262_v42, %v4194_v0  ;;  %v4451_v50 = vor.u32 %v5326_v45, %v4450_v44  ;;  %v5246_v40 = vld [vmem:[#allocation18 + $0x6c] sm:$0xf0]  ;;  %v4298_v0 = vld [vmem:[#allocation18 + $0x198] sm:$0xf] }
 0x68c   :  { %v4196_v22 = vld [vmem:[#allocation18 + $0xf0] sm:$0xf0]  ;;  %v4455_v4 = vor.u32 %v5322_v47, %v4452_v48  ;;  %v5287_v42 = vld [vmem:[#allocation18 + $0x1b4] sm:$0xf0]  ;;  %v5347_v47 = vld [vmem:[#allocation18 + $0x39c] sm:$0xf] }
 0x68d   :  { %v6067_v61 = vpack.c.bf16 %v1538_v35, %v1538_v35  ;;  %v6069_v62 = vpack.c.bf16 %v1539_v57, %v1539_v57  ;;  %v4199_v55 = vor.u32 %v5258_v46, %v4196_v22  ;;  %v5318_v35 = vld [vmem:[#allocation18 + $0x2ac] sm:$0xf0]  ;;  %v5250_v57 = vld [vmem:[#allocation18 + $0x94] sm:$0xf]  ;;  %v4554_v44 = vld [vmem:[#allocation18 + $0x398] sm:$0xf] }
 0x68e   :  { %v5351_v45 = vld [vmem:[#allocation18 + $0x3b4] sm:$0xf0]  ;;  %v5283_v46 = vld [vmem:[#allocation18 + $0x19c] sm:$0xf] }
 0x68f   :  { %2336 = vmatmul.bf16.vlgmr.msra.gmra.mxu0 %v6067_v61  ;;  %2349 = vmatmul.bf16.vlgmr.msra.gmra.mxu1 %v6069_v62  ;;  %v4300_v22 = vld [vmem:[#allocation18 + $0x1b8] sm:$0xf0] }
 0x690   :  { %2362 = vmatmul.bf16.vlgmr.msra.gmra.mxu2 %v6067_v61  ;;  %2375 = vmatmul.bf16.vlgmr.msra.gmra.mxu3 %v6069_v62  ;;  %v4556_v48 = vld [vmem:[#allocation18 + $0x3b8] sm:$0xf0] }
 0x691   :  { %2432 = vmatpush.bf16.msra.mxu0 %v4323_v63  ;;  %2445 = vmatpush.bf16.msra.mxu1 %v4579_v39  ;;  %v4163_v63 = vor.u32 %v5254_v52, %v4162_v51  ;;  %v4419_v39 = vor.u32 %v5318_v35, %v4418_v56  ;;  %v4266_v51 = vld [vmem:[#allocation18 + $0x158] sm:$0xf]  ;;  %v5323_v25 = vld [vmem:[#allocation18 + $0x2dc] sm:$0xf] }
 0x692   :  { %2458 = vmatpush.bf16.msra.mxu2 %v4327_v3  ;;  %2471 = vmatpush.bf16.msra.mxu3 %v4583_v5  ;;  %v4167_v3 = vor.u32 %v5250_v57, %v4164_v58  ;;  %v4423_v5 = vor.u32 %v5314_v59, %v4420_v60  ;;  %v5279_v52 = vld [vmem:[#allocation18 + $0x174] sm:$0xf0]  ;;  %v5275_v57 = vld [vmem:[#allocation18 + $0x15c] sm:$0xf] }
 0x693   :  { %v4522_v56 = vld [vmem:[#allocation18 + $0x358] sm:$0xf]  ;;  %v4268_v58 = vld [vmem:[#allocation18 + $0x178] sm:$0xf0] }
 0x694   :  { %v5343_v35 = vld [vmem:[#allocation18 + $0x374] sm:$0xf0]  ;;  %v5339_v59 = vld [vmem:[#allocation18 + $0x35c] sm:$0xf] }
 0x695   :  { %2433 = vmatpush.bf16.msra.mxu0 %v4291_v14  ;;  %2446 = vmatpush.bf16.msra.mxu1 %v4547_v15  ;;  %v4098_v14 = vld [vmem:[#allocation18 + $0x10] sm:$0xf]  ;;  %v4131_v15 = vor.u32 %v5246_v40, %v4130_v2  ;;  %v4524_v60 = vld [vmem:[#allocation18 + $0x378] sm:$0xf0]  ;;  %v4234_v2 = vld [vmem:[#allocation18 + $0x118] sm:$0xf] }
 0x696   :  { %2459 = vmatpush.bf16.msra.mxu2 %v4295_v18  ;;  %2472 = vmatpush.bf16.msra.mxu3 %v4551_v19  ;;  %v4354_v18 = vld [vmem:[#allocation18 + $0x210] sm:$0xf]  ;;  %v5271_v40 = vld [vmem:[#allocation18 + $0x134] sm:$0xf0]  ;;  %v4460_v26 = vld [vmem:[#allocation18 + $0x2f8] sm:$0xf0] }
 0x697   :  { %v5302_v19 = vld [vmem:[#allocation18 + $0x22c] sm:$0xf0] }
 0x698   :  { %v4355_v33 = vor.u32 %v5302_v19, %v4354_v18  ;;  %v4239_v18 = vor.u32 %v5267_v10, %v4236_v11  ;;  %v4495_v19 = vor.u32 %v5331_v12, %v4492_v13  ;;  %v4642_v11 = vld [vmem:[#allocation20 + $0x60] sm:$0xf]  ;;  %v4778_v13 = vld [vmem:[#allocation20 + $0x170] sm:$0xf] }
 0x699   :  { %2434 = vmatpush.bf16.msra.mxu0 %v4259_v27  ;;  %2447 = vmatpush.bf16.msra.mxu1 %v4515_v28  ;;  %v4330_v27 = vld [vmem:[#allocation18 + $0x1d8] sm:$0xf] }
 0x69a   :  { %2460 = vmatpush.bf16.msra.mxu2 %v4263_v31  ;;  %2473 = vmatpush.bf16.msra.mxu3 %v4519_v32  ;;  %v5295_v28 = vld [vmem:[#allocation18 + $0x1f4] sm:$0xf0]  ;;  %v5291_v31 = vld [vmem:[#allocation18 + $0x1dc] sm:$0xf]  ;;  %v4099_v32 = vor.u32 %v5238_v17, %v4098_v14  ;;  %v4235_v14 = vor.u32 %v5271_v40, %v4234_v2  ;;  %v4714_v2 = vld [vmem:[#allocation20 + $0xf0] sm:$0xf] }
 0x69b   :  { %v5263_v17 = vld [vmem:[#allocation18 + $0xf4] sm:$0xf0] }
 0x69c   :  { %v5391_v40 = vld [vmem:[#allocation20 + $0xf4] sm:$0xf0] }
 0x69d   :  { %2435 = vmatpush.bf16.msra.mxu0 %v4227_v38  ;;  %2448 = vmatpush.bf16.msra.mxu1 %v4483_v41  ;;  %v4331_v38 = vor.u32 %v5295_v28, %v4330_v27  ;;  %v4587_v41 = vor.u32 %v5359_v30, %v4586_v29  ;;  %v4170_v29 = vld [vmem:[#allocation18 + $0x98] sm:$0xf]  ;;  %v4715_v12 = vor.u32 %v5391_v40, %v4714_v2 }
 0x69e   :  { %2461 = vmatpush.bf16.msra.mxu2 %v4231_v43  ;;  %2474 = vmatpush.bf16.msra.mxu3 %v4487_v1  ;;  %v4335_v43 = vor.u32 %v5291_v31, %v4332_v34  ;;  %v4591_v1 = vor.u32 %v5355_v36, %v4588_v53  ;;  %v5255_v30 = vld [vmem:[#allocation18 + $0xb4] sm:$0xf0]  ;;  %v4207_v31 = vor.u32 %v5259_v23, %v4204_v24  ;;  %v5251_v36 = vld [vmem:[#allocation18 + $0x9c] sm:$0xf]  ;;  %v4770_v24 = vld [vmem:[#allocation20 + $0x160] sm:$0xf] }
 0x69f   :  { %2388 = vmatmul.bf16.vlgmr.msrb.gmra.mxu0 %v6067_v61  ;;  %2401 = vmatmul.bf16.vlgmr.msrb.gmra.mxu1 %v6069_v62  ;;  %v5319_v34 = vld [vmem:[#allocation18 + $0x2b4] sm:$0xf0]  ;;  %v4172_v53 = vld [vmem:[#allocation18 + $0xb8] sm:$0xf0] }
 0x6a0   :  { %2414 = vmatmul.bf16.vlgmr.msrb.gmra.mxu2 %v6067_v61  ;;  %2427 = vmatmul.bf16.vlgmr.msrb.gmra.mxu3 %v6069_v62  ;;  %v5363_v40 = vld [vmem:[#allocation20 + $0x14] sm:$0xf0] }
 0x6a1   :  { %2436 = vmatpush.bf16.msra.mxu0 %v4195_v49  ;;  %2449 = vmatpush.bf16.msra.mxu1 %v4451_v50  ;;  %v4299_v49 = vor.u32 %v5287_v42, %v4298_v0  ;;  %v4555_v50 = vor.u32 %v5351_v45, %v4554_v44  ;;  %v4138_v0 = vld [vmem:[#allocation18 + $0x58] sm:$0xf] }
 0x6a2   :  { %2462 = vmatpush.bf16.msra.mxu2 %v4199_v55  ;;  %2475 = vmatpush.bf16.msra.mxu3 %v4455_v4  ;;  %v4303_v55 = vor.u32 %v5283_v46, %v4300_v22  ;;  %v4559_v4 = vor.u32 %v5347_v47, %v4556_v48  ;;  %v5247_v42 = vld [vmem:[#allocation18 + $0x74] sm:$0xf0]  ;;  %v5243_v46 = vld [vmem:[#allocation18 + $0x5c] sm:$0xf] }
 0x6a3   :  { %v4394_v44 = vld [vmem:[#allocation18 + $0x258] sm:$0xf]  ;;  %v4140_v22 = vld [vmem:[#allocation18 + $0x78] sm:$0xf0] }
 0x6a4   :  { %v5311_v45 = vld [vmem:[#allocation18 + $0x274] sm:$0xf0]  ;;  %v5307_v47 = vld [vmem:[#allocation18 + $0x25c] sm:$0xf] }
 0x6a5   :  { %2437 = vmatpush.bf16.msra.mxu0 %v4163_v63  ;;  %2450 = vmatpush.bf16.msra.mxu1 %v4419_v39  ;;  %v4267_v63 = vor.u32 %v5279_v52, %v4266_v51  ;;  %v4523_v39 = vor.u32 %v5343_v35, %v4522_v56  ;;  %v4396_v48 = vld [vmem:[#allocation18 + $0x278] sm:$0xf0]  ;;  %v4106_v51 = vld [vmem:[#allocation18 + $0x18] sm:$0xf] }
 0x6a6   :  { %2463 = vmatpush.bf16.msra.mxu2 %v4167_v3  ;;  %2476 = vmatpush.bf16.msra.mxu3 %v4423_v5  ;;  %v4271_v3 = vor.u32 %v5275_v57, %v4268_v58  ;;  %v4527_v5 = vor.u32 %v5339_v59, %v4524_v60  ;;  %v5239_v52 = vld [vmem:[#allocation18 + $0x34] sm:$0xf0]  ;;  %v4399_v56 = vor.u32 %v5307_v47, %v4396_v48  ;;  %v5235_v57 = vld [vmem:[#allocation18 + $0x1c] sm:$0xf]  ;;  %v4826_v48 = vld [vmem:[#allocation20 + $0x1d0] sm:$0xf] }
 0x6a7   :  { %v5303_v35 = vld [vmem:[#allocation18 + $0x234] sm:$0xf0]  ;;  %v4108_v58 = vld [vmem:[#allocation18 + $0x38] sm:$0xf0] }
 0x6a8   :  { %v5299_v59 = vld [vmem:[#allocation18 + $0x21c] sm:$0xf]  ;;  %v5383_v47 = vld [vmem:[#allocation20 + $0xb4] sm:$0xf0] }
 0x6a9   :  { %2438 = vmatpush.bf16.msra.mxu0 %v4131_v15  ;;  %2451 = vmatpush.bf16.msra.mxu1 %v4387_v16  ;;  %v4491_v15 = vor.u32 %v5335_v8, %v4490_v7  ;;  %v4202_v16 = vld [vmem:[#allocation18 + $0xd8] sm:$0xf]  ;;  %v4364_v60 = vld [vmem:[#allocation18 + $0x238] sm:$0xf0]  ;;  %v4111_v7 = vor.u32 %v5235_v57, %v4108_v58  ;;  %v5365_v57 = vld [vmem:[#allocation20 + $0x24] sm:$0xf0] }
 0x6aa   :  { %2464 = vmatpush.bf16.msra.mxu2 %v4135_v20  ;;  %2477 = vmatpush.bf16.msra.mxu3 %v4391_v21  ;;  %v4458_v20 = vld [vmem:[#allocation18 + $0x2d8] sm:$0xf]  ;;  %v4203_v27 = vor.u32 %v5263_v17, %v4202_v16  ;;  %v4367_v8 = vor.u32 %v5299_v59, %v4364_v60  ;;  %v4706_v16 = vld [vmem:[#allocation20 + $0xe0] sm:$0xf]  ;;  %v5389_v17 = vld [vmem:[#allocation20 + $0xe4] sm:$0xf0] }
 0x6ab   :  { %v5327_v21 = vld [vmem:[#allocation18 + $0x2f4] sm:$0xf0]  ;;  %v4707_v23 = vor.u32 %v5389_v17, %v4706_v16  ;;  %v4674_v58 = vld [vmem:[#allocation20 + $0xa0] sm:$0xf]  ;;  %v5381_v59 = vld [vmem:[#allocation20 + $0xa4] sm:$0xf0] }
 0x6ac   :  { %v4459_v28 = vor.u32 %v5327_v21, %v4458_v20  ;;  %v5371_v21 = vld [vmem:[#allocation20 + $0x54] sm:$0xf0]  ;;  %v4675_v2 = vor.u32 %v5381_v59, %v4674_v58  ;;  %v4970_v16 = vld [vmem:[#allocation20 + $0x2f0] sm:$0xf]  ;;  %v5429_v58 = vld [vmem:[#allocation20 + $0x224] sm:$0xf0] }
 0x6ad   :  { %2439 = vmatpush.bf16.msra.mxu0 %v4099_v32  ;;  %2452 = vmatpush.bf16.msra.mxu1 %v4355_v33  ;;  %v4463_v32 = vor.u32 %v5323_v25, %v4460_v26  ;;  %v4426_v33 = vld [vmem:[#allocation18 + $0x298] sm:$0xf]  ;;  %v5405_v25 = vld [vmem:[#allocation20 + $0x164] sm:$0xf0]  ;;  %v4698_v26 = vld [vmem:[#allocation20 + $0xd0] sm:$0xf] }
 0x6ae   :  { %2465 = vmatpush.bf16.msra.mxu2 %v4103_v37  ;;  %2478 = vmatpush.bf16.msra.mxu3 %v4359_v54  ;;  %v5315_v37 = vld [vmem:[#allocation18 + $0x29c] sm:$0xf]  ;;  %v5455_v17 = vld [vmem:[#allocation20 + $0x2f4] sm:$0xf0] }
 0x6af   :  { %v4428_v54 = vld [vmem:[#allocation18 + $0x2b8] sm:$0xf0] }
 0x6b0   :  { %2440 = vmatmul.bf16.vlgmr.msra.gmra.mxu0 %v6067_v61  ;;  %2453 = vmatmul.bf16.vlgmr.msra.gmra.mxu1 %v6069_v62 }
 0x6b1   :  { %2484 = vmatpush.bf16.msrb.mxu0 %v4331_v38  ;;  %2497 = vmatpush.bf16.msrb.mxu1 %v4587_v41  ;;  %v4171_v38 = vor.u32 %v5255_v30, %v4170_v29  ;;  %v4427_v41 = vor.u32 %v5319_v34, %v4426_v33  ;;  %v5423_v29 = vld [vmem:[#allocation20 + $0x1f4] sm:$0xf0]  ;;  %v4626_v30 = vld [vmem:[#allocation20 + $0x40] sm:$0xf] }
 0x6b2   :  { %2510 = vmatpush.bf16.msrb.mxu2 %v4335_v43  ;;  %2523 = vmatpush.bf16.msrb.mxu3 %v4591_v1  ;;  %v4175_v43 = vor.u32 %v5251_v36, %v4172_v53  ;;  %v4431_v1 = vor.u32 %v5315_v37, %v4428_v54  ;;  %v4690_v53 = vld [vmem:[#allocation20 + $0xc0] sm:$0xf]  ;;  %v4762_v37 = vld [vmem:[#allocation20 + $0x150] sm:$0xf]  ;;  %v5403_v54 = vld [vmem:[#allocation20 + $0x154] sm:$0xf0] }
 0x6b3   :  { %2466 = vmatmul.bf16.vlgmr.msra.gmra.mxu2 %v6067_v61  ;;  %2479 = vmatmul.bf16.vlgmr.msra.gmra.mxu3 %v6069_v62 }
 0x6b5   :  { %2485 = vmatpush.bf16.msrb.mxu0 %v4299_v49  ;;  %2498 = vmatpush.bf16.msrb.mxu1 %v4555_v50  ;;  %v4139_v49 = vor.u32 %v5247_v42, %v4138_v0  ;;  %v4395_v50 = vor.u32 %v5311_v45, %v4394_v44  ;;  %v5421_v0 = vld [vmem:[#allocation20 + $0x1e4] sm:$0xf0]  ;;  %v4618_v42 = vld [vmem:[#allocation20 + $0x30] sm:$0xf] }
 0x6b6   :  { %2511 = vmatpush.bf16.msrb.mxu2 %v4303_v55  ;;  %2524 = vmatpush.bf16.msrb.mxu3 %v4559_v4  ;;  %v4362_v55 = vld [vmem:[#allocation18 + $0x218] sm:$0xf]  ;;  %v4143_v4 = vor.u32 %v5243_v46, %v4140_v22  ;;  %v4682_v45 = vld [vmem:[#allocation20 + $0xb0] sm:$0xf]  ;;  %v4754_v46 = vld [vmem:[#allocation20 + $0x140] sm:$0xf] }
 0x6b7   :  { %v5401_v22 = vld [vmem:[#allocation20 + $0x144] sm:$0xf0] }
 0x6b9   :  { %2486 = vmatpush.bf16.msrb.mxu0 %v4267_v63  ;;  %2499 = vmatpush.bf16.msrb.mxu1 %v4523_v39  ;;  %v4650_v63 = vld [vmem:[#allocation20 + $0x70] sm:$0xf]  ;;  %v5375_v39 = vld [vmem:[#allocation20 + $0x74] sm:$0xf0] }
 0x6ba   :  { %2512 = vmatpush.bf16.msrb.mxu2 %v4271_v3  ;;  %2525 = vmatpush.bf16.msrb.mxu3 %v4527_v5  ;;  %v4107_v3 = vor.u32 %v5239_v52, %v4106_v51  ;;  %v4363_v5 = vor.u32 %v5303_v35, %v4362_v55  ;;  %v4651_v10 = vor.u32 %v5375_v39, %v4650_v63  ;;  %v4610_v55 = vld [vmem:[#allocation20 + $0x20] sm:$0xf]  ;;  %v5399_v35 = vld [vmem:[#allocation20 + $0x134] sm:$0xf0]  ;;  %v4602_v39 = vld [vmem:[#allocation20 + $0x10] sm:$0xf] }
 0x6bb   :  { %v4755_v51 = vor.u32 %v5401_v22, %v4754_v46  ;;  %v4611_v63 = vor.u32 %v5365_v57, %v4610_v55  ;;  %v5415_v46 = vld [vmem:[#allocation20 + $0x1b4] sm:$0xf0]  ;;  %v5413_v57 = vld [vmem:[#allocation20 + $0x1a4] sm:$0xf0] }
 0x6bc   :  { %v5431_v22 = vld [vmem:[#allocation20 + $0x234] sm:$0xf0] }
 0x6bd   :  { %2487 = vmatpush.bf16.msrb.mxu0 %v4235_v14  ;;  %2500 = vmatpush.bf16.msrb.mxu1 %v4491_v15  ;;  %v5407_v14 = vld [vmem:[#allocation20 + $0x174] sm:$0xf0]  ;;  %v5373_v15 = vld [vmem:[#allocation20 + $0x64] sm:$0xf0] }
 0x6be   :  { %2513 = vmatpush.bf16.msrb.mxu2 %v4239_v18  ;;  %2526 = vmatpush.bf16.msrb.mxu3 %v4495_v19  ;;  %v4634_v18 = vld [vmem:[#allocation20 + $0x50] sm:$0xf]  ;;  %v4779_v19 = vor.u32 %v5407_v14, %v4778_v13  ;;  %v4643_v20 = vor.u32 %v5373_v15, %v4642_v11  ;;  %v4658_v13 = vld [vmem:[#allocation20 + $0x80] sm:$0xf]  ;;  %v5377_v14 = vld [vmem:[#allocation20 + $0x84] sm:$0xf0] }
 0x6bf   :  { %v4635_v34 = vor.u32 %v5371_v21, %v4634_v18  ;;  %v5439_v15 = vld [vmem:[#allocation20 + $0x274] sm:$0xf0]  ;;  %v4898_v21 = vld [vmem:[#allocation20 + $0x260] sm:$0xf] }
 0x6c1   :  { %2488 = vmatpush.bf16.msrb.mxu0 %v4203_v27  ;;  %2501 = vmatpush.bf16.msrb.mxu1 %v4459_v28  ;;  %v5387_v27 = vld [vmem:[#allocation20 + $0xd4] sm:$0xf0]  ;;  %v4842_v28 = vld [vmem:[#allocation20 + $0x1f0] sm:$0xf] }
 0x6c2   :  { %2514 = vmatpush.bf16.msrb.mxu2 %v4207_v31  ;;  %2527 = vmatpush.bf16.msrb.mxu3 %v4463_v32  ;;  %v5369_v31 = vld [vmem:[#allocation20 + $0x44] sm:$0xf0]  ;;  %v4771_v32 = vor.u32 %v5405_v25, %v4770_v24  ;;  %v4843_v33 = vor.u32 %v5423_v29, %v4842_v28  ;;  %v4699_v36 = vor.u32 %v5387_v27, %v4698_v26  ;;  %v4962_v25 = vld [vmem:[#allocation20 + $0x2e0] sm:$0xf]  ;;  %v4890_v28 = vld [vmem:[#allocation20 + $0x250] sm:$0xf] }
 0x6c3   :  { %v5437_v24 = vld [vmem:[#allocation20 + $0x264] sm:$0xf0] }
 0x6c4   :  { %v5453_v26 = vld [vmem:[#allocation20 + $0x2e4] sm:$0xf0]  ;;  %v4899_v27 = vor.u32 %v5437_v24, %v4898_v21  ;;  %v4850_v21 = vld [vmem:[#allocation20 + $0x200] sm:$0xf] }
 0x6c5   :  { %2489 = vmatpush.bf16.msrb.mxu0 %v4171_v38  ;;  %2502 = vmatpush.bf16.msrb.mxu1 %v4427_v41  ;;  %v5385_v38 = vld [vmem:[#allocation20 + $0xc4] sm:$0xf0]  ;;  %v4834_v41 = vld [vmem:[#allocation20 + $0x1e0] sm:$0xf]  ;;  %v4963_v29 = vor.u32 %v5453_v26, %v4962_v25 }
 0x6c6   :  { %2515 = vmatpush.bf16.msrb.mxu2 %v4175_v43  ;;  %2528 = vmatpush.bf16.msrb.mxu3 %v4431_v1  ;;  %v4763_v43 = vor.u32 %v5403_v54, %v4762_v37  ;;  %v4627_v1 = vor.u32 %v5369_v31, %v4626_v30  ;;  %v4691_v44 = vor.u32 %v5385_v38, %v4690_v53  ;;  %v5435_v30 = vld [vmem:[#allocation20 + $0x254] sm:$0xf0]  ;;  %v4954_v31 = vld [vmem:[#allocation20 + $0x2d0] sm:$0xf]  ;;  %v4818_v53 = vld [vmem:[#allocation20 + $0x1c0] sm:$0xf] }
 0x6c7   :  { %v5417_v37 = vld [vmem:[#allocation20 + $0x1c4] sm:$0xf0]  ;;  %v4786_v25 = vld [vmem:[#allocation20 + $0x180] sm:$0xf] }
 0x6c8   :  { %v5433_v54 = vld [vmem:[#allocation20 + $0x244] sm:$0xf0]  ;;  %v4819_v38 = vor.u32 %v5417_v37, %v4818_v53 }
 0x6c9   :  { %2490 = vmatpush.bf16.msrb.mxu0 %v4139_v49  ;;  %2503 = vmatpush.bf16.msrb.mxu1 %v4395_v50  ;;  %v5419_v49 = vld [vmem:[#allocation20 + $0x1d4] sm:$0xf0]  ;;  %v5409_v26 = vld [vmem:[#allocation20 + $0x184] sm:$0xf0] }
 0x6ca   :  { %2516 = vmatpush.bf16.msrb.mxu2 %v4143_v4  ;;  %2529 = vmatpush.bf16.msrb.mxu3 %v4399_v56  ;;  %v4827_v50 = vor.u32 %v5419_v49, %v4826_v48  ;;  %v4683_v4 = vor.u32 %v5383_v47, %v4682_v45  ;;  %v4746_v56 = vld [vmem:[#allocation20 + $0x130] sm:$0xf]  ;;  %v5447_v49 = vld [vmem:[#allocation20 + $0x2b4] sm:$0xf0] }
 0x6cb   :  { %v4747_v60 = vor.u32 %v5399_v35, %v4746_v56  ;;  %v4810_v45 = vld [vmem:[#allocation20 + $0x1b0] sm:$0xf]  ;;  %v4802_v35 = vld [vmem:[#allocation20 + $0x1a0] sm:$0xf] }
 0x6cc   :  { %v4811_v47 = vor.u32 %v5415_v46, %v4810_v45  ;;  %v4938_v48 = vld [vmem:[#allocation20 + $0x2b0] sm:$0xf]  ;;  %v4803_v59 = vor.u32 %v5413_v57, %v4802_v35  ;;  %v5461_v35 = vld [vmem:[#allocation20 + $0x324] sm:$0xf0]  ;;  %v5374_v57 = vld [vmem:[#allocation20 + $0x74] sm:$0xf] }
 0x6cd   :  { %2491 = vmatpush.bf16.msrb.mxu0 %v4107_v3  ;;  %2504 = vmatpush.bf16.msrb.mxu1 %v4363_v5  ;;  %v4666_v3 = vld [vmem:[#allocation20 + $0x90] sm:$0xf]  ;;  %v5379_v5 = vld [vmem:[#allocation20 + $0x94] sm:$0xf0]  ;;  %v4939_v56 = vor.u32 %v5447_v49, %v4938_v48  ;;  %v5074_v49 = vld [vmem:[#allocation20 + $0x3c0] sm:$0xf] }
 0x6ce   :  { %2517 = vmatpush.bf16.msrb.mxu2 %v4111_v7  ;;  %2530 = vmatpush.bf16.msrb.mxu3 %v4367_v8  ;;  %v4603_v7 = vor.u32 %v5363_v40, %v4602_v39  ;;  %v4594_v8 = vld [vmem:[#allocation20] sm:$0xf]  ;;  %v4667_v11 = vor.u32 %v5379_v5, %v4666_v3  ;;  %v5034_v3 = vld [vmem:[#allocation20 + $0x370] sm:$0xf] }
 0x6cf   :  { %v4722_v39 = vld [vmem:[#allocation20 + $0x100] sm:$0xf] }
 0x6d0   :  { %2492 = vmatmul.bf16.vlgmr.msrb.gmra.mxu0 %v6067_v61  ;;  %2505 = vmatmul.bf16.vlgmr.msrb.gmra.mxu1 %v6069_v62 }
 0x6d1   :  { %3326 = vmatpush.bf16.msra.mxu0 %v4651_v10  ;;  %3339 = vmatpush.bf16.msra.mxu1 %v4715_v12  ;;  %v5361_v10 = vld [vmem:[#allocation20 + $0x4] sm:$0xf0]  ;;  %v4906_v12 = vld [vmem:[#allocation20 + $0x270] sm:$0xf] }
 0x6d2   :  { %2518 = vmatmul.bf16.vlgmr.msrb.gmra.mxu2 %v6067_v61  ;;  %2531 = vmatmul.bf16.vlgmr.msrb.gmra.mxu3 %v6069_v62  ;;  %v4835_v61 = vor.u32 %v5421_v0, %v4834_v41  ;;  %v5367_v62 = vld [vmem:[#allocation20 + $0x34] sm:$0xf0]  ;;  %v4595_v18 = vor.u32 %v5361_v10, %v4594_v8  ;;  %v4946_v41 = vld [vmem:[#allocation20 + $0x2c0] sm:$0xf]  ;;  %v5449_v0 = vld [vmem:[#allocation20 + $0x2c4] sm:$0xf0] }
 0x6d3   :  { %3352 = vmatpush.bf16.msra.mxu2 %v4779_v19  ;;  %3365 = vmatpush.bf16.msra.mxu3 %v4843_v33  ;;  %v4619_v52 = vor.u32 %v5367_v62, %v4618_v42  ;;  %v4659_v19 = vor.u32 %v5377_v14, %v4658_v13  ;;  %v4891_v33 = vor.u32 %v5435_v30, %v4890_v28  ;;  %v5397_v42 = vld [vmem:[#allocation20 + $0x124] sm:$0xf0]  ;;  %v5471_v8 = vld [vmem:[#allocation20 + $0x374] sm:$0xf0]  ;;  %v4794_v10 = vld [vmem:[#allocation20 + $0x190] sm:$0xf] }
 0x6d4   :  { %v5427_v13 = vld [vmem:[#allocation20 + $0x214] sm:$0xf0]  ;;  %v5035_v14 = vor.u32 %v5471_v8, %v5034_v3  ;;  %v4787_v28 = vor.u32 %v5409_v26, %v4786_v25  ;;  %v5441_v30 = vld [vmem:[#allocation20 + $0x284] sm:$0xf0] }
 0x6d5   :  { %3327 = vmatpush.bf16.msra.mxu0 %v4643_v20  ;;  %3340 = vmatpush.bf16.msra.mxu1 %v4707_v23  ;;  %v4907_v20 = vor.u32 %v5439_v15, %v4906_v12  ;;  %v4971_v23 = vor.u32 %v5455_v17, %v4970_v16  ;;  %v4858_v12 = vld [vmem:[#allocation20 + $0x210] sm:$0xf]  ;;  %v5443_v17 = vld [vmem:[#allocation20 + $0x294] sm:$0xf0] }
 0x6d6   :  { %v4922_v16 = vld [vmem:[#allocation20 + $0x290] sm:$0xf] }
 0x6d7   :  { %3353 = vmatpush.bf16.msra.mxu2 %v4771_v32  ;;  %3366 = vmatpush.bf16.msra.mxu3 %v4835_v61  ;;  %v5451_v32 = vld [vmem:[#allocation20 + $0x2d4] sm:$0xf0]  ;;  %v4738_v61 = vld [vmem:[#allocation20 + $0x120] sm:$0xf] }
 0x6d8   :  { %v4739_v62 = vor.u32 %v5397_v42, %v4738_v61  ;;  %v5010_v61 = vld [vmem:[#allocation20 + $0x340] sm:$0xf]  ;;  %v5465_v42 = vld [vmem:[#allocation20 + $0x344] sm:$0xf0] }
 0x6d9   :  { %3328 = vmatpush.bf16.msra.mxu0 %v4635_v34  ;;  %3341 = vmatpush.bf16.msra.mxu1 %v4699_v36  ;;  %v4882_v34 = vld [vmem:[#allocation20 + $0x240] sm:$0xf]  ;;  %v4955_v36 = vor.u32 %v5451_v32, %v4954_v31  ;;  %v5098_v31 = vld [vmem:[#allocation20 + $0x3f0] sm:$0xf]  ;;  %v5487_v32 = vld [vmem:[#allocation20 + $0x3f4] sm:$0xf0] }
 0x6db   :  { %3354 = vmatpush.bf16.msra.mxu2 %v4763_v43  ;;  %3367 = vmatpush.bf16.msra.mxu3 %v4827_v50  ;;  %v4883_v43 = vor.u32 %v5433_v54, %v4882_v34  ;;  %v4730_v50 = vld [vmem:[#allocation20 + $0x110] sm:$0xf] }
 0x6dc   :  { %v5018_v34 = vld [vmem:[#allocation20 + $0x350] sm:$0xf] }
 0x6dd   :  { %3329 = vmatpush.bf16.msra.mxu0 %v4627_v1  ;;  %3342 = vmatpush.bf16.msra.mxu1 %v4691_v44  ;;  %v4874_v1 = vld [vmem:[#allocation20 + $0x230] sm:$0xf]  ;;  %v4947_v44 = vor.u32 %v5449_v0, %v4946_v41  ;;  %v5485_v41 = vld [vmem:[#allocation20 + $0x3e4] sm:$0xf0] }
 0x6de   :  { %v4875_v55 = vor.u32 %v5431_v22, %v4874_v1  ;;  %v5082_v1 = vld [vmem:[#allocation20 + $0x3d0] sm:$0xf] }
 0x6df   :  { %3355 = vmatpush.bf16.msra.mxu2 %v4755_v51  ;;  %3368 = vmatpush.bf16.msra.mxu3 %v4819_v38  ;;  %v5395_v51 = vld [vmem:[#allocation20 + $0x114] sm:$0xf0]  ;;  %v5090_v38 = vld [vmem:[#allocation20 + $0x3e0] sm:$0xf]  ;;  %v5002_v22 = vld [vmem:[#allocation20 + $0x330] sm:$0xf] }
 0x6e0   :  { %v5091_v0 = vor.u32 %v5485_v41, %v5090_v38  ;;  %v5388_v41 = vld [vmem:[#allocation20 + $0xe4] sm:$0xf] }
 0x6e1   :  { %3330 = vmatpush.bf16.msra.mxu0 %v4619_v52  ;;  %3343 = vmatpush.bf16.msra.mxu1 %v4683_v4  ;;  %v4731_v52 = vor.u32 %v5395_v51, %v4730_v50  ;;  %v4866_v4 = vld [vmem:[#allocation20 + $0x220] sm:$0xf]  ;;  %v5481_v50 = vld [vmem:[#allocation20 + $0x3c4] sm:$0xf0] }
 0x6e2   :  { %v4867_v5 = vor.u32 %v5429_v58, %v4866_v4 }
 0x6e3   :  { %3356 = vmatpush.bf16.msra.mxu2 %v4747_v60  ;;  %3369 = vmatpush.bf16.msra.mxu3 %v4811_v47  ;;  %v4930_v60 = vld [vmem:[#allocation20 + $0x2a0] sm:$0xf]  ;;  %v5463_v47 = vld [vmem:[#allocation20 + $0x334] sm:$0xf0] }
 0x6e4   :  { %v5003_v48 = vor.u32 %v5463_v47, %v5002_v22 }
 0x6e5   :  { %3331 = vmatpush.bf16.msra.mxu0 %v4611_v63  ;;  %3344 = vmatpush.bf16.msra.mxu1 %v4675_v2  ;;  %v5445_v63 = vld [vmem:[#allocation20 + $0x2a4] sm:$0xf0] }
 0x6e6   :  { %v5393_v2 = vld [vmem:[#allocation20 + $0x104] sm:$0xf0] }
 0x6e7   :  { %3357 = vmatpush.bf16.msra.mxu2 %v4739_v62  ;;  %3370 = vmatpush.bf16.msra.mxu3 %v4803_v59  ;;  %v4723_v40 = vor.u32 %v5393_v2, %v4722_v39  ;;  %v6090_v62 = vld [vmem:[%s6146_s10] sm:$0xff] }
 0x6e8   :  { %v1672_v46 = vperm.slane %v6090_v62, 0  ;;  %v5479_v39 = vld [vmem:[#allocation20 + $0x3b4] sm:$0xf0]  ;;  %v1673_v2 = vperm.slane %v6090_v62, 1 }
 0x6e9   :  { %3332 = vmatpush.bf16.msra.mxu0 %v4603_v7  ;;  %3345 = vmatpush.bf16.msra.mxu1 %v4667_v11  ;;  %v4931_v7 = vor.u32 %v5445_v63, %v4930_v60  ;;  %v5411_v11 = vld [vmem:[#allocation20 + $0x194] sm:$0xf0]  ;;  %v4652_v60 = vld [vmem:[#allocation20 + $0x78] sm:$0xf0]  ;;  %v5066_v63 = vld [vmem:[#allocation20 + $0x3b0] sm:$0xf] }
 0x6ea   :  { %v4795_v15 = vor.u32 %v5411_v11, %v4794_v10  ;;  %v4655_v8 = vor.u32 %v5374_v57, %v4652_v60  ;;  %v5372_v10 = vld [vmem:[#allocation20 + $0x64] sm:$0xf]  ;;  %v4780_v57 = vld [vmem:[#allocation20 + $0x178] sm:$0xf0] }
 0x6eb   :  { %3358 = vmatpush.bf16.msra.mxu2 %v4731_v52 }
 0x6ec   :  { %3371 = vmatpush.bf16.msra.mxu3 %v4795_v15  ;;  %v4644_v15 = vld [vmem:[#allocation20 + $0x68] sm:$0xf0] }
 0x6ed   :  { %3333 = vmatpush.bf16.msra.mxu0 %v4595_v18  ;;  %3346 = vmatpush.bf16.msra.mxu1 %v4659_v19  ;;  %v5026_v18 = vld [vmem:[#allocation20 + $0x360] sm:$0xf]  ;;  %v5469_v19 = vld [vmem:[#allocation20 + $0x364] sm:$0xf0]  ;;  %v4647_v26 = vor.u32 %v5372_v10, %v4644_v15  ;;  %v4612_v10 = vld [vmem:[#allocation20 + $0x28] sm:$0xf0] }
 0x6ee   :  { %v5027_v24 = vor.u32 %v5469_v19, %v5026_v18 }
 0x6ef   :  { %3359 = vmatpush.bf16.msra.mxu2 %v4723_v40  ;;  %v5067_v40 = vor.u32 %v5479_v39, %v5066_v63  ;;  %v5384_v39 = vld [vmem:[#allocation20 + $0xc4] sm:$0xf] }
 0x6f0   :  { %3372 = vmatpush.bf16.msra.mxu3 %v4787_v28  ;;  %v4716_v28 = vld [vmem:[#allocation20 + $0xf8] sm:$0xf0] }
 0x6f1   :  { %3378 = vmatpush.bf16.msrb.mxu0 %v4907_v20  ;;  %3391 = vmatpush.bf16.msrb.mxu1 %v4971_v23  ;;  %v4859_v20 = vor.u32 %v5427_v13, %v4858_v12  ;;  %v4923_v23 = vor.u32 %v5443_v17, %v4922_v16  ;;  %v5058_v16 = vld [vmem:[#allocation20 + $0x3a0] sm:$0xf]  ;;  %v5477_v17 = vld [vmem:[#allocation20 + $0x3a4] sm:$0xf0] }
 0x6f3   :  { %3404 = vmatpush.bf16.msrb.mxu2 %v5035_v14 }
 0x6f5   :  { %3379 = vmatpush.bf16.msrb.mxu0 %v4899_v27  ;;  %3392 = vmatpush.bf16.msrb.mxu1 %v4963_v29  ;;  %v5425_v27 = vld [vmem:[#allocation20 + $0x204] sm:$0xf0]  ;;  %v4914_v29 = vld [vmem:[#allocation20 + $0x280] sm:$0xf] }
 0x6f6   :  { %v4851_v53 = vor.u32 %v5425_v27, %v4850_v21  ;;  %v4915_v37 = vor.u32 %v5441_v30, %v4914_v29  ;;  %v5059_v21 = vor.u32 %v5477_v17, %v5058_v16  ;;  %v5390_v27 = vld [vmem:[#allocation20 + $0xf4] sm:$0xf] }
 0x6f7   :  { %3405 = vmatpush.bf16.msrb.mxu2 %v5027_v24  ;;  %v5457_v24 = vld [vmem:[#allocation20 + $0x304] sm:$0xf0]  ;;  %v5370_v29 = vld [vmem:[#allocation20 + $0x54] sm:$0xf] }
 0x6f9   :  { %3380 = vmatpush.bf16.msrb.mxu0 %v4891_v33  ;;  %3393 = vmatpush.bf16.msrb.mxu1 %v4955_v36  ;;  %v5099_v33 = vor.u32 %v5487_v32, %v5098_v31  ;;  %v5467_v36 = vld [vmem:[#allocation20 + $0x354] sm:$0xf0]  ;;  %v4636_v31 = vld [vmem:[#allocation20 + $0x58] sm:$0xf0]  ;;  %v5050_v32 = vld [vmem:[#allocation20 + $0x390] sm:$0xf] }
 0x6fa   :  { %v5019_v54 = vor.u32 %v5467_v36, %v5018_v34  ;;  %v4639_v38 = vor.u32 %v5370_v29, %v4636_v31  ;;  %v4764_v29 = vld [vmem:[#allocation20 + $0x158] sm:$0xf0]  ;;  %v1676_v31 = vperm.slane %v6090_v62, 4 }
 0x6fb   :  { %3417 = vmatpush.bf16.msrb.mxu3 %v5099_v33  ;;  %v5475_v33 = vld [vmem:[#allocation20 + $0x394] sm:$0xf0] }
 0x6fc   :  { %3406 = vmatpush.bf16.msrb.mxu2 %v5019_v54  ;;  %v5051_v36 = vor.u32 %v5475_v33, %v5050_v32  ;;  %v5380_v33 = vld [vmem:[#allocation20 + $0xa4] sm:$0xf] }
 0x6fd   :  { %3381 = vmatpush.bf16.msrb.mxu0 %v4883_v43  ;;  %3394 = vmatpush.bf16.msrb.mxu1 %v4947_v44  ;;  %v5011_v43 = vor.u32 %v5465_v42, %v5010_v61  ;;  %v5483_v44 = vld [vmem:[#allocation20 + $0x3d4] sm:$0xf0]  ;;  %v5368_v61 = vld [vmem:[#allocation20 + $0x44] sm:$0xf] }
 0x6fe   :  { %v5083_v45 = vor.u32 %v5483_v44, %v5082_v1  ;;  %v4628_v1 = vld [vmem:[#allocation20 + $0x48] sm:$0xf0]  ;;  %v5042_v44 = vld [vmem:[#allocation20 + $0x380] sm:$0xf] }
 0x6ff   :  { %3418 = vmatpush.bf16.msrb.mxu3 %v5091_v0  ;;  %v4708_v0 = vld [vmem:[#allocation20 + $0xe8] sm:$0xf0] }
 0x700   :  { %3407 = vmatpush.bf16.msrb.mxu2 %v5011_v43 }
 0x701   :  { %3382 = vmatpush.bf16.msrb.mxu0 %v4875_v55  ;;  %3395 = vmatpush.bf16.msrb.mxu1 %v4939_v56  ;;  %v5075_v55 = vor.u32 %v5481_v50, %v5074_v49  ;;  %v4994_v56 = vld [vmem:[#allocation20 + $0x320] sm:$0xf]  ;;  %v4711_v49 = vor.u32 %v5388_v41, %v4708_v0  ;;  %v4631_v50 = vor.u32 %v5368_v61, %v4628_v1  ;;  %v5420_v0 = vld [vmem:[#allocation20 + $0x1e4] sm:$0xf]  ;;  %v4836_v61 = vld [vmem:[#allocation20 + $0x1e8] sm:$0xf0] }
 0x702   :  { %v4995_v58 = vor.u32 %v5461_v35, %v4994_v56  ;;  %v4620_v56 = vld [vmem:[#allocation20 + $0x38] sm:$0xf0]  ;;  %v5406_v35 = vld [vmem:[#allocation20 + $0x174] sm:$0xf]  ;;  %v4596_v1 = vld [vmem:[#allocation20 + $0x8] sm:$0xf0] }
 0x703   :  { %3419 = vmatpush.bf16.msrb.mxu3 %v5083_v45  ;;  %v5473_v45 = vld [vmem:[#allocation20 + $0x384] sm:$0xf0] }
 0x704   :  { %3408 = vmatpush.bf16.msrb.mxu2 %v5003_v48  ;;  %v5043_v47 = vor.u32 %v5473_v45, %v5042_v44  ;;  %v5400_v44 = vld [vmem:[#allocation20 + $0x144] sm:$0xf]  ;;  %v4756_v45 = vld [vmem:[#allocation20 + $0x148] sm:$0xf0] }
 0x705   :  { %3383 = vmatpush.bf16.msrb.mxu0 %v4867_v5  ;;  %3396 = vmatpush.bf16.msrb.mxu1 %v4931_v7  ;;  %v4986_v5 = vld [vmem:[#allocation20 + $0x310] sm:$0xf]  ;;  %v5459_v7 = vld [vmem:[#allocation20 + $0x314] sm:$0xf0] }
 0x706   :  { %v4987_v11 = vor.u32 %v5459_v7, %v4986_v5 }
 0x707   :  { %3420 = vmatpush.bf16.msrb.mxu3 %v5075_v55  ;;  %v5366_v55 = vld [vmem:[#allocation20 + $0x34] sm:$0xf] }
 0x708   :  { %3409 = vmatpush.bf16.msrb.mxu2 %v4995_v58  ;;  %v1675_v58 = vperm.slane %v6090_v62, 3  ;;  %v4623_v63 = vor.u32 %v5366_v55, %v4620_v56  ;;  %v5418_v55 = vld [vmem:[#allocation20 + $0x1d4] sm:$0xf] }
 0x709   :  { %3384 = vmatpush.bf16.msrb.mxu0 %v4859_v20  ;;  %3397 = vmatpush.bf16.msrb.mxu1 %v4923_v23  ;;  %v4978_v23 = vld [vmem:[#allocation20 + $0x300] sm:$0xf] }
 0x70a   :  { %v4979_v30 = vor.u32 %v5457_v24, %v4978_v23  ;;  %v5362_v23 = vld [vmem:[#allocation20 + $0x14] sm:$0xf] }
 0x70b   :  { %3421 = vmatpush.bf16.msrb.mxu3 %v5067_v40  ;;  %v5364_v40 = vld [vmem:[#allocation20 + $0x24] sm:$0xf] }
 0x70c   :  { %v2337_v51 = vpop.f32.mrf.mxu0  ;;  %v2350_v52 = vpop.f32.mrf.mxu1  ;;  %3410 = vmatpush.bf16.msrb.mxu2 %v4987_v11  ;;  %v5404_v11 = vld [vmem:[#allocation20 + $0x164] sm:$0xf] }
 0x70d   :  { %3385 = vmatpush.bf16.msrb.mxu0 %v4851_v53  ;;  %3398 = vmatpush.bf16.msrb.mxu1 %v4915_v37  ;;  %v2338_v4 = vadd.f32 %v2337_v51, %v1672_v46  ;;  %v1674_v53 = vperm.slane %v6090_v62, 2  ;;  %v4719_v37 = vor.u32 %v5390_v27, %v4716_v28  ;;  %v5386_v51 = vld [vmem:[#allocation20 + $0xd4] sm:$0xf]  ;;  %v4604_v27 = vld [vmem:[#allocation20 + $0x18] sm:$0xf0] }
 0x70e   :  { %v5402_v28 = vld [vmem:[#allocation20 + $0x154] sm:$0xf] }
 0x70f   :  { %v2351_v59 = vadd.f32 %v2350_v52, %v2338_v4  ;;  %3422 = vmatpush.bf16.msrb.mxu3 %v5059_v21  ;;  %v4700_v52 = vld [vmem:[#allocation20 + $0xd8] sm:$0xf0]  ;;  %v4615_v21 = vor.u32 %v5364_v40, %v4612_v10  ;;  %v4767_v41 = vor.u32 %v5402_v28, %v4764_v29  ;;  %v4820_v10 = vld [vmem:[#allocation20 + $0x1c8] sm:$0xf0]  ;;  %v5414_v28 = vld [vmem:[#allocation20 + $0x1b4] sm:$0xf] }
 0x710   :  { %3411 = vmatpush.bf16.msrb.mxu2 %v4979_v30  ;;  %v4703_v60 = vor.u32 %v5386_v51, %v4700_v52  ;;  %v4668_v51 = vld [vmem:[#allocation20 + $0x98] sm:$0xf0]  ;;  %v4759_v52 = vor.u32 %v5400_v44, %v4756_v45  ;;  %v5392_v44 = vld [vmem:[#allocation20 + $0x104] sm:$0xf]  ;;  %v4724_v45 = vld [vmem:[#allocation20 + $0x108] sm:$0xf0] }
 0x711   :  { %v2536_v3 = vmax.f32 %v2351_v59, 0.0  ;;  %v4812_v29 = vld [vmem:[#allocation20 + $0x1b8] sm:$0xf0] }
 0x713   :  { %v6094_v12 = vpack.c.bf16 %v2536_v3, %v2536_v3  ;;  %v2363_v13 = vpop.f32.mrf.mxu2  ;;  %v2376_v14 = vpop.f32.mrf.mxu3  ;;  %3423 = vmatpush.bf16.msrb.mxu3 %v5051_v36  ;;  %v4783_v3 = vor.u32 %v5406_v35, %v4780_v57  ;;  %v5398_v35 = vld [vmem:[#allocation20 + $0x134] sm:$0xf]  ;;  %v4748_v57 = vld [vmem:[#allocation20 + $0x138] sm:$0xf0] }
 0x714   :  { %v2364_v18 = vadd.f32 %v2363_v13, %v1673_v2  ;;  %v2339_v19 = vpop.f32.mrf.mxu0  ;;  %v2352_v20 = vpop.f32.mrf.mxu1  ;;  %v4692_v2 = vld [vmem:[#allocation20 + $0xc8] sm:$0xf0] }
 0x715   :  { %3334 = vmatmul.bf16.vlgmr.msra.gmra.mxu0 %v6094_v12  ;;  %v4772_v13 = vld [vmem:[#allocation20 + $0x168] sm:$0xf0]  ;;  %v4695_v17 = vor.u32 %v5384_v39, %v4692_v2  ;;  %v4684_v19 = vld [vmem:[#allocation20 + $0xb8] sm:$0xf0]  ;;  %v5376_v2 = vld [vmem:[#allocation20 + $0x84] sm:$0xf] }
 0x716   :  { %v2377_v25 = vadd.f32 %v2376_v14, %v2364_v18  ;;  %3430 = vmatpush.bf16.msra.mxu0 %v4655_v8  ;;  %v5382_v18 = vld [vmem:[#allocation20 + $0xb4] sm:$0xf]  ;;  %v4775_v24 = vor.u32 %v5404_v11, %v4772_v13  ;;  %v5396_v13 = vld [vmem:[#allocation20 + $0x124] sm:$0xf] }
 0x717   :  { %3424 = vmatpush.bf16.msrb.mxu3 %v5043_v47  ;;  %v4687_v32 = vor.u32 %v5382_v18, %v4684_v19  ;;  %v4839_v47 = vor.u32 %v5420_v0, %v4836_v61  ;;  %v5436_v19 = vld [vmem:[#allocation20 + $0x264] sm:$0xf] }
 0x718   :  { %v2537_v34 = vmax.f32 %v2377_v25, 0.0  ;;  %v5422_v25 = vld [vmem:[#allocation20 + $0x1f4] sm:$0xf] }
 0x71a   :  { %v6098_v54 = vpack.c.bf16 %v2537_v34, %v2537_v34  ;;  %3431 = vmatpush.bf16.msra.mxu0 %v4647_v26  ;;  %v4844_v26 = vld [vmem:[#allocation20 + $0x1f8] sm:$0xf0]  ;;  %v4676_v34 = vld [vmem:[#allocation20 + $0xa8] sm:$0xf0] }
 0x71b   :  { %v2365_v42 = vpop.f32.mrf.mxu2  ;;  %v2378_v43 = vpop.f32.mrf.mxu3  ;;  %v4847_v36 = vor.u32 %v5422_v25, %v4844_v26 }
 0x71c   :  { %3347 = vmatmul.bf16.vlgmr.msra.gmra.mxu1 %v6098_v54  ;;  %v2389_v46 = vpop.f32.mrf.mxu0  ;;  %v2402_v22 = vpop.f32.mrf.mxu1 }
 0x71d   :  { %v2390_v48 = vadd.f32 %v2389_v46, %v1674_v53  ;;  %3443 = vmatpush.bf16.msra.mxu1 %v4719_v37  ;;  %v4607_v37 = vor.u32 %v5362_v23, %v4604_v27  ;;  %v4679_v46 = vor.u32 %v5380_v33, %v4676_v34  ;;  %v5454_v34 = vld [vmem:[#allocation20 + $0x2f4] sm:$0xf] }
 0x71e   :  { %3432 = vmatpush.bf16.msra.mxu0 %v4639_v38  ;;  %v5360_v38 = vld [vmem:[#allocation20 + $0x4] sm:$0xf] }
 0x71f   :  { %v2403_v4 = vadd.f32 %v2402_v22, %v2390_v48  ;;  %v5378_v22 = vld [vmem:[#allocation20 + $0x94] sm:$0xf] }
 0x720   :  { %v4671_v39 = vor.u32 %v5378_v22, %v4668_v51  ;;  %v5432_v51 = vld [vmem:[#allocation20 + $0x244] sm:$0xf] }
 0x721   :  { %v2538_v59 = vmax.f32 %v2403_v4, 0.0  ;;  %3444 = vmatpush.bf16.msra.mxu1 %v4711_v49  ;;  %v4828_v4 = vld [vmem:[#allocation20 + $0x1d8] sm:$0xf0] }
 0x722   :  { %3433 = vmatpush.bf16.msra.mxu0 %v4631_v50  ;;  %v4599_v50 = vor.u32 %v5360_v38, %v4596_v1  ;;  %v4831_v40 = vor.u32 %v5418_v55, %v4828_v4  ;;  %v4892_v38 = vld [vmem:[#allocation20 + $0x258] sm:$0xf0]  ;;  %v4727_v4 = vor.u32 %v5392_v44, %v4724_v45 }
 0x723   :  { %v6102_v5 = vpack.c.bf16 %v2538_v59, %v2538_v59  ;;  %v2415_v7 = vpop.f32.mrf.mxu2  ;;  %v2428_v8 = vpop.f32.mrf.mxu3 }
 0x724   :  { %v2416_v14 = vadd.f32 %v2415_v7, %v1675_v58  ;;  %v2391_v15 = vpop.f32.mrf.mxu0  ;;  %v2404_v16 = vpop.f32.mrf.mxu1  ;;  %v1677_v58 = vperm.slane %v6090_v62, 5  ;;  %v4751_v7 = vor.u32 %v5398_v35, %v4748_v57  ;;  %v4796_v35 = vld [vmem:[#allocation20 + $0x198] sm:$0xf0] }
 0x725   :  { %3360 = vmatmul.bf16.vlgmr.msra.gmra.mxu2 %v6102_v5  ;;  %3445 = vmatpush.bf16.msra.mxu1 %v4703_v60  ;;  %v5438_v60 = vld [vmem:[#allocation20 + $0x274] sm:$0xf] }
 0x726   :  { %v2429_v20 = vadd.f32 %v2428_v8, %v2416_v14  ;;  %3434 = vmatpush.bf16.msra.mxu0 %v4623_v63  ;;  %3456 = vmatpush.bf16.msra.mxu2 %v4783_v3  ;;  %v4908_v63 = vld [vmem:[#allocation20 + $0x278] sm:$0xf0]  ;;  %v4660_v3 = vld [vmem:[#allocation20 + $0x88] sm:$0xf0]  ;;  %v5416_v8 = vld [vmem:[#allocation20 + $0x1c4] sm:$0xf] }
 0x727   :  { %v4740_v14 = vld [vmem:[#allocation20 + $0x128] sm:$0xf0]  ;;  %v4911_v15 = vor.u32 %v5438_v60, %v4908_v63  ;;  %v4823_v23 = vor.u32 %v5416_v8, %v4820_v10  ;;  %v4956_v60 = vld [vmem:[#allocation20 + $0x2d8] sm:$0xf0]  ;;  %v5430_v63 = vld [vmem:[#allocation20 + $0x234] sm:$0xf] }
 0x728   :  { %v2539_v30 = vmax.f32 %v2429_v20, 0.0  ;;  %v4900_v20 = vld [vmem:[#allocation20 + $0x268] sm:$0xf0]  ;;  %v4743_v27 = vor.u32 %v5396_v13, %v4740_v14  ;;  %v5448_v10 = vld [vmem:[#allocation20 + $0x2c4] sm:$0xf] }
 0x729   :  { %3446 = vmatpush.bf16.msra.mxu1 %v4695_v17  ;;  %v4903_v33 = vor.u32 %v5436_v19, %v4900_v20  ;;  %v5428_v13 = vld [vmem:[#allocation20 + $0x224] sm:$0xf]  ;;  %v4868_v14 = vld [vmem:[#allocation20 + $0x228] sm:$0xf0]  ;;  %v5446_v20 = vld [vmem:[#allocation20 + $0x2b4] sm:$0xf] }
 0x72a   :  { %v6106_v53 = vpack.c.bf16 %v2539_v30, %v2539_v30  ;;  %3435 = vmatpush.bf16.msra.mxu0 %v4615_v21  ;;  %3457 = vmatpush.bf16.msra.mxu2 %v4775_v24  ;;  %v4663_v21 = vor.u32 %v5376_v2, %v4660_v3  ;;  %v5394_v30 = vld [vmem:[#allocation20 + $0x114] sm:$0xf]  ;;  %v4788_v3 = vld [vmem:[#allocation20 + $0x188] sm:$0xf0]  ;;  %v4871_v19 = vor.u32 %v5428_v13, %v4868_v14 }
 0x72b   :  { %v2417_v42 = vpop.f32.mrf.mxu2  ;;  %v2430_v43 = vpop.f32.mrf.mxu3  ;;  %v5482_v14 = vld [vmem:[#allocation20 + $0x3d4] sm:$0xf] }
 0x72c   :  { %3373 = vmatmul.bf16.vlgmr.msra.gmra.mxu3 %v6106_v53  ;;  %v5412_v42 = vld [vmem:[#allocation20 + $0x1a4] sm:$0xf]  ;;  %v4804_v43 = vld [vmem:[#allocation20 + $0x1a8] sm:$0xf0] }
 0x72d   :  { %3447 = vmatpush.bf16.msra.mxu1 %v4687_v32  ;;  %3469 = vmatpush.bf16.msra.mxu3 %v4847_v36  ;;  %v2441_v48 = vpop.f32.mrf.mxu0  ;;  %v2454_v49 = vpop.f32.mrf.mxu1  ;;  %v4972_v36 = vld [vmem:[#allocation20 + $0x2f8] sm:$0xf0]  ;;  %v4807_v55 = vor.u32 %v5412_v42, %v4804_v43 }
 0x72e   :  { %3436 = vmatpush.bf16.msra.mxu0 %v4607_v37  ;;  %3458 = vmatpush.bf16.msra.mxu2 %v4767_v41  ;;  %v2442_v56 = vadd.f32 %v2441_v48, %v1676_v31  ;;  %v4732_v31 = vld [vmem:[#allocation20 + $0x118] sm:$0xf0]  ;;  %v5434_v37 = vld [vmem:[#allocation20 + $0x254] sm:$0xf]  ;;  %v4815_v41 = vor.u32 %v5414_v28, %v4812_v29  ;;  %v4975_v1 = vor.u32 %v5454_v34, %v4972_v36  ;;  %v4964_v48 = vld [vmem:[#allocation20 + $0x2e8] sm:$0xf0] }
 0x72f   :  { %v4735_v61 = vor.u32 %v5394_v30, %v4732_v31  ;;  %v4895_v22 = vor.u32 %v5434_v37, %v4892_v38  ;;  %v5444_v30 = vld [vmem:[#allocation20 + $0x2a4] sm:$0xf]  ;;  %v4932_v31 = vld [vmem:[#allocation20 + $0x2a8] sm:$0xf0]  ;;  %v5470_v34 = vld [vmem:[#allocation20 + $0x374] sm:$0xf] }
 0x730   :  { %v2455_v59 = vadd.f32 %v2454_v49, %v2442_v56  ;;  %v5410_v56 = vld [vmem:[#allocation20 + $0x194] sm:$0xf]  ;;  %v5036_v36 = vld [vmem:[#allocation20 + $0x378] sm:$0xf0]  ;;  %v1679_v37 = vperm.slane %v6090_v62, 7  ;;  %v4935_v38 = vor.u32 %v5444_v30, %v4932_v31 }
 0x731   :  { %3448 = vmatpush.bf16.msra.mxu1 %v4679_v46  ;;  %3470 = vmatpush.bf16.msra.mxu3 %v4839_v47  ;;  %v5452_v47 = vld [vmem:[#allocation20 + $0x2e4] sm:$0xf]  ;;  %v4799_v2 = vor.u32 %v5410_v56, %v4796_v35  ;;  %v4924_v42 = vld [vmem:[#allocation20 + $0x298] sm:$0xf0]  ;;  %v5039_v43 = vor.u32 %v5470_v34, %v5036_v36  ;;  %v5466_v35 = vld [vmem:[#allocation20 + $0x354] sm:$0xf] }
 0x732   :  { %3437 = vmatpush.bf16.msra.mxu0 %v4599_v50  ;;  %3459 = vmatpush.bf16.msra.mxu2 %v4759_v52  ;;  %v2540_v11 = vmax.f32 %v2455_v59, 0.0  ;;  %v4884_v52 = vld [vmem:[#allocation20 + $0x248] sm:$0xf0]  ;;  %v4967_v57 = vor.u32 %v5452_v47, %v4964_v48  ;;  %v5450_v59 = vld [vmem:[#allocation20 + $0x2d4] sm:$0xf] }
 0x733   :  { %v5028_v47 = vld [vmem:[#allocation20 + $0x368] sm:$0xf0]  ;;  %v5100_v56 = vld [vmem:[#allocation20 + $0x3f8] sm:$0xf0] }
 0x734   :  { %v6110_v16 = vpack.c.bf16 %v2540_v11, %v2540_v11  ;;  %v4948_v11 = vld [vmem:[#allocation20 + $0x2c8] sm:$0xf0] }
 0x735   :  { %3449 = vmatpush.bf16.msra.mxu1 %v4671_v39  ;;  %3471 = vmatpush.bf16.msra.mxu3 %v4831_v40  ;;  %v2443_v25 = vpop.f32.mrf.mxu0  ;;  %v2456_v26 = vpop.f32.mrf.mxu1  ;;  %v4876_v39 = vld [vmem:[#allocation20 + $0x238] sm:$0xf0]  ;;  %v5408_v40 = vld [vmem:[#allocation20 + $0x184] sm:$0xf]  ;;  %v4980_v34 = vld [vmem:[#allocation20 + $0x308] sm:$0xf0] }
 0x736   :  { %v2467_v17 = vpop.f32.mrf.mxu2  ;;  %v2480_v18 = vpop.f32.mrf.mxu3  ;;  %3460 = vmatpush.bf16.msra.mxu2 %v4751_v7  ;;  %3386 = vmatmul.bf16.vlgmr.msrb.gmra.mxu0 %v6110_v16  ;;  %v4959_v7 = vor.u32 %v5450_v59, %v4956_v60  ;;  %v4879_v8 = vor.u32 %v5430_v63, %v4876_v39 }
 0x737   :  { %v2468_v24 = vadd.f32 %v2467_v17, %v1677_v58  ;;  %3482 = vmatpush.bf16.msrb.mxu0 %v4911_v15  ;;  %v4887_v58 = vor.u32 %v5432_v51, %v4884_v52  ;;  %v4791_v15 = vor.u32 %v5408_v40, %v4788_v3  ;;  %v4951_v17 = vor.u32 %v5448_v10, %v4948_v11  ;;  %v4916_v51 = vld [vmem:[#allocation20 + $0x288] sm:$0xf0] }
 0x738   :  { %v5092_v40 = vld [vmem:[#allocation20 + $0x3e8] sm:$0xf0] }
 0x739   :  { %v2481_v32 = vadd.f32 %v2480_v18, %v2468_v24  ;;  %3450 = vmatpush.bf16.msra.mxu1 %v4663_v21  ;;  %3472 = vmatpush.bf16.msra.mxu3 %v4823_v23  ;;  %v1678_v18 = vperm.slane %v6090_v62, 6  ;;  %v4940_v21 = vld [vmem:[#allocation20 + $0x2b8] sm:$0xf0]  ;;  %v5426_v23 = vld [vmem:[#allocation20 + $0x214] sm:$0xf] }
 0x73a   :  { %3461 = vmatpush.bf16.msra.mxu2 %v4743_v27  ;;  %v4860_v24 = vld [vmem:[#allocation20 + $0x218] sm:$0xf0]  ;;  %v4943_v27 = vor.u32 %v5446_v20, %v4940_v21  ;;  %v5440_v62 = vld [vmem:[#allocation20 + $0x284] sm:$0xf]  ;;  %v5012_v10 = vld [vmem:[#allocation20 + $0x348] sm:$0xf0] }
 0x73b   :  { %v2541_v0 = vmax.f32 %v2481_v32, 0.0  ;;  %3483 = vmatpush.bf16.msrb.mxu0 %v4903_v33  ;;  %v4863_v29 = vor.u32 %v5426_v23, %v4860_v24  ;;  %v4852_v32 = vld [vmem:[#allocation20 + $0x208] sm:$0xf0]  ;;  %v4919_v59 = vor.u32 %v5440_v62, %v4916_v51  ;;  %v5480_v20 = vld [vmem:[#allocation20 + $0x3c4] sm:$0xf] }
 0x73c   :  { %v5076_v21 = vld [vmem:[#allocation20 + $0x3c8] sm:$0xf0]  ;;  %v5460_v23 = vld [vmem:[#allocation20 + $0x324] sm:$0xf] }
 0x73d   :  { %v6113_v46 = vpack.c.bf16 %v2541_v0, %v2541_v0  ;;  %3473 = vmatpush.bf16.msra.mxu3 %v4815_v41  ;;  %v4996_v24 = vld [vmem:[#allocation20 + $0x328] sm:$0xf0] }
 0x73e   :  { %v2469_v49 = vpop.f32.mrf.mxu2  ;;  %v2482_v50 = vpop.f32.mrf.mxu3  ;;  %3462 = vmatpush.bf16.msra.mxu2 %v4735_v61  ;;  %v5442_v61 = vld [vmem:[#allocation20 + $0x294] sm:$0xf] }
 0x73f   :  { %3399 = vmatmul.bf16.vlgmr.msrb.gmra.mxu1 %v6113_v46  ;;  %3484 = vmatpush.bf16.msrb.mxu0 %v4895_v22  ;;  %v5468_v22 = vld [vmem:[#allocation20 + $0x364] sm:$0xf]  ;;  %v4927_v50 = vor.u32 %v5442_v61, %v4924_v42  ;;  %v5044_v61 = vld [vmem:[#allocation20 + $0x388] sm:$0xf0] }
 0x740   :  { %3495 = vmatpush.bf16.msrb.mxu1 %v4975_v1 }
 0x741   :  { %3474 = vmatpush.bf16.msra.mxu3 %v4807_v55  ;;  %v5031_v55 = vor.u32 %v5468_v22, %v5028_v47 }
 0x742   :  { %3463 = vmatpush.bf16.msra.mxu2 %v4727_v4  ;;  %v5486_v4 = vld [vmem:[#allocation20 + $0x3f4] sm:$0xf] }
 0x743   :  { %3485 = vmatpush.bf16.msrb.mxu0 %v4887_v58  ;;  %v5103_v60 = vor.u32 %v5486_v4, %v5100_v56 }
 0x744   :  { %3496 = vmatpush.bf16.msrb.mxu1 %v4967_v57  ;;  %v5020_v57 = vld [vmem:[#allocation20 + $0x358] sm:$0xf0] }
 0x745   :  { %3475 = vmatpush.bf16.msra.mxu3 %v4799_v2  ;;  %v5023_v39 = vor.u32 %v5466_v35, %v5020_v57  ;;  %v5484_v2 = vld [vmem:[#allocation20 + $0x3e4] sm:$0xf] }
 0x746   :  { %3438 = vmatmul.bf16.vlgmr.msra.gmra.mxu0 %v6094_v12  ;;  %v5424_v12 = vld [vmem:[#allocation20 + $0x204] sm:$0xf]  ;;  %v5095_v11 = vor.u32 %v5484_v2, %v5092_v40 }
 0x747   :  { %3486 = vmatpush.bf16.msrb.mxu0 %v4879_v8  ;;  %v4855_v0 = vor.u32 %v5424_v12, %v4852_v32  ;;  %v5464_v8 = vld [vmem:[#allocation20 + $0x344] sm:$0xf]  ;;  %v5060_v32 = vld [vmem:[#allocation20 + $0x3a8] sm:$0xf0] }
 0x748   :  { %3497 = vmatpush.bf16.msrb.mxu1 %v4959_v7  ;;  %v5015_v13 = vor.u32 %v5464_v8, %v5012_v10  ;;  %v5476_v12 = vld [vmem:[#allocation20 + $0x3a4] sm:$0xf] }
 0x749   :  { %3476 = vmatpush.bf16.msra.mxu3 %v4791_v15  ;;  %v5084_v15 = vld [vmem:[#allocation20 + $0x3d8] sm:$0xf0]  ;;  %v5063_v36 = vor.u32 %v5476_v12, %v5060_v32 }
 0x74b   :  { %3487 = vmatpush.bf16.msrb.mxu0 %v4871_v19 }
 0x74c   :  { %3498 = vmatpush.bf16.msrb.mxu1 %v4951_v17  ;;  %v5004_v17 = vld [vmem:[#allocation20 + $0x338] sm:$0xf0] }
 0x74d   :  { %v2493_v25 = vpop.f32.mrf.mxu0  ;;  %v2506_v26 = vpop.f32.mrf.mxu1 }
 0x74e   :  { %v2494_v28 = vadd.f32 %v2493_v25, %v1678_v18  ;;  %v5087_v18 = vor.u32 %v5482_v14, %v5084_v15  ;;  %v5079_v25 = vor.u32 %v5480_v20, %v5076_v21 }
 0x74f   :  { %3451 = vmatmul.bf16.vlgmr.msra.gmra.mxu1 %v6098_v54  ;;  %3488 = vmatpush.bf16.msrb.mxu0 %v4863_v29  ;;  %v5458_v29 = vld [vmem:[#allocation20 + $0x314] sm:$0xf] }
 0x750   :  { %v2507_v33 = vadd.f32 %v2506_v26, %v2494_v28  ;;  %3499 = vmatpush.bf16.msrb.mxu1 %v4943_v27  ;;  %v4999_v26 = vor.u32 %v5460_v23, %v4996_v24  ;;  %v5478_v27 = vld [vmem:[#allocation20 + $0x3b4] sm:$0xf]  ;;  %v5068_v28 = vld [vmem:[#allocation20 + $0x3b8] sm:$0xf0] }
 0x751   :  { %v5071_v30 = vor.u32 %v5478_v27, %v5068_v28 }
 0x752   :  { %v2542_v41 = vmax.f32 %v2507_v33, 0.0  ;;  %v5456_v33 = vld [vmem:[#allocation20 + $0x304] sm:$0xf] }
 0x753   :  { %3489 = vmatpush.bf16.msrb.mxu0 %v4855_v0  ;;  %v5472_v0 = vld [vmem:[#allocation20 + $0x384] sm:$0xf] }
 0x754   :  { %v6120_v1 = vpack.c.bf16 %v2542_v41, %v2542_v41  ;;  %3500 = vmatpush.bf16.msrb.mxu1 %v4935_v38  ;;  %v5052_v38 = vld [vmem:[#allocation20 + $0x398] sm:$0xf0]  ;;  %v5047_v42 = vor.u32 %v5472_v0, %v5044_v61 }
 0x755   :  { %v2519_v44 = vpop.f32.mrf.mxu2  ;;  %v2532_v45 = vpop.f32.mrf.mxu3 }
 0x756   :  { %v2520_v48 = vadd.f32 %v2519_v44, %v1679_v37  ;;  %v2495_v54 = vpop.f32.mrf.mxu0  ;;  %v2508_v49 = vpop.f32.mrf.mxu1  ;;  %3412 = vmatmul.bf16.vlgmr.msrb.gmra.mxu2 %v6120_v1  ;;  %3490 = vmatmul.bf16.vlgmr.msrb.gmra.mxu0 %v6110_v16  ;;  %v5462_v16 = vld [vmem:[#allocation20 + $0x334] sm:$0xf] }
 0x757   :  { %3508 = vmatpush.bf16.msrb.mxu2 %v5039_v43  ;;  %v5007_v19 = vor.u32 %v5462_v16, %v5004_v17  ;;  %v5474_v37 = vld [vmem:[#allocation20 + $0x394] sm:$0xf] }
 0x758   :  { %v2533_v52 = vadd.f32 %v2532_v45, %v2520_v48  ;;  %3501 = vmatpush.bf16.msrb.mxu1 %v4927_v50  ;;  %v5055_v41 = vor.u32 %v5474_v37, %v5052_v38 }
 0x75a   :  { %v2543_v58 = vmax.f32 %v2533_v52, 0.0 }
 0x75b   :  { %3509 = vmatpush.bf16.msrb.mxu2 %v5031_v55 }
 0x75c   :  { %v2551_v63 = vpack.c.bf16 %v2543_v58, %v2543_v58  ;;  %3502 = vmatpush.bf16.msrb.mxu1 %v4919_v59 }
 0x75d   :  { %v2521_v3 = vpop.f32.mrf.mxu2  ;;  %v2534_v7 = vpop.f32.mrf.mxu3 }
 0x75e   :  { %3425 = vmatmul.bf16.vlgmr.msrb.gmra.mxu3 %v2551_v63 }
 0x75f   :  { %3521 = vmatpush.bf16.msrb.mxu3 %v5103_v60  ;;  %3510 = vmatpush.bf16.msrb.mxu2 %v5023_v39 }
 0x760   :  { %3503 = vmatmul.bf16.vlgmr.msrb.gmra.mxu1 %v6113_v46  ;;  %v4988_v46 = vld [vmem:[#allocation20 + $0x318] sm:$0xf0] }
 0x761   :  { %v4991_v31 = vor.u32 %v5458_v29, %v4988_v46 }
 0x763   :  { %3522 = vmatpush.bf16.msrb.mxu3 %v5095_v11  ;;  %3511 = vmatpush.bf16.msrb.mxu2 %v5015_v13 }
 0x766   :  { %3464 = vmatmul.bf16.vlgmr.msra.gmra.mxu2 %v6102_v5  ;;  %v4983_v5 = vor.u32 %v5456_v33, %v4980_v34 }
 0x767   :  { %3523 = vmatpush.bf16.msrb.mxu3 %v5087_v18  ;;  %3512 = vmatpush.bf16.msrb.mxu2 %v5007_v19 }
 0x76b   :  { %3524 = vmatpush.bf16.msrb.mxu3 %v5079_v25  ;;  %3513 = vmatpush.bf16.msrb.mxu2 %v4999_v26 }
 0x76e   :  { %3477 = vmatmul.bf16.vlgmr.msra.gmra.mxu3 %v6106_v53 }
 0x76f   :  { %3525 = vmatpush.bf16.msrb.mxu3 %v5071_v30  ;;  %3514 = vmatpush.bf16.msrb.mxu2 %v4991_v31 }
 0x773   :  { %3526 = vmatpush.bf16.msrb.mxu3 %v5063_v36  ;;  %3515 = vmatpush.bf16.msrb.mxu2 %v4983_v5 }
 0x776   :  { %3516 = vmatmul.bf16.vlgmr.msrb.gmra.mxu2 %v6120_v1  ;;  %v2680_v1 = vld [vmem:[%s6148_s12] sm:$0x3]  ;;  %s5853_s12 = smov [#allocation21]  }
 0x777   :  { %3527 = vmatpush.bf16.msrb.mxu3 %v5055_v41  ;;  %v2682_v56 = vperm.slane %v2680_v1, 0  ;;  %v2683_v18 = vperm.slane %v2680_v1, 1  ;;  %s3543_s22 = sshll.u32 %s5853_s12, 4  ;;  %s3544_s22 = int_to_ptr.vmem [resolvable:$true] %s3543_s22 }
 0x77b   :  { %3528 = vmatpush.bf16.msrb.mxu3 %v5047_v42 }
 0x77e   :  { %3529 = vmatmul.bf16.vlgmr.msrb.gmra.mxu3 %v2551_v63 }
 0x792   :  { %v3335_v43 = vpop.f32.mrf.mxu0 }
 0x793   :  { %v3336_v35 = vadd.f32 %v3335_v43, %v2682_v56 }
 0x799   :  { %v3348_v44 = vpop.f32.mrf.mxu1 }
 0x79a   :  { %v3337_v53 = vpop.f32.mrf.mxu0  ;;  %v3349_v57 = vadd.f32 %v3348_v44, %v3336_v35 }
 0x7a1   :  { %v3350_v45 = vpop.f32.mrf.mxu1 }
 0x7a8   :  { %v3361_v22 = vpop.f32.mrf.mxu2 }
 0x7a9   :  { %v3362_v60 = vadd.f32 %v3361_v22, %v3349_v57 }
 0x7af   :  { %v3374_v47 = vpop.f32.mrf.mxu3 }
 0x7b0   :  { %v3363_v48 = vpop.f32.mrf.mxu2  ;;  %v3375_v63 = vadd.f32 %v3374_v47, %v3362_v60 }
 0x7b3   :  { %v3387_v54 = vpop.f32.mrf.mxu0 }
 0x7b4   :  { %v3388_v2 = vadd.f32 %v3387_v54, %v3375_v63 }
 0x7b7   :  { %v3376_v49 = vpop.f32.mrf.mxu3 }
 0x7bb   :  { %v3389_v62 = vpop.f32.mrf.mxu0 }
 0x7bc   :  { %v3400_v50 = vpop.f32.mrf.mxu1 }
 0x7bd   :  { %v3401_v40 = vadd.f32 %v3400_v50, %v3388_v2 }
 0x7c3   :  { %v3439_v52 = vpop.f32.mrf.mxu0 }
 0x7c4   :  { %v3402_v51 = vpop.f32.mrf.mxu1  ;;  %v3440_v19 = vadd.f32 %v3439_v52, %v2683_v18 }
 0x7cb   :  { %v3441_v4 = vpop.f32.mrf.mxu0 }
 0x7cc   :  { %v3452_v55 = vpop.f32.mrf.mxu1 }
 0x7cd   :  { %v3453_v21 = vadd.f32 %v3452_v55, %v3440_v19 }
 0x7d3   :  { %v3491_v59 = vpop.f32.mrf.mxu0 }
 0x7d4   :  { %v3454_v58 = vpop.f32.mrf.mxu1 }
 0x7d9   :  { %v3413_v39 = vpop.f32.mrf.mxu2 }
 0x7da   :  { %v3414_v8 = vadd.f32 %v3413_v39, %v3401_v40 }
 0x7db   :  { %v3493_v7 = vpop.f32.mrf.mxu0 }
 0x7dd   :  { %v3504_v3 = vpop.f32.mrf.mxu1 }
 0x7e1   :  { %v3426_v10 = vpop.f32.mrf.mxu3  ;;  %v3415_v13 = vpop.f32.mrf.mxu2 }
 0x7e2   :  { %v3427_v11 = vadd.f32 %v3426_v10, %v3414_v8 }
 0x7e4   :  { %v3534_v14 = vadd.f32 %v3427_v11, %v6047_v9 }
 0x7e5   :  { %v3506_v15 = vpop.f32.mrf.mxu1 }
 0x7e6   :  { %3536 = vst [vmem:[#allocation21] sm:$0xff] %v3534_v14 }
 0x7e9   :  { %v3428_v16 = vpop.f32.mrf.mxu3  ;;  %v3465_v17 = vpop.f32.mrf.mxu2 }
 0x7ea   :  { %v3466_v24 = vadd.f32 %v3465_v17, %v3453_v21 }
 0x7f1   :  { %v3478_v20 = vpop.f32.mrf.mxu3  ;;  %v3467_v23 = vpop.f32.mrf.mxu2 }
 0x7f2   :  { %v3479_v25 = vadd.f32 %v3478_v20, %v3466_v24 }
 0x7f4   :  { %v3492_v27 = vadd.f32 %v3491_v59, %v3479_v25 }
 0x7f6   :  { %v3505_v29 = vadd.f32 %v3504_v3, %v3492_v27 }
 0x7f9   :  { %v3480_v26 = vpop.f32.mrf.mxu3  ;;  %v3517_v28 = vpop.f32.mrf.mxu2 }
 0x7fa   :  { %v3518_v46 = vadd.f32 %v3517_v28, %v3505_v29 }
 0x801   :  { %v3530_v30 = vpop.f32.mrf.mxu3  ;;  %v3519_v31 = vpop.f32.mrf.mxu2 }
 0x802   :  { %v3531_v9 = vadd.f32 %v3530_v30, %v3518_v46 }
 0x804   :  { %v3535_v12 = vadd.f32 %v3531_v9, %v6049_v6 }
 0x806   :  { %3537 = vst [vmem:[#allocation21 + $0x8] sm:$0xff] %v3535_v12 }
 0x807   :  { %3548 = dma.vmem_to_hbm [thread:$0]  %s3544_s22, 256, %s3546_s26, [#allocation5]  }
 0x809   :  { %v3532_v32 = vpop.f32.mrf.mxu3 }
 0x80a   :  { %5832 = dma.done.wait [#allocation5], 256  }
 0x80b   :  { %5833 = vsyncadd [#allocation5], 4294967040 }
 0x80c   :  { %3553 = vsyncpa [#allocation4], 1 }
 0x80d   :  { %3554 = vsyncpa [#allocation7], 1 }
 0x80e   :  { %3555 = vsyncpa [#allocation10], 1 }
 0x80f   :  { %3556 = vsyncpa [#allocation13], 1 }
 0x810   :  { %3557 = vsyncpa [#allocation16], 1 }
 0x811   :  { %3558 = vsyncpa [#allocation19], 1 }
 0x812   :  { %3559 = vsyncpa [#allocation5], 1 }

</bundles_post_ra>
